<compile_context>
chip_gen: v7x
topology: tpu7x:2x2x1
jax: 0.10.0
libtpu: 0.0.40
codegen_flags: <defaults>
</compile_context>

<pallas_src>
import numpy as np
import jax
import jax.numpy as jnp
from jax.experimental import pallas as pl
from jax.experimental.pallas import tpu as pltpu


B_TILE_MAX = 256  # documents per grid step upper bound (sweep 128-512 on real batches)


def _round_up(x, m):
    return ((x + m - 1) // m) * m


def _pick_b_tile(batch, max_tile=B_TILE_MAX):
    """Sublane-aligned tile; small batches get small tiles, big batches get >=2 steps."""
    padded = _round_up(max(batch, 1), 8)
    if padded <= max_tile:
        return padded
    num_tiles = -(-padded // max_tile)                 # ceil
    return _round_up(-(-padded // num_tiles), 8)       # near-even split, <= max_tile


def doc_encoder_kernel(ids_ref, table_ref, wt_ref, out_ref, e_scr):
    """One (Bt, L) tile of token ids -> (Bt, D) attended document vectors.

    ids_ref:   (Bt, L)  int32 token ids, -1 = padding (kernel applies the +1 shift)
    table_ref: (Vp, D)  bfloat16 embedding table (row 0 = pad row), VMEM-resident
    wt_ref:    (D, D)   bfloat16 W_b^T, VMEM-resident
    out_ref:   (Bt, D)  float32 attended document vectors
    e_scr:     (L, Bt, D) float32 scratch holding the gathered per-token embeddings
    """
    Bt, L = ids_ref.shape
    Vp, D = table_ref.shape

    ids = ids_ref[...] + 1                                    # pad(-1) -> table row 0
    table = table_ref[...]                                    # (Vp, D) bf16
    vocab_iota = jax.lax.broadcasted_iota(jnp.int32, (Bt, Vp), 1)

    # ---- Phase 1: fused embedding gather (one-hot @ table on the MXU) + mean -------
    hid_acc = jnp.zeros((Bt, D), jnp.float32)
    for l in range(L):
        eq = ids[:, l:l + 1] == vocab_iota                    # (Bt, Vp) bool
        onehot = jnp.where(eq, 1.0, 0.0).astype(jnp.bfloat16)
        # Exact row pick: one non-zero per row, f32 accumulation of bf16 table values.
        e_l = jnp.dot(onehot, table, preferred_element_type=jnp.float32)   # (Bt, D)
        e_scr[l] = e_l
        hid_acc = hid_acc + e_l
    hidden = hid_acc * (1.0 / L)                              # (Bt, D) mean over tokens

    # v[b] = W_b @ hidden_0[b] == hidden_0 @ W_b^T   (bf16 MXU, f32 accumulate)
    v = jnp.dot(hidden.astype(jnp.bfloat16), wt_ref[...],
                preferred_element_type=jnp.float32)           # (Bt, D)

    # ---- Phase 2: scores[b, l] = E[b, l, :] . v[b, :]  (== (E @ W_b) . hidden_0) ---
    score_cols = []
    for l in range(L):
        score_cols.append(jnp.sum(e_scr[l] * v, axis=-1, keepdims=True))   # (Bt, 1)
    scores = jnp.concatenate(score_cols, axis=1)              # (Bt, L)

    # softmax over the token axis; denominator reciprocal goes to the EUP slot
    m = jnp.max(scores, axis=-1, keepdims=True)
    p = jnp.exp(scores - m)
    a = p * pl.reciprocal(jnp.sum(p, axis=-1, keepdims=True), approx=True)  # (Bt, L)

    # ---- Phase 3: ct[b, :] = sum_l a[b, l] * E[b, l, :] ---------------------------
    ct = jnp.zeros((Bt, D), jnp.float32)
    for l in range(L):
        ct = ct + a[:, l:l + 1] * e_scr[l]
    out_ref[...] = ct                                         # (Bt, D) lane-dense store


def _attended_docs(ids_padded, table_bf16, wt_bf16, b_tile):
    Bp, L = ids_padded.shape
    Vp, D = table_bf16.shape
    assert Bp % b_tile == 0
    return pl.pallas_call(
        doc_encoder_kernel,
        out_shape=jax.ShapeDtypeStruct((Bp, D), jnp.float32),
        grid_spec=pltpu.PrefetchScalarGridSpec(
            num_scalar_prefetch=0,
            grid=(Bp // b_tile,),
            in_specs=[
                pl.BlockSpec((b_tile, L), lambda b: (b, 0)),   # token ids (only per-doc HBM read)
                pl.BlockSpec((Vp, D), lambda b: (0, 0)),       # embedding table stays resident
                pl.BlockSpec((D, D), lambda b: (0, 0)),        # W_b^T stays resident
            ],
            out_specs=pl.BlockSpec((b_tile, D), lambda b: (b, 0)),
            scratch_shapes=[pltpu.VMEM((L, b_tile, D), jnp.float32)],
        ),
        compiler_params=pltpu.CompilerParams(
            dimension_semantics=("parallel",)),                # v7x: split batch across TCs
    )(ids_padded, table_bf16, wt_bf16)


def pad_and_stack(docs, max_len):
    """Original forward's pad/truncate-with(-1) semantics, applied to a list of docs."""
    rows = []
    for x in docs:
        x = np.asarray(x, dtype=np.int64)
        if len(x) > max_len:
            row = x[:max_len]
        else:
            row = np.pad(x, (0, max_len - len(x)), 'constant', constant_values=-1)
        rows.append(row)
    return jnp.asarray(np.stack(rows), dtype=jnp.int32)


@jax.jit
def document_encoder_forward_batch(ids, emb_table, w_b):
    """ids: (B, max_len) int32 padded with -1. Returns (B, D) float32 doc vectors."""
    B, L = ids.shape
    V1, D = emb_table.shape                      # V1 = vocab_size + 1 (row 0 = pad row)
    # Pad the table row count to a lane-aligned contraction dim for the one-hot gather;
    # padded rows are never selected (ids + 1 <= vocab_size).
    Vp = _round_up(V1, 128)
    table_bf16 = jnp.pad(emb_table, ((0, Vp - V1), (0, 0))).astype(jnp.bfloat16)
    wt_bf16 = w_b.T.astype(jnp.bfloat16)

    b_tile = _pick_b_tile(B)
    Bp = _round_up(B, b_tile)
    ids_p = jnp.pad(ids, ((0, Bp - B), (0, 0)), constant_values=-1)
    out = _attended_docs(ids_p, table_bf16, wt_bf16, b_tile)
    return out[:B]


def document_encoder_forward(x_tokens, max_len, emb_table, w_b):
    """Single-document path matching the original module forward: returns (1, D)."""
    ids = pad_and_stack([list(x_tokens)], max_len)            # (1, L)
    return document_encoder_forward_batch(ids, emb_table, w_b)


def _reference(ids, emb_table, w_b):
    """Pure-JAX reference in the ORIGINAL (un-rewritten) formulation, on the same
    bf16-quantized parameters, to validate the algebraic rewrite + fused gather."""
    e = jnp.take(emb_table.astype(jnp.bfloat16), ids + 1, axis=0).astype(jnp.float32)
    w = w_b.astype(jnp.bfloat16).astype(jnp.float32)
    hidden = e.mean(axis=1)                                                  # (B, D)
    ha = jnp.einsum('bld,dk->blk', e, w, precision=jax.lax.Precision.HIGHEST)
    scores = jnp.einsum('blk,bk->bl', ha, hidden, precision=jax.lax.Precision.HIGHEST)
    a = jax.nn.softmax(scores, axis=-1)
    return jnp.einsum('bl,bld->bd', a, e, precision=jax.lax.Precision.HIGHEST)


if __name__ == "__main__":
    vocab_size = 50
    embedding_dim = 128      # lane-dense
    max_len = 8
    batch = 272              # -> 2 grid steps of 136 docs (exercises tiling + 2-TC split)

    key = jax.random.PRNGKey(0)
    k_emb, k_w, k_tok = jax.random.split(key, 3)

    # Deterministic synthetic parameters (no checkpoint load).
    # Embedding table has vocab_size + 1 rows since lookups use (encodes + 1).
    embedding_table = jax.random.normal(
        k_emb, (vocab_size + 1, embedding_dim), dtype=jnp.float32) * 0.1
    bound = float(np.sqrt(6.0 / (embedding_dim + embedding_dim)))     # xavier_uniform_
    w_b = jax.random.uniform(
        k_w, (embedding_dim, embedding_dim),
        minval=-bound, maxval=bound, dtype=jnp.float32)

    # A deterministic batch of variable-length documents (some shorter than max_len).
    tok_mat = np.asarray(jax.random.randint(k_tok, (batch, max_len), 0, vocab_size))
    rng = np.random.RandomState(0)
    lengths = rng.randint(1, max_len + 1, size=batch)
    docs = [tok_mat[i, :lengths[i]].tolist() for i in range(batch)]

    ids = pad_and_stack(docs, max_len)                        # (272, 8) int32, -1 padded

    out = jax.block_until_ready(document_encoder_forward_batch(ids, embedding_table, w_b))
    assert out.shape == (batch, embedding_dim)

    # Tolerance covers bf16 MXU operands, the extra bf16 rounding of hidden, and the
    # approximate EUP reciprocal in the softmax; real bugs give O(1) errors.
    ref = _reference(ids, embedding_table, w_b)
    np.testing.assert_allclose(np.asarray(out), np.asarray(ref),
                               rtol=1e-2, atol=5e-4)

    # Single-document path matching the original module forward (returns (1, D)).
    doc_out = jax.block_until_ready(
        document_encoder_forward(docs[0], max_len, embedding_table, w_b))
    assert doc_out.shape == (1, embedding_dim)
    np.testing.assert_allclose(np.asarray(doc_out), np.asarray(ref[0:1]),
                               rtol=1e-2, atol=5e-4)

    print("KERNEL_OK")
</pallas_src>

<mosaic_0001>
module attributes {stable_mosaic.version = 11 : i64} {
  func.func @doc_encoder_kernel(%arg0: i32, %arg1: memref<136x8xi32, #tpu.memory_space<vmem>>, %arg2: memref<128x128xbf16, #tpu.memory_space<vmem>>, %arg3: memref<128x128xbf16, #tpu.memory_space<vmem>>, %arg4: memref<136x128xf32, #tpu.memory_space<vmem>>, %arg5: memref<8x136x128xf32, #tpu.memory_space<vmem>>) attributes {dimension_semantics = [#tpu.dimension_semantics<parallel>], iteration_bounds = array<i64: 2>, scalar_prefetch = 0 : i64, scratch_operands = 1 : i64, tpu.core_type = #tpu.core_type<tc>, window_params = [{transform_indices = @transform_0, window_bounds = array<i64: 136, 8>}, {pipeline_mode = #tpu.pipeline_mode<synchronous>, transform_indices = @transform_1, window_bounds = array<i64: 128, 128>}, {pipeline_mode = #tpu.pipeline_mode<synchronous>, transform_indices = @transform_2, window_bounds = array<i64: 128, 128>}, {transform_indices = @transform_3, window_bounds = array<i64: 136, 128>}]} {
    %c0 = arith.constant 0 : index
    %c0_0 = arith.constant 0 : index
    %0 = vector.load %arg1[%c0, %c0_0] : memref<136x8xi32, #tpu.memory_space<vmem>>, vector<136x8xi32>
    %c1_i32 = arith.constant 1 : i32
    %1 = vector.broadcast %c1_i32 : i32 to vector<136x8xi32>
    %2 = arith.addi %0, %1 : vector<136x8xi32>
    %c0_1 = arith.constant 0 : index
    %c0_2 = arith.constant 0 : index
    %3 = vector.load %arg2[%c0_1, %c0_2] : memref<128x128xbf16, #tpu.memory_space<vmem>>, vector<128x128xbf16>
    %4 = tpu.iota {dimensions = array<i32: 1>} : vector<136x128xi32>
    %cst = arith.constant 0.000000e+00 : f32
    %5 = vector.broadcast %cst : f32 to vector<136x128xf32>
    %6 = vector.extract_strided_slice %2 {offsets = [0, 0], sizes = [136, 1], strides = [1, 1]} : vector<136x8xi32> to vector<136x1xi32>
    %7 = vector.broadcast %6 : vector<136x1xi32> to vector<136x128xi32>
    %8 = arith.cmpi eq, %7, %4 : vector<136x128xi32>
    %cst_3 = arith.constant 1.000000e+00 : f32
    %cst_4 = arith.constant 0.000000e+00 : f32
    %9 = vector.broadcast %cst_3 : f32 to vector<136x128xf32>
    %10 = vector.broadcast %cst_4 : f32 to vector<136x128xf32>
    %11 = arith.select %8, %9, %10 : vector<136x128xi1>, vector<136x128xf32>
    %12 = arith.truncf %11 : vector<136x128xf32> to vector<136x128xbf16>
    %cst_5 = arith.constant dense<0.000000e+00> : vector<136x128xf32>
    %13 = tpu.matmul %12, %3, %cst_5 {dimension_numbers = #tpu.dot_dimension_numbers<[1], [0], [0], [1], [0, 0, 1, 1], [], []>} : vector<136x128xbf16>, vector<128x128xbf16>, vector<136x128xf32> -> vector<136x128xf32>
    %c0_6 = arith.constant 0 : index
    %c0_7 = arith.constant 0 : index
    %c0_8 = arith.constant 0 : index
    %14 = vector.load %arg5[%c0_6, %c0_7, %c0_8] : memref<8x136x128xf32, #tpu.memory_space<vmem>>, vector<1x136x128xf32>
    %15 = vector.shape_cast %14 : vector<1x136x128xf32> to vector<136x128xf32>
    %16 = vector.shape_cast %13 : vector<136x128xf32> to vector<1x136x128xf32>
    tpu.vector_store %arg5[%c0_6, %c0_7, %c0_8], %16 {strides = array<i32>} : memref<8x136x128xf32, #tpu.memory_space<vmem>>, vector<1x136x128xf32>,
    %17 = arith.addf %5, %13 : vector<136x128xf32>
    %18 = vector.extract_strided_slice %2 {offsets = [0, 1], sizes = [136, 1], strides = [1, 1]} : vector<136x8xi32> to vector<136x1xi32>
    %19 = vector.broadcast %18 : vector<136x1xi32> to vector<136x128xi32>
    %20 = arith.cmpi eq, %19, %4 : vector<136x128xi32>
    %cst_9 = arith.constant 1.000000e+00 : f32
    %cst_10 = arith.constant 0.000000e+00 : f32
    %21 = vector.broadcast %cst_9 : f32 to vector<136x128xf32>
    %22 = vector.broadcast %cst_10 : f32 to vector<136x128xf32>
    %23 = arith.select %20, %21, %22 : vector<136x128xi1>, vector<136x128xf32>
    %24 = arith.truncf %23 : vector<136x128xf32> to vector<136x128xbf16>
    %cst_11 = arith.constant dense<0.000000e+00> : vector<136x128xf32>
    %25 = tpu.matmul %24, %3, %cst_11 {dimension_numbers = #tpu.dot_dimension_numbers<[1], [0], [0], [1], [0, 0, 1, 1], [], []>} : vector<136x128xbf16>, vector<128x128xbf16>, vector<136x128xf32> -> vector<136x128xf32>
    %c1 = arith.constant 1 : index
    %c0_12 = arith.constant 0 : index
    %c0_13 = arith.constant 0 : index
    %26 = vector.load %arg5[%c1, %c0_12, %c0_13] : memref<8x136x128xf32, #tpu.memory_space<vmem>>, vector<1x136x128xf32>
    %27 = vector.shape_cast %26 : vector<1x136x128xf32> to vector<136x128xf32>
    %28 = vector.shape_cast %25 : vector<136x128xf32> to vector<1x136x128xf32>
    tpu.vector_store %arg5[%c1, %c0_12, %c0_13], %28 {strides = array<i32>} : memref<8x136x128xf32, #tpu.memory_space<vmem>>, vector<1x136x128xf32>,
    %29 = arith.addf %17, %25 : vector<136x128xf32>
    %30 = vector.extract_strided_slice %2 {offsets = [0, 2], sizes = [136, 1], strides = [1, 1]} : vector<136x8xi32> to vector<136x1xi32>
    %31 = vector.broadcast %30 : vector<136x1xi32> to vector<136x128xi32>
    %32 = arith.cmpi eq, %31, %4 : vector<136x128xi32>
    %cst_14 = arith.constant 1.000000e+00 : f32
    %cst_15 = arith.constant 0.000000e+00 : f32
    %33 = vector.broadcast %cst_14 : f32 to vector<136x128xf32>
    %34 = vector.broadcast %cst_15 : f32 to vector<136x128xf32>
    %35 = arith.select %32, %33, %34 : vector<136x128xi1>, vector<136x128xf32>
    %36 = arith.truncf %35 : vector<136x128xf32> to vector<136x128xbf16>
    %cst_16 = arith.constant dense<0.000000e+00> : vector<136x128xf32>
    %37 = tpu.matmul %36, %3, %cst_16 {dimension_numbers = #tpu.dot_dimension_numbers<[1], [0], [0], [1], [0, 0, 1, 1], [], []>} : vector<136x128xbf16>, vector<128x128xbf16>, vector<136x128xf32> -> vector<136x128xf32>
    %c2 = arith.constant 2 : index
    %c0_17 = arith.constant 0 : index
    %c0_18 = arith.constant 0 : index
    %38 = vector.load %arg5[%c2, %c0_17, %c0_18] : memref<8x136x128xf32, #tpu.memory_space<vmem>>, vector<1x136x128xf32>
    %39 = vector.shape_cast %38 : vector<1x136x128xf32> to vector<136x128xf32>
    %40 = vector.shape_cast %37 : vector<136x128xf32> to vector<1x136x128xf32>
    tpu.vector_store %arg5[%c2, %c0_17, %c0_18], %40 {strides = array<i32>} : memref<8x136x128xf32, #tpu.memory_space<vmem>>, vector<1x136x128xf32>,
    %41 = arith.addf %29, %37 : vector<136x128xf32>
    %42 = vector.extract_strided_slice %2 {offsets = [0, 3], sizes = [136, 1], strides = [1, 1]} : vector<136x8xi32> to vector<136x1xi32>
    %43 = vector.broadcast %42 : vector<136x1xi32> to vector<136x128xi32>
    %44 = arith.cmpi eq, %43, %4 : vector<136x128xi32>
    %cst_19 = arith.constant 1.000000e+00 : f32
    %cst_20 = arith.constant 0.000000e+00 : f32
    %45 = vector.broadcast %cst_19 : f32 to vector<136x128xf32>
    %46 = vector.broadcast %cst_20 : f32 to vector<136x128xf32>
    %47 = arith.select %44, %45, %46 : vector<136x128xi1>, vector<136x128xf32>
    %48 = arith.truncf %47 : vector<136x128xf32> to vector<136x128xbf16>
    %cst_21 = arith.constant dense<0.000000e+00> : vector<136x128xf32>
    %49 = tpu.matmul %48, %3, %cst_21 {dimension_numbers = #tpu.dot_dimension_numbers<[1], [0], [0], [1], [0, 0, 1, 1], [], []>} : vector<136x128xbf16>, vector<128x128xbf16>, vector<136x128xf32> -> vector<136x128xf32>
    %c3 = arith.constant 3 : index
    %c0_22 = arith.constant 0 : index
    %c0_23 = arith.constant 0 : index
    %50 = vector.load %arg5[%c3, %c0_22, %c0_23] : memref<8x136x128xf32, #tpu.memory_space<vmem>>, vector<1x136x128xf32>
    %51 = vector.shape_cast %50 : vector<1x136x128xf32> to vector<136x128xf32>
    %52 = vector.shape_cast %49 : vector<136x128xf32> to vector<1x136x128xf32>
    tpu.vector_store %arg5[%c3, %c0_22, %c0_23], %52 {strides = array<i32>} : memref<8x136x128xf32, #tpu.memory_space<vmem>>, vector<1x136x128xf32>,
    %53 = arith.addf %41, %49 : vector<136x128xf32>
    %54 = vector.extract_strided_slice %2 {offsets = [0, 4], sizes = [136, 1], strides = [1, 1]} : vector<136x8xi32> to vector<136x1xi32>
    %55 = vector.broadcast %54 : vector<136x1xi32> to vector<136x128xi32>
    %56 = arith.cmpi eq, %55, %4 : vector<136x128xi32>
    %cst_24 = arith.constant 1.000000e+00 : f32
    %cst_25 = arith.constant 0.000000e+00 : f32
    %57 = vector.broadcast %cst_24 : f32 to vector<136x128xf32>
    %58 = vector.broadcast %cst_25 : f32 to vector<136x128xf32>
    %59 = arith.select %56, %57, %58 : vector<136x128xi1>, vector<136x128xf32>
    %60 = arith.truncf %59 : vector<136x128xf32> to vector<136x128xbf16>
    %cst_26 = arith.constant dense<0.000000e+00> : vector<136x128xf32>
    %61 = tpu.matmul %60, %3, %cst_26 {dimension_numbers = #tpu.dot_dimension_numbers<[1], [0], [0], [1], [0, 0, 1, 1], [], []>} : vector<136x128xbf16>, vector<128x128xbf16>, vector<136x128xf32> -> vector<136x128xf32>
    %c4 = arith.constant 4 : index
    %c0_27 = arith.constant 0 : index
    %c0_28 = arith.constant 0 : index
    %62 = vector.load %arg5[%c4, %c0_27, %c0_28] : memref<8x136x128xf32, #tpu.memory_space<vmem>>, vector<1x136x128xf32>
    %63 = vector.shape_cast %62 : vector<1x136x128xf32> to vector<136x128xf32>
    %64 = vector.shape_cast %61 : vector<136x128xf32> to vector<1x136x128xf32>
    tpu.vector_store %arg5[%c4, %c0_27, %c0_28], %64 {strides = array<i32>} : memref<8x136x128xf32, #tpu.memory_space<vmem>>, vector<1x136x128xf32>,
    %65 = arith.addf %53, %61 : vector<136x128xf32>
    %66 = vector.extract_strided_slice %2 {offsets = [0, 5], sizes = [136, 1], strides = [1, 1]} : vector<136x8xi32> to vector<136x1xi32>
    %67 = vector.broadcast %66 : vector<136x1xi32> to vector<136x128xi32>
    %68 = arith.cmpi eq, %67, %4 : vector<136x128xi32>
    %cst_29 = arith.constant 1.000000e+00 : f32
    %cst_30 = arith.constant 0.000000e+00 : f32
    %69 = vector.broadcast %cst_29 : f32 to vector<136x128xf32>
    %70 = vector.broadcast %cst_30 : f32 to vector<136x128xf32>
    %71 = arith.select %68, %69, %70 : vector<136x128xi1>, vector<136x128xf32>
    %72 = arith.truncf %71 : vector<136x128xf32> to vector<136x128xbf16>
    %cst_31 = arith.constant dense<0.000000e+00> : vector<136x128xf32>
    %73 = tpu.matmul %72, %3, %cst_31 {dimension_numbers = #tpu.dot_dimension_numbers<[1], [0], [0], [1], [0, 0, 1, 1], [], []>} : vector<136x128xbf16>, vector<128x128xbf16>, vector<136x128xf32> -> vector<136x128xf32>
    %c5 = arith.constant 5 : index
    %c0_32 = arith.constant 0 : index
    %c0_33 = arith.constant 0 : index
    %74 = vector.load %arg5[%c5, %c0_32, %c0_33] : memref<8x136x128xf32, #tpu.memory_space<vmem>>, vector<1x136x128xf32>
    %75 = vector.shape_cast %74 : vector<1x136x128xf32> to vector<136x128xf32>
    %76 = vector.shape_cast %73 : vector<136x128xf32> to vector<1x136x128xf32>
    tpu.vector_store %arg5[%c5, %c0_32, %c0_33], %76 {strides = array<i32>} : memref<8x136x128xf32, #tpu.memory_space<vmem>>, vector<1x136x128xf32>,
    %77 = arith.addf %65, %73 : vector<136x128xf32>
    %78 = vector.extract_strided_slice %2 {offsets = [0, 6], sizes = [136, 1], strides = [1, 1]} : vector<136x8xi32> to vector<136x1xi32>
    %79 = vector.broadcast %78 : vector<136x1xi32> to vector<136x128xi32>
    %80 = arith.cmpi eq, %79, %4 : vector<136x128xi32>
    %cst_34 = arith.constant 1.000000e+00 : f32
    %cst_35 = arith.constant 0.000000e+00 : f32
    %81 = vector.broadcast %cst_34 : f32 to vector<136x128xf32>
    %82 = vector.broadcast %cst_35 : f32 to vector<136x128xf32>
    %83 = arith.select %80, %81, %82 : vector<136x128xi1>, vector<136x128xf32>
    %84 = arith.truncf %83 : vector<136x128xf32> to vector<136x128xbf16>
    %cst_36 = arith.constant dense<0.000000e+00> : vector<136x128xf32>
    %85 = tpu.matmul %84, %3, %cst_36 {dimension_numbers = #tpu.dot_dimension_numbers<[1], [0], [0], [1], [0, 0, 1, 1], [], []>} : vector<136x128xbf16>, vector<128x128xbf16>, vector<136x128xf32> -> vector<136x128xf32>
    %c6 = arith.constant 6 : index
    %c0_37 = arith.constant 0 : index
    %c0_38 = arith.constant 0 : index
    %86 = vector.load %arg5[%c6, %c0_37, %c0_38] : memref<8x136x128xf32, #tpu.memory_space<vmem>>, vector<1x136x128xf32>
    %87 = vector.shape_cast %86 : vector<1x136x128xf32> to vector<136x128xf32>
    %88 = vector.shape_cast %85 : vector<136x128xf32> to vector<1x136x128xf32>
    tpu.vector_store %arg5[%c6, %c0_37, %c0_38], %88 {strides = array<i32>} : memref<8x136x128xf32, #tpu.memory_space<vmem>>, vector<1x136x128xf32>,
    %89 = arith.addf %77, %85 : vector<136x128xf32>
    %90 = vector.extract_strided_slice %2 {offsets = [0, 7], sizes = [136, 1], strides = [1, 1]} : vector<136x8xi32> to vector<136x1xi32>
    %91 = vector.broadcast %90 : vector<136x1xi32> to vector<136x128xi32>
    %92 = arith.cmpi eq, %91, %4 : vector<136x128xi32>
    %cst_39 = arith.constant 1.000000e+00 : f32
    %cst_40 = arith.constant 0.000000e+00 : f32
    %93 = vector.broadcast %cst_39 : f32 to vector<136x128xf32>
    %94 = vector.broadcast %cst_40 : f32 to vector<136x128xf32>
    %95 = arith.select %92, %93, %94 : vector<136x128xi1>, vector<136x128xf32>
    %96 = arith.truncf %95 : vector<136x128xf32> to vector<136x128xbf16>
    %cst_41 = arith.constant dense<0.000000e+00> : vector<136x128xf32>
    %97 = tpu.matmul %96, %3, %cst_41 {dimension_numbers = #tpu.dot_dimension_numbers<[1], [0], [0], [1], [0, 0, 1, 1], [], []>} : vector<136x128xbf16>, vector<128x128xbf16>, vector<136x128xf32> -> vector<136x128xf32>
    %c7 = arith.constant 7 : index
    %c0_42 = arith.constant 0 : index
    %c0_43 = arith.constant 0 : index
    %98 = vector.load %arg5[%c7, %c0_42, %c0_43] : memref<8x136x128xf32, #tpu.memory_space<vmem>>, vector<1x136x128xf32>
    %99 = vector.shape_cast %98 : vector<1x136x128xf32> to vector<136x128xf32>
    %100 = vector.shape_cast %97 : vector<136x128xf32> to vector<1x136x128xf32>
    tpu.vector_store %arg5[%c7, %c0_42, %c0_43], %100 {strides = array<i32>} : memref<8x136x128xf32, #tpu.memory_space<vmem>>, vector<1x136x128xf32>,
    %101 = arith.addf %89, %97 : vector<136x128xf32>
    %cst_44 = arith.constant 1.250000e-01 : f32
    %102 = vector.broadcast %cst_44 : f32 to vector<136x128xf32>
    %103 = arith.mulf %101, %102 : vector<136x128xf32>
    %104 = arith.truncf %103 : vector<136x128xf32> to vector<136x128xbf16>
    %c0_45 = arith.constant 0 : index
    %c0_46 = arith.constant 0 : index
    %105 = vector.load %arg3[%c0_45, %c0_46] : memref<128x128xbf16, #tpu.memory_space<vmem>>, vector<128x128xbf16>
    %cst_47 = arith.constant dense<0.000000e+00> : vector<136x128xf32>
    %106 = tpu.matmul %104, %105, %cst_47 {dimension_numbers = #tpu.dot_dimension_numbers<[1], [0], [0], [1], [0, 0, 1, 1], [], []>} : vector<136x128xbf16>, vector<128x128xbf16>, vector<136x128xf32> -> vector<136x128xf32>
    %c0_48 = arith.constant 0 : index
    %c0_49 = arith.constant 0 : index
    %c0_50 = arith.constant 0 : index
    %107 = vector.load %arg5[%c0_48, %c0_49, %c0_50] : memref<8x136x128xf32, #tpu.memory_space<vmem>>, vector<1x136x128xf32>
    %108 = vector.shape_cast %107 : vector<1x136x128xf32> to vector<136x128xf32>
    %109 = arith.mulf %108, %106 : vector<136x128xf32>
    %cst_51 = arith.constant dense<0.000000e+00> : vector<136xf32>
    %110 = vector.multi_reduction <add>, %109, %cst_51 [1] : vector<136x128xf32> to vector<136xf32>
    %111 = vector.shape_cast %110 : vector<136xf32> to vector<136x1xf32>
    %c1_52 = arith.constant 1 : index
    %c0_53 = arith.constant 0 : index
    %c0_54 = arith.constant 0 : index
    %112 = vector.load %arg5[%c1_52, %c0_53, %c0_54] : memref<8x136x128xf32, #tpu.memory_space<vmem>>, vector<1x136x128xf32>
    %113 = vector.shape_cast %112 : vector<1x136x128xf32> to vector<136x128xf32>
    %114 = arith.mulf %113, %106 : vector<136x128xf32>
    %cst_55 = arith.constant dense<0.000000e+00> : vector<136xf32>
    %115 = vector.multi_reduction <add>, %114, %cst_55 [1] : vector<136x128xf32> to vector<136xf32>
    %116 = vector.shape_cast %115 : vector<136xf32> to vector<136x1xf32>
    %c2_56 = arith.constant 2 : index
    %c0_57 = arith.constant 0 : index
    %c0_58 = arith.constant 0 : index
    %117 = vector.load %arg5[%c2_56, %c0_57, %c0_58] : memref<8x136x128xf32, #tpu.memory_space<vmem>>, vector<1x136x128xf32>
    %118 = vector.shape_cast %117 : vector<1x136x128xf32> to vector<136x128xf32>
    %119 = arith.mulf %118, %106 : vector<136x128xf32>
    %cst_59 = arith.constant dense<0.000000e+00> : vector<136xf32>
    %120 = vector.multi_reduction <add>, %119, %cst_59 [1] : vector<136x128xf32> to vector<136xf32>
    %121 = vector.shape_cast %120 : vector<136xf32> to vector<136x1xf32>
    %c3_60 = arith.constant 3 : index
    %c0_61 = arith.constant 0 : index
    %c0_62 = arith.constant 0 : index
    %122 = vector.load %arg5[%c3_60, %c0_61, %c0_62] : memref<8x136x128xf32, #tpu.memory_space<vmem>>, vector<1x136x128xf32>
    %123 = vector.shape_cast %122 : vector<1x136x128xf32> to vector<136x128xf32>
    %124 = arith.mulf %123, %106 : vector<136x128xf32>
    %cst_63 = arith.constant dense<0.000000e+00> : vector<136xf32>
    %125 = vector.multi_reduction <add>, %124, %cst_63 [1] : vector<136x128xf32> to vector<136xf32>
    %126 = vector.shape_cast %125 : vector<136xf32> to vector<136x1xf32>
    %c4_64 = arith.constant 4 : index
    %c0_65 = arith.constant 0 : index
    %c0_66 = arith.constant 0 : index
    %127 = vector.load %arg5[%c4_64, %c0_65, %c0_66] : memref<8x136x128xf32, #tpu.memory_space<vmem>>, vector<1x136x128xf32>
    %128 = vector.shape_cast %127 : vector<1x136x128xf32> to vector<136x128xf32>
    %129 = arith.mulf %128, %106 : vector<136x128xf32>
    %cst_67 = arith.constant dense<0.000000e+00> : vector<136xf32>
    %130 = vector.multi_reduction <add>, %129, %cst_67 [1] : vector<136x128xf32> to vector<136xf32>
    %131 = vector.shape_cast %130 : vector<136xf32> to vector<136x1xf32>
    %c5_68 = arith.constant 5 : index
    %c0_69 = arith.constant 0 : index
    %c0_70 = arith.constant 0 : index
    %132 = vector.load %arg5[%c5_68, %c0_69, %c0_70] : memref<8x136x128xf32, #tpu.memory_space<vmem>>, vector<1x136x128xf32>
    %133 = vector.shape_cast %132 : vector<1x136x128xf32> to vector<136x128xf32>
    %134 = arith.mulf %133, %106 : vector<136x128xf32>
    %cst_71 = arith.constant dense<0.000000e+00> : vector<136xf32>
    %135 = vector.multi_reduction <add>, %134, %cst_71 [1] : vector<136x128xf32> to vector<136xf32>
    %136 = vector.shape_cast %135 : vector<136xf32> to vector<136x1xf32>
    %c6_72 = arith.constant 6 : index
    %c0_73 = arith.constant 0 : index
    %c0_74 = arith.constant 0 : index
    %137 = vector.load %arg5[%c6_72, %c0_73, %c0_74] : memref<8x136x128xf32, #tpu.memory_space<vmem>>, vector<1x136x128xf32>
    %138 = vector.shape_cast %137 : vector<1x136x128xf32> to vector<136x128xf32>
    %139 = arith.mulf %138, %106 : vector<136x128xf32>
    %cst_75 = arith.constant dense<0.000000e+00> : vector<136xf32>
    %140 = vector.multi_reduction <add>, %139, %cst_75 [1] : vector<136x128xf32> to vector<136xf32>
    %141 = vector.shape_cast %140 : vector<136xf32> to vector<136x1xf32>
    %c7_76 = arith.constant 7 : index
    %c0_77 = arith.constant 0 : index
    %c0_78 = arith.constant 0 : index
    %142 = vector.load %arg5[%c7_76, %c0_77, %c0_78] : memref<8x136x128xf32, #tpu.memory_space<vmem>>, vector<1x136x128xf32>
    %143 = vector.shape_cast %142 : vector<1x136x128xf32> to vector<136x128xf32>
    %144 = arith.mulf %143, %106 : vector<136x128xf32>
    %cst_79 = arith.constant dense<0.000000e+00> : vector<136xf32>
    %145 = vector.multi_reduction <add>, %144, %cst_79 [1] : vector<136x128xf32> to vector<136xf32>
    %146 = vector.shape_cast %145 : vector<136xf32> to vector<136x1xf32>
    %147 = tpu.concatenate %111, %116, %121, %126, %131, %136, %141, %146 in 1 : vector<136x1xf32>, vector<136x1xf32>, vector<136x1xf32>, vector<136x1xf32>, vector<136x1xf32>, vector<136x1xf32>, vector<136x1xf32>, vector<136x1xf32> -> vector<136x8xf32>
    %cst_80 = arith.constant dense<0xFF800000> : vector<136xf32>
    %148 = vector.multi_reduction <maximumf>, %147, %cst_80 [1] : vector<136x8xf32> to vector<136xf32>
    %149 = vector.shape_cast %148 : vector<136xf32> to vector<136x1xf32>
    %150 = vector.broadcast %149 : vector<136x1xf32> to vector<136x8xf32>
    %151 = arith.subf %147, %150 : vector<136x8xf32>
    %152 = math.exp %151 : vector<136x8xf32>
    %cst_81 = arith.constant dense<0.000000e+00> : vector<136xf32>
    %153 = vector.multi_reduction <add>, %152, %cst_81 [1] : vector<136x8xf32> to vector<136xf32>
    %154 = vector.shape_cast %153 : vector<136xf32> to vector<136x1xf32>
    %155 = tpu.reciprocal %154 {approx = true} : vector<136x1xf32> -> vector<136x1xf32>
    %156 = vector.broadcast %155 : vector<136x1xf32> to vector<136x8xf32>
    %157 = arith.mulf %152, %156 : vector<136x8xf32>
    %cst_82 = arith.constant 0.000000e+00 : f32
    %158 = vector.broadcast %cst_82 : f32 to vector<136x128xf32>
    %159 = vector.extract_strided_slice %157 {offsets = [0, 0], sizes = [136, 1], strides = [1, 1]} : vector<136x8xf32> to vector<136x1xf32>
    %c0_83 = arith.constant 0 : index
    %c0_84 = arith.constant 0 : index
    %c0_85 = arith.constant 0 : index
    %160 = vector.load %arg5[%c0_83, %c0_84, %c0_85] : memref<8x136x128xf32, #tpu.memory_space<vmem>>, vector<1x136x128xf32>
    %161 = vector.shape_cast %160 : vector<1x136x128xf32> to vector<136x128xf32>
    %162 = vector.broadcast %159 : vector<136x1xf32> to vector<136x128xf32>
    %163 = arith.mulf %162, %161 : vector<136x128xf32>
    %164 = arith.addf %158, %163 : vector<136x128xf32>
    %165 = vector.extract_strided_slice %157 {offsets = [0, 1], sizes = [136, 1], strides = [1, 1]} : vector<136x8xf32> to vector<136x1xf32>
    %c1_86 = arith.constant 1 : index
    %c0_87 = arith.constant 0 : index
    %c0_88 = arith.constant 0 : index
    %166 = vector.load %arg5[%c1_86, %c0_87, %c0_88] : memref<8x136x128xf32, #tpu.memory_space<vmem>>, vector<1x136x128xf32>
    %167 = vector.shape_cast %166 : vector<1x136x128xf32> to vector<136x128xf32>
    %168 = vector.broadcast %165 : vector<136x1xf32> to vector<136x128xf32>
    %169 = arith.mulf %168, %167 : vector<136x128xf32>
    %170 = arith.addf %164, %169 : vector<136x128xf32>
    %171 = vector.extract_strided_slice %157 {offsets = [0, 2], sizes = [136, 1], strides = [1, 1]} : vector<136x8xf32> to vector<136x1xf32>
    %c2_89 = arith.constant 2 : index
    %c0_90 = arith.constant 0 : index
    %c0_91 = arith.constant 0 : index
    %172 = vector.load %arg5[%c2_89, %c0_90, %c0_91] : memref<8x136x128xf32, #tpu.memory_space<vmem>>, vector<1x136x128xf32>
    %173 = vector.shape_cast %172 : vector<1x136x128xf32> to vector<136x128xf32>
    %174 = vector.broadcast %171 : vector<136x1xf32> to vector<136x128xf32>
    %175 = arith.mulf %174, %173 : vector<136x128xf32>
    %176 = arith.addf %170, %175 : vector<136x128xf32>
    %177 = vector.extract_strided_slice %157 {offsets = [0, 3], sizes = [136, 1], strides = [1, 1]} : vector<136x8xf32> to vector<136x1xf32>
    %c3_92 = arith.constant 3 : index
    %c0_93 = arith.constant 0 : index
    %c0_94 = arith.constant 0 : index
    %178 = vector.load %arg5[%c3_92, %c0_93, %c0_94] : memref<8x136x128xf32, #tpu.memory_space<vmem>>, vector<1x136x128xf32>
    %179 = vector.shape_cast %178 : vector<1x136x128xf32> to vector<136x128xf32>
    %180 = vector.broadcast %177 : vector<136x1xf32> to vector<136x128xf32>
    %181 = arith.mulf %180, %179 : vector<136x128xf32>
    %182 = arith.addf %176, %181 : vector<136x128xf32>
    %183 = vector.extract_strided_slice %157 {offsets = [0, 4], sizes = [136, 1], strides = [1, 1]} : vector<136x8xf32> to vector<136x1xf32>
    %c4_95 = arith.constant 4 : index
    %c0_96 = arith.constant 0 : index
    %c0_97 = arith.constant 0 : index
    %184 = vector.load %arg5[%c4_95, %c0_96, %c0_97] : memref<8x136x128xf32, #tpu.memory_space<vmem>>, vector<1x136x128xf32>
    %185 = vector.shape_cast %184 : vector<1x136x128xf32> to vector<136x128xf32>
    %186 = vector.broadcast %183 : vector<136x1xf32> to vector<136x128xf32>
    %187 = arith.mulf %186, %185 : vector<136x128xf32>
    %188 = arith.addf %182, %187 : vector<136x128xf32>
    %189 = vector.extract_strided_slice %157 {offsets = [0, 5], sizes = [136, 1], strides = [1, 1]} : vector<136x8xf32> to vector<136x1xf32>
    %c5_98 = arith.constant 5 : index
    %c0_99 = arith.constant 0 : index
    %c0_100 = arith.constant 0 : index
    %190 = vector.load %arg5[%c5_98, %c0_99, %c0_100] : memref<8x136x128xf32, #tpu.memory_space<vmem>>, vector<1x136x128xf32>
    %191 = vector.shape_cast %190 : vector<1x136x128xf32> to vector<136x128xf32>
    %192 = vector.broadcast %189 : vector<136x1xf32> to vector<136x128xf32>
    %193 = arith.mulf %192, %191 : vector<136x128xf32>
    %194 = arith.addf %188, %193 : vector<136x128xf32>
    %195 = vector.extract_strided_slice %157 {offsets = [0, 6], sizes = [136, 1], strides = [1, 1]} : vector<136x8xf32> to vector<136x1xf32>
    %c6_101 = arith.constant 6 : index
    %c0_102 = arith.constant 0 : index
    %c0_103 = arith.constant 0 : index
    %196 = vector.load %arg5[%c6_101, %c0_102, %c0_103] : memref<8x136x128xf32, #tpu.memory_space<vmem>>, vector<1x136x128xf32>
    %197 = vector.shape_cast %196 : vector<1x136x128xf32> to vector<136x128xf32>
    %198 = vector.broadcast %195 : vector<136x1xf32> to vector<136x128xf32>
    %199 = arith.mulf %198, %197 : vector<136x128xf32>
    %200 = arith.addf %194, %199 : vector<136x128xf32>
    %201 = vector.extract_strided_slice %157 {offsets = [0, 7], sizes = [136, 1], strides = [1, 1]} : vector<136x8xf32> to vector<136x1xf32>
    %c7_104 = arith.constant 7 : index
    %c0_105 = arith.constant 0 : index
    %c0_106 = arith.constant 0 : index
    %202 = vector.load %arg5[%c7_104, %c0_105, %c0_106] : memref<8x136x128xf32, #tpu.memory_space<vmem>>, vector<1x136x128xf32>
    %203 = vector.shape_cast %202 : vector<1x136x128xf32> to vector<136x128xf32>
    %204 = vector.broadcast %201 : vector<136x1xf32> to vector<136x128xf32>
    %205 = arith.mulf %204, %203 : vector<136x128xf32>
    %206 = arith.addf %200, %205 : vector<136x128xf32>
    %c0_107 = arith.constant 0 : index
    %c0_108 = arith.constant 0 : index
    %207 = vector.load %arg4[%c0_107, %c0_108] : memref<136x128xf32, #tpu.memory_space<vmem>>, vector<136x128xf32>
    tpu.vector_store %arg4[%c0_107, %c0_108], %206 {strides = array<i32>} : memref<136x128xf32, #tpu.memory_space<vmem>>, vector<136x128xf32>,
    return
  }
  func.func @transform_0(%arg0: i32) -> (i32, i32) {
    %c0_i32 = arith.constant 0 : i32
    %c0_i32_0 = arith.constant 0 : i32
    return %arg0, %c0_i32 : i32, i32
  }
  func.func @transform_1(%arg0: i32) -> (i32, i32) {
    %c0_i32 = arith.constant 0 : i32
    %c0_i32_0 = arith.constant 0 : i32
    %c0_i32_1 = arith.constant 0 : i32
    return %c0_i32, %c0_i32_0 : i32, i32
  }
  func.func @transform_2(%arg0: i32) -> (i32, i32) {
    %c0_i32 = arith.constant 0 : i32
    %c0_i32_0 = arith.constant 0 : i32
    %c0_i32_1 = arith.constant 0 : i32
    return %c0_i32, %c0_i32_0 : i32, i32
  }
  func.func @transform_3(%arg0: i32) -> (i32, i32) {
    %c0_i32 = arith.constant 0 : i32
    %c0_i32_0 = arith.constant 0 : i32
    return %arg0, %c0_i32 : i32, i32
  }
}

</mosaic_0001>

<bundles_post_ra>
// kernel: document_encoder_forward_batch.1
= control target key start
LH: loop header
LB: loop body
LE: loop exit
PB: predicated region body
PF: predicated region fallthrough
CT: control target
= control target key end

     0   :  { %8 = vsyncpa [#allocation4], 0  ;;  %s8241_s0 = inlined_call_operand.vmem [shape: s32[272,8], index: 0, kind: input, shape index: {}]   ;;  %s8242_s1 = inlined_call_operand.vmem [shape: bf16[128,128], index: 1, kind: input, shape index: {}]   ;;  %s8243_s2 = inlined_call_operand.vmem [shape: bf16[128,128], index: 2, kind: input, shape index: {}]   ;;  %s8244_s3 = inlined_call_operand.hbm [shape: f32[272,128], index: 3, kind: output, shape index: {}]  }
   0x1   :  { %10 = vsyncpa [#allocation4 + $0x1], 0  ;;  %s5312_s12 = smov 0   ;;  %s5314_s13 = smov 0  }
   0x2   :  { %s5316_s14 = smov 0   ;;  %s5318_s15 = smov 0  }
   0x3 LB: > { %s5333_s16 = sadd.s32 4294967295, %s5276_s15   ;;  %s4114_s17 = sadd.s32 4294967294, %s5276_s15   ;;  %s5276_s15 = sphi %s5318_s15, %s8952_s15   ;;  %s5272_s14 = sphi %s5316_s14, %s8951_s14   ;;  %s5268_s13 = sphi %s5314_s13, %s8950_s13   ;;  %s5264_s12 = sphi %s5312_s12, %s8949_s12  }
   0x4   : > { %s5337_s18 = sadd.s32 1, %s5276_s15   ;;  %s91_s19 = sadd.s32 1, %s5272_s14 }
   0x5   : > { %s88_s20 = ssub.s32 %s5276_s15, %s5337_s18  ;;  %p101_p0 = scmp.ne.s32.totalorder %s5272_s14, %s5268_s13 }
   0x6   : > { %p89_p1 = scmp.eq.s32.totalorder %s88_s20, 0  ;;  %p102_p2 = scmp.eq.s32.totalorder %s5333_s16, 1 }
   0x7   : > { %p107_p3 = scmp.ne.s32.totalorder %s5268_s13, %s5264_s12  ;;  %p108_p4 = scmp.eq.s32.totalorder %s4114_s17, 1 }
   0x8   : > { %s5348_s21 = scalar_select %p89_p1, %s5272_s14, %s91_s19  }
   0x9   : > { %p5350_p5 = por %p102_p2, %p101_p0  ;;  %p5354_p6 = por %p108_p4, %p107_p3 }
   0xa   : > { %p4117_p7 = scmp.ge.s32.totalorder %s5276_s15, 1  ;;  %p141_p8 = scmp.lt.s32.totalorder %s5276_s15, 3 }
   0xc   : > { %p142_p9 = pnand %p4117_p7, %p141_p8 }
   0xe   : > { %145 = sbr.rel (%p142_p9) target bundleno = 1969 (0x7b1), region = 32 }
  0x15   : > { %s165_s24 = smul.u32 17, %s5333_s16  ;;  %v5364_v0 = vld [vmem:[%s8242_s1] sm:$0xff]   ;;  %v8245_v1 = vmov 0   ;;  %v8261_v2 = vmov 0.0   ;;  %v5372_v3 = vld [vmem:[%s8242_s1 + $0x8] sm:$0xff]   ;;  %v5388_v4 = vld [vmem:[%s8242_s1 + $0x10] sm:$0xff]   ;;  %v223_v47 = vlaneseq }
  0x16   : > { %4974 = vset.pattern.permute.xlu1 %v8245_v1  ;;  %4973 = vset.pattern.permute.xlu0 %v8245_v1  ;;  %v5413_v15 = vld [vmem:[%s8242_s1 + $0x18] sm:$0xff]   ;;  %v5430_v20 = vld [vmem:[%s8242_s1 + $0x20] sm:$0xff]   ;;  %v5443_v24 = vld [vmem:[%s8242_s1 + $0x28] sm:$0xff]   ;;  %vm5280_vm0 = vmmov 0   ;;  %v8259_v44 = vmov 1   ;;  %v8257_v45 = vmov 2  }
  0x17   : > { %p166_p10 = scmp.lt.s32.totalorder %s165_s24, 33  ;;  %4436 = vmatprep.subr.bf16.mxu0 %v8261_v2  ;;  %4904 = vmatprep.subr.bf16.mxu1 %v8261_v2  ;;  %v5468_v30 = vld [vmem:[%s8242_s1 + $0x30] sm:$0xff]   ;;  %v5485_v35 = vld [vmem:[%s8242_s1 + $0x38] sm:$0xff]   ;;  %v8255_v46 = vmov 3   ;;  %v5567_v50 = vand.u32 127, %v223_v47  ;;  %v8253_v56 = vmov 4  }
  0x18   : > { %4437 = vmatpush3.bf16.msra.mxu0 %v5364_v0  ;;  %4912 = vmatpush3.bf16.msra.mxu1 %v5364_v0  ;;  %v8267_v53 = vmov 1.0|1.0   ;;  %s162_s20 = sand.u32 1, %s5268_s13   ;;  %s4282_s26 = smul.u32 2176, %s5333_s16 }
  0x19   : > { %s8954_s24 = smov (!%p166_p10, %s165_s24), 33  ;;  %4438 = vmatprep.subr.bf16.mxu0 %v8261_v2  ;;  %4905 = vmatprep.subr.bf16.mxu1 %v8261_v2  ;;  %s8200_s4 = scalar_lea.sflag [#allocation4], %s162_s20 }
  0x1a   : > { %s4118_s29 = sshll.u32 %s8954_s24, 3  ;;  %4452 = vmatprep.mubr.msk.bf16.mxu0 %vm5280_vm0, %v8261_v2  ;;  %4468 = vmatprep.mubr.msk.bf16.mxu1 %vm5280_vm0, %v8261_v2  ;;  %s4920_s24 = smul.u32 136, %s162_s20 }
  0x1b   : > { %s5382_s5 = scalar_lea.vmem %s8241_s0, %s4118_s29  ;;  %s8195_s30 = scalar_lea.hbm %s8244_s3, %s4282_s26 }
  0x1c   : > { %4439 = vmatpush3.bf16.msra.mxu0 %v5372_v3  ;;  %4913 = vmatpush3.bf16.msra.mxu1 %v5372_v3  ;;  %v175_v5 = vld [vmem:[%s5382_s5 + $0x10] sm:$0xff]  ;;  %v173_v6 = vld [vmem:[%s5382_s5] sm:$0xff]  ;;  %v176_v7 = vld [vmem:[%s5382_s5 + $0x18] sm:$0xff]  ;;  %s7840_s25 = scalar_lea.vmem [#allocation3], %s4920_s24 }
  0x1d   : > { %4440 = vmatprep.subr.bf16.mxu0 %v8261_v2  ;;  %4906 = vmatprep.subr.bf16.mxu1 %v8261_v2  ;;  %v5396_v8 = vadd.s32 1, %v175_v5  ;;  %v5398_v9 = vadd.s32 1, %v173_v6  ;;  %v174_v10 = vld [vmem:[%s5382_s5 + $0x8] sm:$0xff]  ;;  %v5404_v12 = vadd.s32 1, %v176_v7  ;;  %v177_v14 = vld [vmem:[%s5382_s5 + $0x20] sm:$0xff]  ;;  %v180_v17 = vld [vmem:[%s5382_s5 + $0x38] sm:$0xff] }
  0x1e   : > { %v178_v11 = vld [vmem:[%s5382_s5 + $0x28] sm:$0xff]  ;;  %v5406_v13 = vadd.s32 1, %v174_v10  ;;  %v5421_v18 = vadd.s32 1, %v177_v14  ;;  %v179_v19 = vld [vmem:[%s5382_s5 + $0x30] sm:$0xff]  ;;  %v5433_v21 = vadd.s32 1, %v180_v17  ;;  %v181_v25 = vld [vmem:[%s5382_s5 + $0x40] sm:$0xff] }
  0x1f   : > { %232 = vperm.xlu1 %4974, %v5396_v8   ;;  %226 = vperm.xlu0 %4973, %v5398_v9   ;;  %v5416_v16 = vadd.s32 1, %v178_v11  ;;  %v5435_v22 = vadd.s32 1, %v179_v19  ;;  %v182_v23 = vld [vmem:[%s5382_s5 + $0x48] sm:$0xff]  ;;  %v5460_v27 = vadd.s32 1, %v181_v25  ;;  %v184_v28 = vld [vmem:[%s5382_s5 + $0x58] sm:$0xff]  ;;  %v183_v29 = vld [vmem:[%s5382_s5 + $0x50] sm:$0xff] }
  0x20   : > { %4441 = vmatpush3.bf16.msra.mxu0 %v5388_v4  ;;  %4914 = vmatpush3.bf16.msra.mxu1 %v5388_v4  ;;  %v5458_v26 = vadd.s32 1, %v182_v23  ;;  %v5475_v31 = vadd.s32 1, %v184_v28  ;;  %v5477_v32 = vadd.s32 1, %v183_v29  ;;  %v186_v33 = vld [vmem:[%s5382_s5 + $0x68] sm:$0xff]  ;;  %v185_v34 = vld [vmem:[%s5382_s5 + $0x60] sm:$0xff]  ;;  %v188_v38 = vld [vmem:[%s5382_s5 + $0x78] sm:$0xff] }
  0x21   : > { %4442 = vmatprep.subr.bf16.mxu0 %v8261_v2  ;;  %4907 = vmatprep.subr.bf16.mxu1 %v8261_v2  ;;  %v5492_v36 = vadd.s32 1, %v186_v33  ;;  %v5494_v37 = vadd.s32 1, %v185_v34  ;;  %v187_v39 = vld [vmem:[%s5382_s5 + $0x70] sm:$0xff]  ;;  %v5504_v40 = vadd.s32 1, %v188_v38  ;;  %v189_v42 = vld [vmem:[%s5382_s5 + $0x80] sm:$0xff]  ;;  %v8251_v25 = vmov 5  }
  0x22   : > { %v5506_v41 = vadd.s32 1, %v187_v39  ;;  %v5511_v43 = vadd.s32 1, %v189_v42  ;;  %s4052_s27 = sshll.u32 %s7840_s25, 4  ;;  %s5289_s5 = smov [#allocation3]   ;;  %s8190_s27 = int_to_ptr.vmem [resolvable:$true] %s4052_s27 }
  0x23   : > { %235 = vperm.xlu1 %4974, %v5404_v12   ;;  %229 = vperm.xlu0 %4973, %v5406_v13   ;;  %s5214_s16 = scalar_lea.vmem %s8190_s27, 2176  ;;  %s5218_s6 = sshll.u32 %s5289_s5, 4  ;;  %s5219_s6 = int_to_ptr.vmem [resolvable:$false] %s5218_s6 }
  0x24   : > { %4443 = vmatpush3.bf16.msra.mxu0 %v5413_v15  ;;  %4915 = vmatpush3.bf16.msra.mxu1 %v5413_v15  ;;  %p5215_p11 = scmp.ne.s32.totalorder %s8190_s27, %s5214_s16  ;;  %s5220_s7 = scalar_lea.vmem %s5219_s6, 4352 }
  0x25   : > { %4444 = vmatprep.subr.bf16.mxu0 %v8261_v2  ;;  %4908 = vmatprep.subr.bf16.mxu1 %v8261_v2  ;;  %p5221_p0 = scmp.lt.s32.totalorder %s8190_s27, %s5219_s6  ;;  %p5222_p1 = scmp.lt.s32.totalorder %s5220_s7, %s5214_s16 }
  0x26   : > { %p5216_p12 = pnand %p5215_p11, %p5350_p5 }
  0x27   : > { %241 = vperm.xlu1 %4974, %v5416_v16   ;;  %238 = vperm.xlu0 %4973, %v5421_v18   ;;  %p5223_p2 = por %p5222_p1, %p5221_p0 }
  0x28   : > { %4445 = vmatpush3.bf16.msra.mxu0 %v5430_v20  ;;  %4916 = vmatpush3.bf16.msra.mxu1 %v5430_v20  ;;  %p5217_p13 = pneg %p5216_p12 }
  0x29   : > { %4446 = vmatprep.subr.bf16.mxu0 %v8261_v2  ;;  %4909 = vmatprep.subr.bf16.mxu1 %v8261_v2 }
  0x2a   : > { %p5224_p3 = pnand %p5223_p2, %p5217_p13 }
  0x2b   : > { %247 = vperm.xlu1 %4974, %v5433_v21   ;;  %244 = vperm.xlu0 %4973, %v5435_v22  }
  0x2c   : > { %4447 = vmatpush3.bf16.msra.mxu0 %v5443_v24  ;;  %4917 = vmatpush3.bf16.msra.mxu1 %v5443_v24 }
  0x2d   : > { %4448 = vmatprep.subr.bf16.mxu0 %v8261_v2  ;;  %4910 = vmatprep.subr.bf16.mxu1 %v8261_v2 }
  0x2f   : > { %253 = vperm.xlu1 %4974, %v5458_v26   ;;  %250 = vperm.xlu0 %4973, %v5460_v27  }
  0x30   : > { %4449 = vmatpush3.bf16.msra.mxu0 %v5468_v30  ;;  %4918 = vmatpush3.bf16.msra.mxu1 %v5468_v30 }
  0x31   : > { %4450 = vmatprep.subr.bf16.mxu0 %v8261_v2  ;;  %4911 = vmatprep.subr.bf16.mxu1 %v8261_v2 }
  0x33   : > { %259 = vperm.xlu1 %4974, %v5475_v31   ;;  %256 = vperm.xlu0 %4973, %v5477_v32  }
  0x34   : > { %4451 = vmatpush3.bf16.msra.mxu0 %v5485_v35  ;;  %4919 = vmatpush3.bf16.msra.mxu1 %v5485_v35 }
  0x35   : > { %4488 = vmatprep.subr.bf16.mxu1 %v8261_v2  ;;  %4540 = vmatprep.subr.bf16.mxu0 %v8261_v2 }
  0x37   : > { %265 = vperm.xlu1 %4974, %v5492_v36   ;;  %262 = vperm.xlu0 %4973, %v5494_v37  }
  0x3b   : > { %271 = vperm.xlu1 %4974, %v5504_v40   ;;  %268 = vperm.xlu0 %4973, %v5506_v41  }
  0x3f   : > { %4975 = vset.pattern.permute.xlu1 %v8259_v44  ;;  %274 = vperm.xlu0 %4973, %v5511_v43  }
  0x40   : > { %506 = vperm.xlu1 %4975, %v5398_v9  }
  0x43   : > { %4976 = vset.pattern.permute.xlu0 %v8259_v44 }
  0x44   : > { %512 = vperm.xlu1 %4975, %v5396_v8   ;;  %509 = vperm.xlu0 %4976, %v5406_v13  }
  0x48   : > { %515 = vperm.xlu1 %4975, %v5404_v12   ;;  %518 = vperm.xlu0 %4976, %v5421_v18  }
  0x4c   : > { %521 = vperm.xlu1 %4975, %v5416_v16   ;;  %524 = vperm.xlu0 %4976, %v5435_v22  }
  0x50   : > { %527 = vperm.xlu1 %4975, %v5433_v21   ;;  %530 = vperm.xlu0 %4976, %v5460_v27  }
  0x54   : > { %533 = vperm.xlu1 %4975, %v5458_v26   ;;  %536 = vperm.xlu0 %4976, %v5477_v32  }
  0x58   : > { %539 = vperm.xlu1 %4975, %v5475_v31   ;;  %542 = vperm.xlu0 %4976, %v5494_v37  }
  0x5c   : > { %545 = vperm.xlu1 %4975, %v5492_v36   ;;  %548 = vperm.xlu0 %4976, %v5506_v41  }
  0x60   : > { %551 = vperm.xlu1 %4975, %v5504_v40   ;;  %554 = vperm.xlu0 %4976, %v5511_v43  }
  0x64   : > { %4977 = vset.pattern.permute.xlu1 %v8257_v45  ;;  %4978 = vset.pattern.permute.xlu0 %v8257_v45 }
  0x65   : > { %739 = vperm.xlu1 %4977, %v5398_v9   ;;  %742 = vperm.xlu0 %4978, %v5406_v13  }
  0x69   : > { %745 = vperm.xlu1 %4977, %v5396_v8   ;;  %751 = vperm.xlu0 %4978, %v5421_v18  }
  0x6d   : > { %748 = vperm.xlu1 %4977, %v5404_v12   ;;  %757 = vperm.xlu0 %4978, %v5435_v22  }
  0x71   : > { %754 = vperm.xlu1 %4977, %v5416_v16   ;;  %763 = vperm.xlu0 %4978, %v5460_v27  }
  0x75   : > { %760 = vperm.xlu1 %4977, %v5433_v21   ;;  %769 = vperm.xlu0 %4978, %v5477_v32  }
  0x79   : > { %766 = vperm.xlu1 %4977, %v5458_v26   ;;  %775 = vperm.xlu0 %4978, %v5494_v37  }
  0x7d   : > { %772 = vperm.xlu1 %4977, %v5475_v31   ;;  %781 = vperm.xlu0 %4978, %v5506_v41  }
  0x81   : > { %778 = vperm.xlu1 %4977, %v5492_v36   ;;  %787 = vperm.xlu0 %4978, %v5511_v43  }
  0x85   : > { %784 = vperm.xlu1 %4977, %v5504_v40   ;;  %4980 = vset.pattern.permute.xlu0 %v8255_v46 }
  0x86   : > { %975 = vperm.xlu0 %4980, %v5406_v13  }
  0x89   : > { %4979 = vset.pattern.permute.xlu1 %v8255_v46 }
  0x8a   : > { %972 = vperm.xlu1 %4979, %v5398_v9   ;;  %984 = vperm.xlu0 %4980, %v5421_v18  }
  0x8e   : > { %978 = vperm.xlu1 %4979, %v5396_v8   ;;  %990 = vperm.xlu0 %4980, %v5435_v22  }
  0x92   : > { %981 = vperm.xlu1 %4979, %v5404_v12   ;;  %996 = vperm.xlu0 %4980, %v5460_v27  }
  0x96   : > { %987 = vperm.xlu1 %4979, %v5416_v16   ;;  %1002 = vperm.xlu0 %4980, %v5477_v32  }
  0x9a   : > { %993 = vperm.xlu1 %4979, %v5433_v21   ;;  %1008 = vperm.xlu0 %4980, %v5494_v37  }
  0x9e   : > { %v233_v48 = vpop.permute.xlu1 %232  ;;  %999 = vperm.xlu1 %4979, %v5458_v26   ;;  %1014 = vperm.xlu0 %4980, %v5506_v41   ;;  %v227_v49 = vpop.permute.xlu0 %226 }
  0x9f   : > { %vm276_vm2 = vcmp.eq.s32.totalorder %v227_v49, %v5567_v50  ;;  %vm278_vm5 = vcmp.eq.s32.totalorder %v233_v48, %v5567_v50 }
  0xa2   : > { %v236_v51 = vpop.permute.xlu1 %235  ;;  %1005 = vperm.xlu1 %4979, %v5475_v31   ;;  %1020 = vperm.xlu0 %4980, %v5511_v43   ;;  %v230_v52 = vpop.permute.xlu0 %229 }
  0xa3   : > { %vm277_vm1 = vcmp.eq.s32.totalorder %v230_v52, %v5567_v50  ;;  %vm279_vm4 = vcmp.eq.s32.totalorder %v236_v51, %v5567_v50 }
  0xa4   : > { %vm4127_vm3 = vmpackc.low %vm277_vm1, %vm276_vm2 }
  0xa5   : > { %4453 = vmatmul.mubr.msk.bf16.vlgmr.msra.gmra.mrb[0].mxu0 %vm4127_vm3, %v8267_v53  ;;  %vm4129_vm6 = vmpackc.low %vm279_vm4, %vm278_vm5 }
  0xa6   : > { %v242_v54 = vpop.permute.xlu1 %241  ;;  %1011 = vperm.xlu1 %4979, %v5492_v36   ;;  %v239_v55 = vpop.permute.xlu0 %238  ;;  %4982 = vset.pattern.permute.xlu0 %v8253_v56 }
  0xa7   : > { %4456 = vmatprep.mubr.msk.bf16.mxu0 %vm5280_vm0, %v8261_v2  ;;  %1208 = vperm.xlu0 %4982, %v5406_v13   ;;  %vm281_vm10 = vcmp.eq.s32.totalorder %v242_v54, %v5567_v50  ;;  %vm280_vm11 = vcmp.eq.s32.totalorder %v239_v55, %v5567_v50 }
  0xa8   : > { %4541 = vmatpush3.bf16.msra.mxu0 %v5364_v0  ;;  %vm4131_vm12 = vmpackc.low %vm281_vm10, %vm280_vm11 }
  0xa9   : > { %4542 = vmatprep.subr.bf16.mxu0 %v8261_v2 }
  0xaa   : > { %v248_v57 = vpop.permute.xlu1 %247  ;;  %1017 = vperm.xlu1 %4979, %v5504_v40   ;;  %v245_v58 = vpop.permute.xlu0 %244 }
  0xab   : > { %1217 = vperm.xlu0 %4982, %v5421_v18   ;;  %vm283_vm1 = vcmp.eq.s32.totalorder %v248_v57, %v5567_v50  ;;  %vm282_vm2 = vcmp.eq.s32.totalorder %v245_v58, %v5567_v50 }
  0xac   : > { %4543 = vmatpush3.bf16.msra.mxu0 %v5372_v3  ;;  %vm4133_vm3 = vmpackc.low %vm283_vm1, %vm282_vm2 }
  0xad   : > { %4544 = vmatprep.subr.bf16.mxu0 %v8261_v2  ;;  %4457 = vmatmul.mubr.msk.bf16.gmra.mrb[4].mxu0 %vm4129_vm6, %v8267_v53 }
  0xae   : > { %v254_v59 = vpop.permute.xlu1 %253  ;;  %4981 = vset.pattern.permute.xlu1 %v8253_v56  ;;  %v251_v60 = vpop.permute.xlu0 %250  ;;  %4460 = vmatprep.mubr.msk.bf16.mxu0 %vm5280_vm0, %v8261_v2 }
  0xaf   : > { %vm285_vm7 = vcmp.eq.s32.totalorder %v254_v59, %v5567_v50  ;;  %vm284_vm8 = vcmp.eq.s32.totalorder %v251_v60, %v5567_v50  ;;  %1205 = vperm.xlu1 %4981, %v5398_v9   ;;  %1223 = vperm.xlu0 %4982, %v5435_v22   ;;  %v8249_v59 = vmov 6  }
  0xb0   : > { %vm4135_vm9 = vmpackc.low %vm285_vm7, %vm284_vm8  ;;  %4545 = vmatpush3.bf16.msra.mxu0 %v5388_v4 }
  0xb1   : > { %4469 = vmatmul.mubr.msk.bf16.vlgmr.msra.gmra.mrb[0].mxu1 %vm4135_vm9, %v8267_v53  ;;  %4546 = vmatprep.subr.bf16.mxu0 %v8261_v2 }
  0xb2   : > { %4489 = vmatpush3.bf16.msra.mxu1 %v5364_v0  ;;  %v260_v61 = vpop.permute.xlu1 %259  ;;  %v257_v62 = vpop.permute.xlu0 %256  ;;  %4472 = vmatprep.mubr.msk.bf16.mxu1 %vm5280_vm0, %v8261_v2 }
  0xb3   : > { %1211 = vperm.xlu1 %4981, %v5396_v8   ;;  %4490 = vmatprep.subr.bf16.mxu1 %v8261_v2  ;;  %vm287_vm13 = vcmp.eq.s32.totalorder %v260_v61, %v5567_v50  ;;  %vm286_vm14 = vcmp.eq.s32.totalorder %v257_v62, %v5567_v50 }
  0xb4   : > { %1229 = vperm.xlu0 %4982, %v5460_v27   ;;  %4547 = vmatpush3.bf16.msra.mxu0 %v5413_v15  ;;  %vm4137_vm15 = vmpackc.low %vm287_vm13, %vm286_vm14 }
  0xb5   : > { %4548 = vmatprep.subr.bf16.mxu0 %v8261_v2  ;;  %4461 = vmatmul.mubr.msk.bf16.gmra.mrb[8].mxu0 %vm4131_vm12, %v8267_v53 }
  0xb6   : > { %v266_v63 = vpop.permute.xlu1 %265  ;;  %4491 = vmatpush3.bf16.msra.mxu1 %v5372_v3  ;;  %v263_v5 = vpop.permute.xlu0 %262  ;;  %4464 = vmatprep.mubr.msk.bf16.mxu0 %vm5280_vm0, %v8261_v2 }
  0xb7   : > { %1214 = vperm.xlu1 %4981, %v5404_v12   ;;  %4492 = vmatprep.subr.bf16.mxu1 %v8261_v2  ;;  %vm289_vm4 = vcmp.eq.s32.totalorder %v266_v63, %v5567_v50  ;;  %vm288_vm5 = vcmp.eq.s32.totalorder %v263_v5, %v5567_v50 }
  0xb8   : > { %1235 = vperm.xlu0 %4982, %v5477_v32   ;;  %4549 = vmatpush3.bf16.msra.mxu0 %v5430_v20  ;;  %vm4139_vm6 = vmpackc.low %vm289_vm4, %vm288_vm5 }
  0xb9   : > { %4473 = vmatmul.mubr.msk.bf16.gmra.mrb[4].mxu1 %vm4137_vm15, %v8267_v53  ;;  %4550 = vmatprep.subr.bf16.mxu0 %v8261_v2 }
  0xba   : > { %v272_v6 = vpop.permute.xlu1 %271  ;;  %v269_v7 = vpop.permute.xlu0 %268  ;;  %4493 = vmatpush3.bf16.msra.mxu1 %v5388_v4  ;;  %4476 = vmatprep.mubr.msk.bf16.mxu1 %vm5280_vm0, %v8261_v2 }
  0xbb   : > { %1220 = vperm.xlu1 %4981, %v5416_v16   ;;  %4494 = vmatprep.subr.bf16.mxu1 %v8261_v2  ;;  %vm291_vm7 = vcmp.eq.s32.totalorder %v272_v6, %v5567_v50  ;;  %vm290_vm8 = vcmp.eq.s32.totalorder %v269_v7, %v5567_v50 }
  0xbc   : > { %1241 = vperm.xlu0 %4982, %v5494_v37   ;;  %4551 = vmatpush3.bf16.msra.mxu0 %v5443_v24  ;;  %vm4141_vm9 = vmpackc.low %vm291_vm7, %vm290_vm8 }
  0xbd   : > { %4465 = vmatmul.mubr.msk.bf16.gmra.mrb[12].mxu0 %vm4133_vm3, %v8267_v53  ;;  %4552 = vmatprep.subr.bf16.mxu0 %v8261_v2 }
  0xbe   : > { %v275_v10 = vpop.permute.xlu0 %274  ;;  %4495 = vmatpush3.bf16.msra.mxu1 %v5413_v15  ;;  %4556 = vmatprep.mubr.msk.bf16.mxu0 %vm5280_vm0, %v8261_v2 }
  0xbf   : > { %1226 = vperm.xlu1 %4981, %v5433_v21   ;;  %v507_v11 = vpop.permute.xlu1 %506  ;;  %4496 = vmatprep.subr.bf16.mxu1 %v8261_v2  ;;  %vm292_vm10 = vcmp.eq.s32.totalorder %v275_v10, %v5567_v50 }
  0xc0   : > { %1247 = vperm.xlu0 %4982, %v5506_v41   ;;  %4553 = vmatpush3.bf16.msra.mxu0 %v5468_v30  ;;  %vm4143_vm11 = vmpackc.low %vm292_vm10, %vm292_vm10  ;;  %vm556_vm12 = vcmp.eq.s32.totalorder %v507_v11, %v5567_v50 }
  0xc1   : > { %4477 = vmatmul.mubr.msk.bf16.gmra.mrb[8].mxu1 %vm4139_vm6, %v8267_v53  ;;  %4554 = vmatprep.subr.bf16.mxu0 %v8261_v2 }
  0xc2   : > { %4497 = vmatpush3.bf16.msra.mxu1 %v5430_v20  ;;  %4480 = vmatprep.mubr.msk.bf16.mxu1 %vm5280_vm0, %v8261_v2 }
  0xc3   : > { %1232 = vperm.xlu1 %4981, %v5458_v26   ;;  %v5643_v14 = vpop.permute.xlu1 %512  ;;  %v510_v17 = vpop.permute.xlu0 %509  ;;  %4498 = vmatprep.subr.bf16.mxu1 %v8261_v2 }
  0xc4   : > { %1253 = vperm.xlu0 %4982, %v5511_v43   ;;  %4555 = vmatpush3.bf16.msra.mxu0 %v5485_v35  ;;  %vm557_vm13 = vcmp.eq.s32.totalorder %v510_v17, %v5567_v50  ;;  %vm558_vm15 = vcmp.eq.s32.totalorder %v5643_v14, %v5567_v50 }
  0xc5   : > { %4644 = vmatprep.subr.bf16.mxu0 %v8261_v2  ;;  %vm4145_vm14 = vmpackc.low %vm557_vm13, %vm556_vm12 }
  0xc6   : > { %4499 = vmatpush3.bf16.msra.mxu1 %v5443_v24 }
  0xc7   : > { %1238 = vperm.xlu1 %4981, %v5475_v31   ;;  %v516_v19 = vpop.permute.xlu1 %515  ;;  %v5656_v23 = vpop.permute.xlu0 %518  ;;  %4500 = vmatprep.subr.bf16.mxu1 %v8261_v2 }
  0xc8   : > { %4984 = vset.pattern.permute.xlu0 %v8251_v25  ;;  %vm559_vm1 = vcmp.eq.s32.totalorder %v516_v19, %v5567_v50  ;;  %vm560_vm3 = vcmp.eq.s32.totalorder %v5656_v23, %v5567_v50  ;;  %v8247_v23 = vmov 7  }
  0xc9   : > { %4481 = vmatmul.mubr.msk.bf16.gmra.mrb[12].mxu1 %vm4141_vm9, %v8267_v53  ;;  %1441 = vperm.xlu0 %4984, %v5406_v13   ;;  %vm4147_vm2 = vmpackc.low %vm559_vm1, %vm558_vm15 }
  0xca   : > { %4501 = vmatpush3.bf16.msra.mxu1 %v5468_v30  ;;  %4484 = vmatprep.mubr.msk.bf16.mxu1 %vm5280_vm0, %v8261_v2 }
  0xcb   : > { %1244 = vperm.xlu1 %4981, %v5492_v36   ;;  %v522_v28 = vpop.permute.xlu1 %521  ;;  %v5666_v29 = vpop.permute.xlu0 %524  ;;  %4502 = vmatprep.subr.bf16.mxu1 %v8261_v2 }
  0xcc   : > { %vm561_vm4 = vcmp.eq.s32.totalorder %v522_v28, %v5567_v50  ;;  %vm562_vm10 = vcmp.eq.s32.totalorder %v5666_v29, %v5567_v50 }
  0xcd   : > { %1450 = vperm.xlu0 %4984, %v5421_v18   ;;  %vm4149_vm8 = vmpackc.low %vm561_vm4, %vm560_vm3 }
  0xce   : > { %4503 = vmatpush3.bf16.msra.mxu1 %v5485_v35 }
  0xcf   : > { %1250 = vperm.xlu1 %4981, %v5504_v40   ;;  %v5673_v33 = vpop.permute.xlu1 %527  ;;  %v5675_v34 = vpop.permute.xlu0 %530  ;;  %4592 = vmatprep.subr.bf16.mxu1 %v8261_v2 }
  0xd0   : > { %vm564_vm3 = vcmp.eq.s32.totalorder %v5675_v34, %v5567_v50 }
  0xd1   : > { %4485 = vmatmul.mubr.msk.bf16.gmra.mrb[16].mxu1 %vm4143_vm11, %v8267_v53  ;;  %1456 = vperm.xlu0 %4984, %v5435_v22   ;;  %vm563_vm11 = vcmp.eq.s32.totalorder %v5673_v33, %v5567_v50 }
  0xd2   : > { %4504 = vmatprep.mubr.msk.bf16.mxu1 %vm5280_vm0, %v8261_v2 }
  0xd3   : > { %4983 = vset.pattern.permute.xlu1 %v8251_v25  ;;  %v5683_v38 = vpop.permute.xlu1 %533  ;;  %v5685_v39 = vpop.permute.xlu0 %536 }
  0xd4   : > { %1438 = vperm.xlu1 %4983, %v5398_v9   ;;  %vm565_vm4 = vcmp.eq.s32.totalorder %v5683_v38, %v5567_v50 }
  0xd5   : > { %1462 = vperm.xlu0 %4984, %v5460_v27  }
  0xd7   : > { %v5691_v42 = vpop.permute.xlu1 %539  ;;  %v5693_v47 = vpop.permute.xlu0 %542 }
  0xd8   : > { %1444 = vperm.xlu1 %4983, %v5396_v8  }
  0xd9   : > { %4505 = vmatmul.mubr.msk.bf16.vlgmr.msra.gmra.mrb[20].mxu1 %vm4145_vm14, %v8267_v53  ;;  %1468 = vperm.xlu0 %4984, %v5477_v32   ;;  %vm4151_vm14 = vmpackc.low %vm563_vm11, %vm562_vm10 }
  0xda   : > { %4593 = vmatpush3.bf16.msra.mxu1 %v5364_v0  ;;  %4508 = vmatprep.mubr.msk.bf16.mxu1 %vm5280_vm0, %v8261_v2 }
  0xdb   : > { %v5701_v48 = vpop.permute.xlu1 %545  ;;  %v5703_v49 = vpop.permute.xlu0 %548  ;;  %4594 = vmatprep.subr.bf16.mxu1 %v8261_v2 }
  0xdc   : > { %1447 = vperm.xlu1 %4983, %v5404_v12  }
  0xdd   : > { %1474 = vperm.xlu0 %4984, %v5494_v37  }
  0xde   : > { %4595 = vmatpush3.bf16.msra.mxu1 %v5372_v3 }
  0xdf   : > { %v5712_v51 = vpop.permute.xlu1 %551  ;;  %v5714_v52 = vpop.permute.xlu0 %554  ;;  %4596 = vmatprep.subr.bf16.mxu1 %v8261_v2 }
  0xe0   : > { %1453 = vperm.xlu1 %4983, %v5416_v16  }
  0xe1   : > { %4509 = vmatmul.mubr.msk.bf16.gmra.mrb[24].mxu1 %vm4147_vm2, %v8267_v53  ;;  %1480 = vperm.xlu0 %4984, %v5506_v41  }
  0xe2   : > { %4512 = vmatprep.mubr.msk.bf16.mxu1 %vm5280_vm0, %v8261_v2  ;;  %4597 = vmatpush3.bf16.msra.mxu1 %v5388_v4 }
  0xe3   : > { %4598 = vmatprep.subr.bf16.mxu1 %v8261_v2 }
  0xe4   : > { %1459 = vperm.xlu1 %4983, %v5433_v21   ;;  %v740_v54 = vpop.permute.xlu1 %739  ;;  %v743_v55 = vpop.permute.xlu0 %742 }
  0xe5   : > { %vm789_vm5 = vcmp.eq.s32.totalorder %v740_v54, %v5567_v50  ;;  %vm790_vm6 = vcmp.eq.s32.totalorder %v743_v55, %v5567_v50  ;;  %1486 = vperm.xlu0 %4984, %v5511_v43   ;;  %v6045_v54 = vld [vmem:[%s8242_s1 + $0x20] sm:$0xff]  }
  0xe6   : > { %vm4163_vm7 = vmpackc.low %vm790_vm6, %vm789_vm5  ;;  %4599 = vmatpush3.bf16.msra.mxu1 %v5413_v15 }
  0xe7   : > { %4557 = vmatmul.mubr.msk.bf16.vlgmr.msra.gmra.mrb[16].mxu0 %vm4163_vm7, %v8267_v53  ;;  %4600 = vmatprep.subr.bf16.mxu1 %v8261_v2  ;;  %vm4153_vm5 = vmpackc.low %vm565_vm4, %vm564_vm3 }
  0xe8   : > { %1465 = vperm.xlu1 %4983, %v5458_v26   ;;  %v746_v57 = vpop.permute.xlu1 %745  ;;  %v752_v58 = vpop.permute.xlu0 %751  ;;  %4560 = vmatprep.mubr.msk.bf16.mxu0 %vm5280_vm0, %v8261_v2 }
  0xe9   : > { %4513 = vmatmul.mubr.msk.bf16.gmra.mrb[28].mxu1 %vm4149_vm8, %v8267_v53  ;;  %4986 = vset.pattern.permute.xlu0 %v8249_v59  ;;  %vm791_vm9 = vcmp.eq.s32.totalorder %v746_v57, %v5567_v50  ;;  %vm793_vm15 = vcmp.eq.s32.totalorder %v752_v58, %v5567_v50  ;;  %vm566_vm8 = vcmp.eq.s32.totalorder %v5685_v39, %v5567_v50  ;;  %v6058_v58 = vld [vmem:[%s8242_s1 + $0x28] sm:$0xff]  }
  0xea   : > { %4516 = vmatprep.mubr.msk.bf16.mxu1 %vm5280_vm0, %v8261_v2  ;;  %1674 = vperm.xlu0 %4986, %v5406_v13  }
  0xeb   : > { %4601 = vmatpush3.bf16.msra.mxu1 %v5430_v20  ;;  %4645 = vmatpush3.bf16.msra.mxu0 %v5364_v0 }
  0xec   : > { %1471 = vperm.xlu1 %4983, %v5475_v31   ;;  %v749_v60 = vpop.permute.xlu1 %748  ;;  %v758_v61 = vpop.permute.xlu0 %757  ;;  %4602 = vmatprep.subr.bf16.mxu1 %v8261_v2 }
  0xed   : > { %vm792_vm12 = vcmp.eq.s32.totalorder %v749_v60, %v5567_v50  ;;  %4646 = vmatprep.subr.bf16.mxu0 %v8261_v2  ;;  %vm795_vm6 = vcmp.eq.s32.totalorder %v758_v61, %v5567_v50 }
  0xee   : > { %vm4165_vm13 = vmpackc.low %vm792_vm12, %vm791_vm9  ;;  %1683 = vperm.xlu0 %4986, %v5421_v18   ;;  %vm567_vm9 = vcmp.eq.s32.totalorder %v5691_v42, %v5567_v50  ;;  %v5915_v42 = vld [vmem:[%s8242_s1] sm:$0xff]  }
  0xef   : > { %4561 = vmatmul.mubr.msk.bf16.gmra.mrb[20].mxu0 %vm4165_vm13, %v8267_v53  ;;  %4603 = vmatpush3.bf16.msra.mxu1 %v5443_v24  ;;  %vm4155_vm11 = vmpackc.low %vm567_vm9, %vm566_vm8 }
  0xf0   : > { %1477 = vperm.xlu1 %4983, %v5492_v36   ;;  %v755_v0 = vpop.permute.xlu1 %754  ;;  %v764_v62 = vpop.permute.xlu0 %763  ;;  %4564 = vmatprep.mubr.msk.bf16.mxu0 %vm5280_vm0, %v8261_v2 }
  0xf1   : > { %vm794_vm1 = vcmp.eq.s32.totalorder %v755_v0, %v5567_v50  ;;  %4517 = vmatmul.mubr.msk.bf16.gmra.mrb[32].mxu1 %vm4151_vm14, %v8267_v53  ;;  %4604 = vmatprep.subr.bf16.mxu1 %v8261_v2  ;;  %vm797_vm12 = vcmp.eq.s32.totalorder %v764_v62, %v5567_v50  ;;  %vm569_vm14 = vcmp.eq.s32.totalorder %v5701_v48, %v5567_v50  ;;  %v5953_v48 = vld [vmem:[%s8242_s1 + $0x10] sm:$0xff]  }
  0xf2   : > { %4520 = vmatprep.mubr.msk.bf16.mxu1 %vm5280_vm0, %v8261_v2  ;;  %1689 = vperm.xlu0 %4986, %v5435_v22   ;;  %vm4167_vm2 = vmpackc.low %vm794_vm1, %vm793_vm15  ;;  %vm568_vm1 = vcmp.eq.s32.totalorder %v5693_v47, %v5567_v50  ;;  %v6074_v0 = vld [vmem:[%s8242_s1 + $0x30] sm:$0xff]  }
  0xf3   : > { %4605 = vmatpush3.bf16.msra.mxu1 %v5468_v30  ;;  %4647 = vmatpush3.bf16.msra.mxu0 %v5372_v3 }
  0xf4   : > { %1483 = vperm.xlu1 %4983, %v5504_v40   ;;  %v761_v63 = vpop.permute.xlu1 %760  ;;  %v5769_v5 = vpop.permute.xlu0 %769  ;;  %4606 = vmatprep.subr.bf16.mxu1 %v8261_v2 }
  0xf5   : > { %4648 = vmatprep.subr.bf16.mxu0 %v8261_v2  ;;  %vm796_vm7 = vcmp.eq.s32.totalorder %v761_v63, %v5567_v50  ;;  %vm799_vm3 = vcmp.eq.s32.totalorder %v5769_v5, %v5567_v50  ;;  %v6087_v63 = vld [vmem:[%s8242_s1 + $0x38] sm:$0xff]  }
  0xf6   : > { %1695 = vperm.xlu0 %4986, %v5460_v27   ;;  %vm4169_vm10 = vmpackc.low %vm796_vm7, %vm795_vm6  ;;  %vm570_vm7 = vcmp.eq.s32.totalorder %v5703_v49, %v5567_v50  ;;  %v5970_v49 = vld [vmem:[%s8242_s1 + $0x18] sm:$0xff]  }
  0xf7   : > { %4565 = vmatmul.mubr.msk.bf16.gmra.mrb[24].mxu0 %vm4167_vm2, %v8267_v53  ;;  %4607 = vmatpush3.bf16.msra.mxu1 %v5485_v35  ;;  %vm4157_vm2 = vmpackc.low %vm569_vm14, %vm568_vm1 }
  0xf8   : > { %4985 = vset.pattern.permute.xlu1 %v8249_v59  ;;  %v767_v3 = vpop.permute.xlu1 %766  ;;  %v5781_v6 = vpop.permute.xlu0 %775  ;;  %4568 = vmatprep.mubr.msk.bf16.mxu0 %vm5280_vm0, %v8261_v2 }
  0xf9   : > { %1671 = vperm.xlu1 %4985, %v5398_v9   ;;  %4521 = vmatmul.mubr.msk.bf16.gmra.mrb[36].mxu1 %vm4153_vm5, %v8267_v53  ;;  %vm798_vm13 = vcmp.eq.s32.totalorder %v767_v3, %v5567_v50  ;;  %vm571_vm5 = vcmp.eq.s32.totalorder %v5712_v51, %v5567_v50 }
  0xfa   : > { %4524 = vmatprep.mubr.msk.bf16.mxu1 %vm5280_vm0, %v8261_v2  ;;  %1701 = vperm.xlu0 %4986, %v5477_v32   ;;  %vm4171_vm15 = vmpackc.low %vm798_vm13, %vm797_vm12 }
  0xfb   : > { %4649 = vmatpush3.bf16.msra.mxu0 %v5388_v4  ;;  %4696 = vmatprep.subr.bf16.mxu1 %v8261_v2  ;;  %vm4159_vm8 = vmpackc.low %vm571_vm5, %vm570_vm7 }
  0xfc   : > { %v773_v7 = vpop.permute.xlu1 %772  ;;  %v5794_v10 = vpop.permute.xlu0 %781  ;;  %4650 = vmatprep.subr.bf16.mxu0 %v8261_v2 }
  0xfd   : > { %1677 = vperm.xlu1 %4985, %v5396_v8   ;;  %vm800_vm4 = vcmp.eq.s32.totalorder %v773_v7, %v5567_v50 }
  0xfe   : > { %1707 = vperm.xlu0 %4986, %v5494_v37   ;;  %vm4173_vm6 = vmpackc.low %vm800_vm4, %vm799_vm3 }
  0xff   : > { %4569 = vmatmul.mubr.msk.bf16.gmra.mrb[28].mxu0 %vm4169_vm10, %v8267_v53  ;;  %vm572_vm10 = vcmp.eq.s32.totalorder %v5714_v52, %v5567_v50 }
 0x100   : > { %v779_v4 = vpop.permute.xlu1 %778  ;;  %v5804_v11 = vpop.permute.xlu0 %787  ;;  %4572 = vmatprep.mubr.msk.bf16.mxu0 %vm5280_vm0, %v8261_v2  ;;  %4651 = vmatpush3.bf16.msra.mxu0 %v5413_v15  ;;  %vm4161_vm13 = vmpackc.low %vm572_vm10, %vm572_vm10 }
 0x101   : > { %1680 = vperm.xlu1 %4985, %v5404_v12   ;;  %4525 = vmatmul.mubr.msk.bf16.gmra.mrb[40].mxu1 %vm4155_vm11, %v8267_v53  ;;  %vm802_vm9 = vcmp.eq.s32.totalorder %v779_v4, %v5567_v50  ;;  %vm801_vm11 = vcmp.eq.s32.totalorder %v5781_v6, %v5567_v50  ;;  %vm805_vm5 = vcmp.eq.s32.totalorder %v5804_v11, %v5567_v50 }
 0x102   : > { %4528 = vmatprep.mubr.msk.bf16.mxu1 %vm5280_vm0, %v8261_v2  ;;  %1713 = vperm.xlu0 %4986, %v5506_v41   ;;  %vm4175_vm12 = vmpackc.low %vm802_vm9, %vm801_vm11 }
 0x103   : > { %4652 = vmatprep.subr.bf16.mxu0 %v8261_v2 }
 0x104   : > { %v5817_v14 = vpop.permute.xlu1 %784  ;;  %4653 = vmatpush3.bf16.msra.mxu0 %v5430_v20 }
 0x105   : > { %1686 = vperm.xlu1 %4985, %v5416_v16   ;;  %v5823_v15 = vpop.permute.xlu0 %975  ;;  %4654 = vmatprep.subr.bf16.mxu0 %v8261_v2  ;;  %vm804_vm14 = vcmp.eq.s32.totalorder %v5817_v14, %v5567_v50 }
 0x106   : > { %1719 = vperm.xlu0 %4986, %v5511_v43   ;;  %vm1023_vm1 = vcmp.eq.s32.totalorder %v5823_v15, %v5567_v50 }
 0x107   : > { %4573 = vmatmul.mubr.msk.bf16.gmra.mrb[32].mxu0 %vm4171_vm15, %v8267_v53  ;;  %vm803_vm15 = vcmp.eq.s32.totalorder %v5794_v10, %v5567_v50 }
 0x108   : > { %4576 = vmatprep.mubr.msk.bf16.mxu0 %vm5280_vm0, %v8261_v2  ;;  %4655 = vmatpush3.bf16.msra.mxu0 %v5443_v24  ;;  %vm4177_vm3 = vmpackc.low %vm804_vm14, %vm803_vm15 }
 0x109   : > { %1692 = vperm.xlu1 %4985, %v5433_v21   ;;  %v973_v17 = vpop.permute.xlu1 %972  ;;  %4529 = vmatmul.mubr.msk.bf16.gmra.mrb[44].mxu1 %vm4157_vm2, %v8267_v53  ;;  %v5835_v19 = vpop.permute.xlu0 %984 }
 0x10a   : > { %4532 = vmatprep.mubr.msk.bf16.mxu1 %vm5280_vm0, %v8261_v2  ;;  %4988 = vset.pattern.permute.xlu0 %v8247_v23  ;;  %vm1022_vm2 = vcmp.eq.s32.totalorder %v973_v17, %v5567_v50  ;;  %vm1026_vm10 = vcmp.eq.s32.totalorder %v5835_v19, %v5567_v50 }
 0x10b   : > { %1907 = vperm.xlu0 %4988, %v5406_v13   ;;  %4656 = vmatprep.subr.bf16.mxu0 %v8261_v2  ;;  %vm4181_vm4 = vmpackc.low %vm1023_vm1, %vm1022_vm2 }
 0x10c   : > { %4657 = vmatpush3.bf16.msra.mxu0 %v5468_v30 }
 0x10d   : > { %1698 = vperm.xlu1 %4985, %v5458_v26   ;;  %v5849_v28 = vpop.permute.xlu1 %978  ;;  %v5851_v29 = vpop.permute.xlu0 %990  ;;  %4658 = vmatprep.subr.bf16.mxu0 %v8261_v2 }
 0x10e   : > { %vm1028_vm1 = vcmp.eq.s32.totalorder %v5851_v29, %v5567_v50 }
 0x10f   : > { %4577 = vmatmul.mubr.msk.bf16.gmra.mrb[36].mxu0 %vm4173_vm6, %v8267_v53  ;;  %1916 = vperm.xlu0 %4988, %v5421_v18   ;;  %vm1024_vm6 = vcmp.eq.s32.totalorder %v5849_v28, %v5567_v50 }
 0x110   : > { %4580 = vmatprep.mubr.msk.bf16.mxu0 %vm5280_vm0, %v8261_v2  ;;  %4659 = vmatpush3.bf16.msra.mxu0 %v5485_v35 }
 0x111   : > { %1704 = vperm.xlu1 %4985, %v5475_v31   ;;  %v982_v13 = vpop.permute.xlu1 %981  ;;  %4533 = vmatmul.mubr.msk.bf16.gmra.mrb[48].mxu1 %vm4159_vm8, %v8267_v53  ;;  %v5863_v33 = vpop.permute.xlu0 %996  ;;  %vm4179_vm8 = vmpackc.low %vm805_vm5, %vm805_vm5 }
 0x112   : > { %4536 = vmatprep.mubr.msk.bf16.mxu1 %vm5280_vm0, %v8261_v2  ;;  %4748 = vmatprep.subr.bf16.mxu0 %v8261_v2  ;;  %vm1025_vm7 = vcmp.eq.s32.totalorder %v982_v13, %v5567_v50 }
 0x113   : > { %1922 = vperm.xlu0 %4988, %v5435_v22   ;;  %vm4183_vm9 = vmpackc.low %vm1025_vm7, %vm1024_vm6 }
 0x115   : > { %1710 = vperm.xlu1 %4985, %v5492_v36   ;;  %v5875_v18 = vpop.permute.xlu1 %987  ;;  %v5877_v34 = vpop.permute.xlu0 %1002 }
 0x116   : > { %vm1027_vm11 = vcmp.eq.s32.totalorder %v5875_v18, %v5567_v50 }
 0x117   : > { %4581 = vmatmul.mubr.msk.bf16.gmra.mrb[40].mxu0 %vm4175_vm12, %v8267_v53  ;;  %1928 = vperm.xlu0 %4988, %v5460_v27  }
 0x118   : > { %4584 = vmatprep.mubr.msk.bf16.mxu0 %vm5280_vm0, %v8261_v2 }
 0x119   : > { %1716 = vperm.xlu1 %4985, %v5504_v40   ;;  %v5884_v22 = vpop.permute.xlu1 %993  ;;  %4537 = vmatmul.mubr.msk.bf16.gmra.mrb[52].mxu1 %vm4161_vm13, %v8267_v53  ;;  %v5887_v38 = vpop.permute.xlu0 %1008  ;;  %vm4185_vm13 = vmpackc.low %vm1027_vm11, %vm1026_vm10 }
 0x11a   : > { %4608 = vmatprep.mubr.msk.bf16.mxu1 %vm5280_vm0, %v8261_v2  ;;  %vm1029_vm2 = vcmp.eq.s32.totalorder %v5884_v22, %v5567_v50 }
 0x11b   : > { %1934 = vperm.xlu0 %4988, %v5477_v32  }
 0x11d   : > { %4987 = vset.pattern.permute.xlu1 %v8247_v23  ;;  %v5900_v27 = vpop.permute.xlu1 %999  ;;  %v5902_v39 = vpop.permute.xlu0 %1014 }
 0x11e   : > { %1904 = vperm.xlu1 %4987, %v5398_v9   ;;  %vm1031_vm10 = vcmp.eq.s32.totalorder %v5900_v27, %v5567_v50 }
 0x11f   : > { %4585 = vmatmul.mubr.msk.bf16.gmra.mrb[44].mxu0 %vm4177_vm3, %v8267_v53  ;;  %1940 = vperm.xlu0 %4988, %v5494_v37  }
 0x120   : > { %4588 = vmatprep.mubr.msk.bf16.mxu0 %vm5280_vm0, %v8261_v2 }
 0x121   : > { %v5909_v32 = vpop.permute.xlu1 %1005  ;;  %4609 = vmatmul.mubr.msk.bf16.vlgmr.msra.gmra.mrb[56].mxu1 %vm4181_vm4, %v8267_v53  ;;  %v5921_v9 = vpop.permute.xlu0 %1020  ;;  %vm4187_vm4 = vmpackc.low %vm1029_vm2, %vm1028_vm1  ;;  %vm1032_vm1 = vcmp.eq.s32.totalorder %v5877_v34, %v5567_v50 }
 0x122   : > { %4697 = vmatpush3.bf16.msra.mxu1 %v5915_v42  ;;  %1910 = vperm.xlu1 %4987, %v5396_v8   ;;  %v5936_v8 = vld [vmem:[%s8242_s1 + $0x8] sm:$0xff]  }
 0x123   : > { %4612 = vmatprep.mubr.msk.bf16.mxu1 %vm5280_vm0, %v8261_v2  ;;  %4698 = vmatprep.subr.bf16.mxu1 %v8261_v2 }
 0x124   : > { %1946 = vperm.xlu0 %4988, %v5506_v41  }
 0x125   : > { %v5930_v37 = vpop.permute.xlu1 %1011 }
 0x126   : > { %1913 = vperm.xlu1 %4987, %v5404_v12   ;;  %4699 = vmatpush3.bf16.msra.mxu1 %v5936_v8  ;;  %v1209_v41 = vpop.permute.xlu0 %1208 }
 0x127   : > { %4589 = vmatmul.mubr.msk.bf16.gmra.mrb[48].mxu0 %vm4179_vm8, %v8267_v53  ;;  %4700 = vmatprep.subr.bf16.mxu1 %v8261_v2  ;;  %vm1256_vm12 = vcmp.eq.s32.totalorder %v1209_v41, %v5567_v50 }
 0x128   : > { %1952 = vperm.xlu0 %4988, %v5511_v43   ;;  %4660 = vmatprep.mubr.msk.bf16.mxu0 %vm5280_vm0, %v8261_v2 }
 0x129   : > { %v5944_v47 = vpop.permute.xlu1 %1017  ;;  %4613 = vmatmul.mubr.msk.bf16.gmra.mrb[60].mxu1 %vm4183_vm9, %v8267_v53  ;;  %vm1030_vm9 = vcmp.eq.s32.totalorder %v5863_v33, %v5567_v50 }
 0x12a   : > { %1919 = vperm.xlu1 %4987, %v5416_v16   ;;  %4616 = vmatprep.mubr.msk.bf16.mxu1 %vm5280_vm0, %v8261_v2  ;;  %v1218_v12 = vpop.permute.xlu0 %1217 }
 0x12b   : > { %4701 = vmatpush3.bf16.msra.mxu1 %v5953_v48  ;;  %vm1259_vm7 = vcmp.eq.s32.totalorder %v1218_v12, %v5567_v50 }
 0x12c   : > { %4702 = vmatprep.subr.bf16.mxu1 %v8261_v2  ;;  %4989 = vset.pattern.permute.xlu0 %v8245_v1 }
 0x12e   : > { %1925 = vperm.xlu1 %4987, %v5433_v21   ;;  %v1206_v16 = vpop.permute.xlu1 %1205  ;;  %v5965_v43 = vpop.permute.xlu0 %1223 }
 0x12f   : > { %vm1255_vm14 = vcmp.eq.s32.totalorder %v1206_v16, %v5567_v50  ;;  %4703 = vmatpush3.bf16.msra.mxu1 %v5970_v49 }
 0x130   : > { %vm4199_vm15 = vmpackc.low %vm1256_vm12, %vm1255_vm14  ;;  %4704 = vmatprep.subr.bf16.mxu1 %v8261_v2  ;;  %vm1261_vm14 = vcmp.eq.s32.totalorder %v5965_v43, %v5567_v50 }
 0x131   : > { %4617 = vmatmul.mubr.msk.bf16.gmra.mrb[64].mxu1 %vm4185_vm13, %v8267_v53  ;;  %4661 = vmatmul.mubr.msk.bf16.vlgmr.msra.gmra.mrb[52].mxu0 %vm4199_vm15, %v8267_v53  ;;  %vm4189_vm12 = vmpackc.low %vm1031_vm10, %vm1030_vm9  ;;  %vm1033_vm13 = vcmp.eq.s32.totalorder %v5909_v32, %v5567_v50  ;;  %vm1037_vm10 = vcmp.eq.s32.totalorder %v5944_v47, %v5567_v50 }
 0x132   : > { %1931 = vperm.xlu1 %4987, %v5458_v26   ;;  %v1212_v21 = vpop.permute.xlu1 %1211  ;;  %4620 = vmatprep.mubr.msk.bf16.mxu1 %vm5280_vm0, %v8261_v2  ;;  %vm4191_vm2 = vmpackc.low %vm1033_vm13, %vm1032_vm1  ;;  %vm1036_vm13 = vcmp.eq.s32.totalorder %v5902_v39, %v5567_v50  ;;  %vm1038_vm1 = vcmp.eq.s32.totalorder %v5921_v9, %v5567_v50 }
 0x133   : > { %v5979_v51 = vpop.permute.xlu0 %1229  ;;  %4664 = vmatprep.mubr.msk.bf16.mxu0 %vm5280_vm0, %v8261_v2  ;;  %4705 = vmatpush3.bf16.msra.mxu1 %v5430_v20  ;;  %vm1257_vm3 = vcmp.eq.s32.totalorder %v1212_v21, %v5567_v50 }
 0x134   : > { %4706 = vmatprep.subr.bf16.mxu1 %v8261_v2  ;;  %4749 = vmatpush3.bf16.msra.mxu0 %v5915_v42 }
 0x135   : > { %4750 = vmatprep.subr.bf16.mxu0 %v8261_v2 }
 0x136   : > { %1937 = vperm.xlu1 %4987, %v5475_v31   ;;  %v1215_v26 = vpop.permute.xlu1 %1214 }
 0x137   : > { %vm1258_vm5 = vcmp.eq.s32.totalorder %v1215_v26, %v5567_v50  ;;  %v5994_v20 = vpop.permute.xlu0 %1235  ;;  %4707 = vmatpush3.bf16.msra.mxu1 %v5443_v24 }
 0x138   : > { %vm4201_vm6 = vmpackc.low %vm1258_vm5, %vm1257_vm3  ;;  %4708 = vmatprep.subr.bf16.mxu1 %v8261_v2  ;;  %4751 = vmatpush3.bf16.msra.mxu0 %v5936_v8  ;;  %vm1263_vm5 = vcmp.eq.s32.totalorder %v5979_v51, %v5567_v50 }
 0x139   : > { %4621 = vmatmul.mubr.msk.bf16.gmra.mrb[68].mxu1 %vm4187_vm4, %v8267_v53  ;;  %4665 = vmatmul.mubr.msk.bf16.gmra.mrb[56].mxu0 %vm4201_vm6, %v8267_v53  ;;  %vm1035_vm4 = vcmp.eq.s32.totalorder %v5930_v37, %v5567_v50 }
 0x13a   : > { %1943 = vperm.xlu1 %4987, %v5492_v36   ;;  %v1221_v31 = vpop.permute.xlu1 %1220  ;;  %4624 = vmatprep.mubr.msk.bf16.mxu1 %vm5280_vm0, %v8261_v2 }
 0x13b   : > { %vm1260_vm8 = vcmp.eq.s32.totalorder %v1221_v31, %v5567_v50  ;;  %v6006_v24 = vpop.permute.xlu0 %1241  ;;  %4668 = vmatprep.mubr.msk.bf16.mxu0 %vm5280_vm0, %v8261_v2  ;;  %4709 = vmatpush3.bf16.msra.mxu1 %v5468_v30 }
 0x13c   : > { %4710 = vmatprep.subr.bf16.mxu1 %v8261_v2  ;;  %4752 = vmatprep.subr.bf16.mxu0 %v8261_v2  ;;  %vm4203_vm11 = vmpackc.low %vm1260_vm8, %vm1259_vm7  ;;  %vm1034_vm7 = vcmp.eq.s32.totalorder %v5887_v38, %v5567_v50 }
 0x13d   : > { %4753 = vmatpush3.bf16.msra.mxu0 %v5953_v48  ;;  %vm4193_vm8 = vmpackc.low %vm1035_vm4, %vm1034_vm7  ;;  %vm1267_vm4 = vcmp.eq.s32.totalorder %v6006_v24, %v5567_v50 }
 0x13e   : > { %1949 = vperm.xlu1 %4987, %v5504_v40   ;;  %v1227_v36 = vpop.permute.xlu1 %1226  ;;  %4754 = vmatprep.subr.bf16.mxu0 %v8261_v2 }
 0x13f   : > { %v6020_v52 = vpop.permute.xlu0 %1247  ;;  %4711 = vmatpush3.bf16.msra.mxu1 %v5485_v35  ;;  %vm1262_vm15 = vcmp.eq.s32.totalorder %v1227_v36, %v5567_v50 }
 0x140   : > { %4800 = vmatprep.subr.bf16.mxu1 %v8261_v2  ;;  %vm4205_vm3 = vmpackc.low %vm1262_vm15, %vm1261_vm14 }
 0x141   : > { %4625 = vmatmul.mubr.msk.bf16.gmra.mrb[72].mxu1 %vm4189_vm12, %v8267_v53  ;;  %4669 = vmatmul.mubr.msk.bf16.gmra.mrb[60].mxu0 %vm4203_vm11, %v8267_v53  ;;  %vm1265_vm11 = vcmp.eq.s32.totalorder %v5994_v20, %v5567_v50  ;;  %vm4195_vm14 = vmpackc.low %vm1037_vm10, %vm1036_vm13 }
 0x142   : > { %v1233_v30 = vpop.permute.xlu1 %1232  ;;  %4628 = vmatprep.mubr.msk.bf16.mxu1 %vm5280_vm0, %v8261_v2  ;;  %4672 = vmatprep.mubr.msk.bf16.mxu0 %vm5280_vm0, %v8261_v2 }
 0x143   : > { %v6030_v40 = vpop.permute.xlu0 %1253  ;;  %4755 = vmatpush3.bf16.msra.mxu0 %v5970_v49  ;;  %4997 = vset.pattern.permute.xlu1 %v8245_v1  ;;  %vm1264_vm6 = vcmp.eq.s32.totalorder %v1233_v30, %v5567_v50 }
 0x144   : > { %4756 = vmatprep.subr.bf16.mxu0 %v8261_v2  ;;  %vm4207_vm9 = vmpackc.low %vm1264_vm6, %vm1263_vm5 }
 0x146   : > { %v1239_v35 = vpop.permute.xlu1 %1238 }
 0x147   : > { %4757 = vmatpush3.bf16.msra.mxu0 %v6045_v54  ;;  %vm1266_vm12 = vcmp.eq.s32.totalorder %v1239_v35, %v5567_v50 }
 0x148   : > { %v1442_v55 = vpop.permute.xlu0 %1441  ;;  %4758 = vmatprep.subr.bf16.mxu0 %v8261_v2  ;;  %vm4209_vm15 = vmpackc.low %vm1266_vm12, %vm1265_vm11  ;;  %vm1271_vm12 = vcmp.eq.s32.totalorder %v6030_v40, %v5567_v50 }
 0x149   : > { %4629 = vmatmul.mubr.msk.bf16.gmra.mrb[76].mxu1 %vm4191_vm2, %v8267_v53  ;;  %4673 = vmatmul.mubr.msk.bf16.gmra.mrb[64].mxu0 %vm4205_vm3, %v8267_v53  ;;  %vm4197_vm3 = vmpackc.low %vm1038_vm1, %vm1038_vm1  ;;  %vm1489_vm7 = vcmp.eq.s32.totalorder %v1442_v55, %v5567_v50 }
 0x14a   : > { %v1245_v57 = vpop.permute.xlu1 %1244  ;;  %4632 = vmatprep.mubr.msk.bf16.mxu1 %vm5280_vm0, %v8261_v2  ;;  %4676 = vmatprep.mubr.msk.bf16.mxu0 %vm5280_vm0, %v8261_v2 }
 0x14b   : > { %4759 = vmatpush3.bf16.msra.mxu0 %v6058_v58  ;;  %vm1268_vm2 = vcmp.eq.s32.totalorder %v1245_v57, %v5567_v50 }
 0x14c   : > { %4760 = vmatprep.subr.bf16.mxu0 %v8261_v2  ;;  %v6069_v61 = vpop.permute.xlu0 %1450  ;;  %vm4211_vm5 = vmpackc.low %vm1268_vm2, %vm1267_vm4 }
 0x14d   : > { %vm1492_vm2 = vcmp.eq.s32.totalorder %v6069_v61, %v5567_v50 }
 0x14e   : > { %v1251_v60 = vpop.permute.xlu1 %1250 }
 0x14f   : > { %4761 = vmatpush3.bf16.msra.mxu0 %v6074_v0  ;;  %vm1270_vm6 = vcmp.eq.s32.totalorder %v1251_v60, %v5567_v50 }
 0x150   : > { %4762 = vmatprep.subr.bf16.mxu0 %v8261_v2  ;;  %v6092_v5 = vpop.permute.xlu0 %1456 }
 0x151   : > { %4633 = vmatmul.mubr.msk.bf16.gmra.mrb[80].mxu1 %vm4193_vm8, %v8267_v53  ;;  %4677 = vmatmul.mubr.msk.bf16.gmra.mrb[68].mxu0 %vm4207_vm9, %v8267_v53  ;;  %vm1269_vm9 = vcmp.eq.s32.totalorder %v6020_v52, %v5567_v50 }
 0x152   : > { %4636 = vmatprep.mubr.msk.bf16.mxu1 %vm5280_vm0, %v8261_v2  ;;  %4680 = vmatprep.mubr.msk.bf16.mxu0 %vm5280_vm0, %v8261_v2  ;;  %vm4213_vm10 = vmpackc.low %vm1270_vm6, %vm1269_vm9 }
 0x153   : > { %v1439_v62 = vpop.permute.xlu1 %1438  ;;  %4763 = vmatpush3.bf16.msra.mxu0 %v6087_v63 }
 0x154   : > { %4852 = vmatprep.subr.bf16.mxu0 %v8261_v2  ;;  %v6102_v6 = vpop.permute.xlu0 %1462  ;;  %vm1488_vm8 = vcmp.eq.s32.totalorder %v1439_v62, %v5567_v50 }
 0x155   : > { %vm4217_vm11 = vmpackc.low %vm1489_vm7, %vm1488_vm8  ;;  %vm1494_vm8 = vcmp.eq.s32.totalorder %v6092_v5, %v5567_v50 }
 0x157   : > { %v1445_v3 = vpop.permute.xlu1 %1444 }
 0x158   : > { %v6113_v4 = vpop.permute.xlu0 %1468  ;;  %vm1490_vm13 = vcmp.eq.s32.totalorder %v1445_v3, %v5567_v50 }
 0x159   : > { %4637 = vmatmul.mubr.msk.bf16.gmra.mrb[84].mxu1 %vm4195_vm14, %v8267_v53  ;;  %4681 = vmatmul.mubr.msk.bf16.gmra.mrb[72].mxu0 %vm4209_vm15, %v8267_v53  ;;  %vm4215_vm15 = vmpackc.low %vm1271_vm12, %vm1271_vm12 }
 0x15a   : > { %4640 = vmatprep.mubr.msk.bf16.mxu1 %vm5280_vm0, %v8261_v2  ;;  %4684 = vmatprep.mubr.msk.bf16.mxu0 %vm5280_vm0, %v8261_v2 }
 0x15b   : > { %v1448_v7 = vpop.permute.xlu1 %1447 }
 0x15c   : > { %v6126_v14 = vpop.permute.xlu0 %1474  ;;  %vm1491_vm14 = vcmp.eq.s32.totalorder %v1448_v7, %v5567_v50 }
 0x15d   : > { %vm4219_vm1 = vmpackc.low %vm1491_vm14, %vm1490_vm13  ;;  %vm1496_vm14 = vcmp.eq.s32.totalorder %v6102_v6, %v5567_v50 }
 0x15f   : > { %v1454_v10 = vpop.permute.xlu1 %1453 }
 0x160   : > { %v6142_v19 = vpop.permute.xlu0 %1480 }
 0x161   : > { %4641 = vmatmul.mubr.msk.bf16.gmra.mrb[88].mxu1 %vm4197_vm3, %v8267_v53  ;;  %4685 = vmatmul.mubr.msk.bf16.gmra.mrb[76].mxu0 %vm4211_vm5, %v8267_v53  ;;  %vm1493_vm3 = vcmp.eq.s32.totalorder %v1454_v10, %v5567_v50 }
 0x162   : > { %4688 = vmatprep.mubr.msk.bf16.mxu0 %vm5280_vm0, %v8261_v2  ;;  %4712 = vmatprep.mubr.msk.bf16.mxu1 %vm5280_vm0, %v8261_v2  ;;  %vm4221_vm5 = vmpackc.low %vm1493_vm3, %vm1492_vm2 }
 0x163   : > { %v1460_v11 = vpop.permute.xlu1 %1459 }
 0x164   : > { %v6152_v29 = vpop.permute.xlu0 %1486  ;;  %vm1495_vm9 = vcmp.eq.s32.totalorder %v1460_v11, %v5567_v50 }
 0x167   : > { %v6128_v15 = vpop.permute.xlu1 %1465 }
 0x169   : > { %4689 = vmatmul.mubr.msk.bf16.gmra.mrb[80].mxu0 %vm4213_vm10, %v8267_v53  ;;  %4713 = vmatmul.mubr.msk.bf16.vlgmr.msra.gmra.mrb[92].mxu1 %vm4217_vm11, %v8267_v53  ;;  %v1675_v33 = vpop.permute.xlu0 %1674  ;;  %vm4223_vm11 = vmpackc.low %vm1495_vm9, %vm1494_vm8 }
 0x16a   : > { %4801 = vmatpush3.bf16.msra.mxu1 %v5915_v42  ;;  %4692 = vmatprep.mubr.msk.bf16.mxu0 %vm5280_vm0, %v8261_v2  ;;  %vm1722_vm4 = vcmp.eq.s32.totalorder %v1675_v33, %v5567_v50 }
 0x16b   : > { %v6135_v17 = vpop.permute.xlu1 %1471  ;;  %4716 = vmatprep.mubr.msk.bf16.mxu1 %vm5280_vm0, %v8261_v2  ;;  %4802 = vmatprep.subr.bf16.mxu1 %v8261_v2 }
 0x16d   : > { %v1684_v32 = vpop.permute.xlu0 %1683 }
 0x16e   : > { %4803 = vmatpush3.bf16.msra.mxu1 %v5936_v8 }
 0x16f   : > { %v6147_v28 = vpop.permute.xlu1 %1477  ;;  %4804 = vmatprep.subr.bf16.mxu1 %v8261_v2 }
 0x171   : > { %4693 = vmatmul.mubr.msk.bf16.gmra.mrb[84].mxu0 %vm4215_vm15, %v8267_v53  ;;  %4717 = vmatmul.mubr.msk.bf16.gmra.mrb[96].mxu1 %vm4219_vm1, %v8267_v53  ;;  %vm1497_vm15 = vcmp.eq.s32.totalorder %v6128_v15, %v5567_v50  ;;  %vm1725_vm1 = vcmp.eq.s32.totalorder %v1684_v32, %v5567_v50 }
 0x172   : > { %4720 = vmatprep.mubr.msk.bf16.mxu1 %vm5280_vm0, %v8261_v2  ;;  %4764 = vmatprep.mubr.msk.bf16.mxu0 %vm5280_vm0, %v8261_v2  ;;  %vm4225_vm3 = vmpackc.low %vm1497_vm15, %vm1496_vm14 }
 0x173   : > { %v6158_v13 = vpop.permute.xlu1 %1483  ;;  %4805 = vmatpush3.bf16.msra.mxu1 %v5953_v48  ;;  %v1690_v48 = vpop.permute.xlu0 %1689 }
 0x174   : > { %4806 = vmatprep.subr.bf16.mxu1 %v8261_v2 }
 0x177   : > { %4807 = vmatpush3.bf16.msra.mxu1 %v5970_v49  ;;  %v1696_v31 = vpop.permute.xlu0 %1695 }
 0x178   : > { %v1672_v18 = vpop.permute.xlu1 %1671  ;;  %4808 = vmatprep.subr.bf16.mxu1 %v8261_v2  ;;  %v6169_v34 = vpop.f32.mrb[0].mxu0 }
 0x179   : > { %vm1721_vm6 = vcmp.eq.s32.totalorder %v1672_v18, %v5567_v50  ;;  %8489 = vst [vmem:[#allocation6_spill] sm:$0xff] %v6169_v34  ;;  %4721 = vmatmul.mubr.msk.bf16.gmra.mrb[100].mxu1 %vm4221_vm5, %v8267_v53  ;;  %v4454_v22 = vpop.f32.mrb[1].mxu0  ;;  %vm1499_vm5 = vcmp.eq.s32.totalorder %v6135_v17, %v5567_v50 }
 0x17a   : > { %vm4235_vm7 = vmpackc.low %vm1722_vm4, %vm1721_vm6  ;;  %4724 = vmatprep.mubr.msk.bf16.mxu1 %vm5280_vm0, %v8261_v2  ;;  %v6174_v38 = vpop.f32.mrb[2].mxu0  ;;  %vm1498_vm6 = vcmp.eq.s32.totalorder %v6113_v4, %v5567_v50 }
 0x17b   : > { %8490 = vst [vmem:[#allocation7_spill] sm:$0xff] %v6174_v38  ;;  %4765 = vmatmul.mubr.msk.bf16.vlgmr.msra.gmra.mrb[88].mxu0 %vm4235_vm7, %v8267_v53  ;;  %4809 = vmatpush3.bf16.msra.mxu1 %v6045_v54  ;;  %v4455_v27 = vpop.f32.mrb[3].mxu0  ;;  %vm1727_vm7 = vcmp.eq.s32.totalorder %v1690_v48, %v5567_v50  ;;  %vm4227_vm9 = vmpackc.low %vm1499_vm5, %vm1498_vm6  ;;  %v1702_v55 = vpop.permute.xlu0 %1701 }
 0x17c   : > { %v1678_v39 = vpop.permute.xlu1 %1677  ;;  %4768 = vmatprep.mubr.msk.bf16.mxu0 %vm5280_vm0, %v8261_v2  ;;  %4810 = vmatprep.subr.bf16.mxu1 %v8261_v2  ;;  %vm1731_vm6 = vcmp.eq.s32.totalorder %v1702_v55, %v5567_v50 }
 0x17d   : > { %vm1723_vm10 = vcmp.eq.s32.totalorder %v1678_v39, %v5567_v50 }
 0x17f   : > { %4811 = vmatpush3.bf16.msra.mxu1 %v6058_v58  ;;  %v1708_v5 = vpop.permute.xlu0 %1707 }
 0x180   : > { %v1681_v42 = vpop.permute.xlu1 %1680  ;;  %4812 = vmatprep.subr.bf16.mxu1 %v8261_v2  ;;  %v6188_v9 = vpop.f32.mrb[4].mxu0 }
 0x181   : > { %vm1724_vm12 = vcmp.eq.s32.totalorder %v1681_v42, %v5567_v50  ;;  %8491 = vst [vmem:[#allocation8_spill] sm:$0xff] %v6188_v9  ;;  %4725 = vmatmul.mubr.msk.bf16.gmra.mrb[104].mxu1 %vm4223_vm11, %v8267_v53  ;;  %v4458_v37 = vpop.f32.mrb[5].mxu0  ;;  %vm1501_vm11 = vcmp.eq.s32.totalorder %v6147_v28, %v5567_v50 }
 0x182   : > { %vm4237_vm13 = vmpackc.low %vm1724_vm12, %vm1723_vm10  ;;  %4728 = vmatprep.mubr.msk.bf16.mxu1 %vm5280_vm0, %v8261_v2  ;;  %v6193_v8 = vpop.f32.mrb[6].mxu0  ;;  %vm1500_vm12 = vcmp.eq.s32.totalorder %v6126_v14, %v5567_v50 }
 0x183   : > { %8492 = vst [vmem:[#allocation9_spill] sm:$0xff] %v6193_v8  ;;  %4769 = vmatmul.mubr.msk.bf16.gmra.mrb[92].mxu0 %vm4237_vm13, %v8267_v53  ;;  %4813 = vmatpush3.bf16.msra.mxu1 %v6074_v0  ;;  %v4459_v41 = vpop.f32.mrb[7].mxu0  ;;  %vm1729_vm13 = vcmp.eq.s32.totalorder %v1696_v31, %v5567_v50  ;;  %vm4229_vm15 = vmpackc.low %vm1501_vm11, %vm1500_vm12  ;;  %v1714_v4 = vpop.permute.xlu0 %1713  ;;  %vm1733_vm11 = vcmp.eq.s32.totalorder %v1708_v5, %v5567_v50 }
 0x184   : > { %v1687_v47 = vpop.permute.xlu1 %1686  ;;  %4772 = vmatprep.mubr.msk.bf16.mxu0 %vm5280_vm0, %v8261_v2  ;;  %4814 = vmatprep.subr.bf16.mxu1 %v8261_v2  ;;  %v6206_v12 = vpop.f32.mrb[0].mxu1 }
 0x185   : > { %vm1726_vm2 = vcmp.eq.s32.totalorder %v1687_v47, %v5567_v50  ;;  %8493 = vst [vmem:[#allocation10_spill] sm:$0xff] %v6206_v12  ;;  %v4470_v16 = vpop.f32.mrb[1].mxu1 }
 0x186   : > { %v6208_v43 = vpop.f32.mrb[2].mxu1  ;;  %vm4239_vm4 = vmpackc.low %vm1726_vm2, %vm1725_vm1  ;;  %vm1503_vm2 = vcmp.eq.s32.totalorder %v6158_v13, %v5567_v50 }
 0x187   : > { %8494 = vst [vmem:[#allocation11_spill] sm:$0xff] %v6208_v43  ;;  %4815 = vmatpush3.bf16.msra.mxu1 %v6087_v63  ;;  %v4471_v49 = vpop.f32.mrb[3].mxu1  ;;  %v1720_v17 = vpop.permute.xlu0 %1719 }
 0x188   : > { %v6211_v21 = vpop.f32.mrb[8].mxu0  ;;  %v1693_v51 = vpop.permute.xlu1 %1692 }
 0x189   : > { %8495 = vst [vmem:[#allocation12_spill] sm:$0xff] %v6211_v21  ;;  %4729 = vmatmul.mubr.msk.bf16.gmra.mrb[108].mxu1 %vm4225_vm3, %v8267_v53  ;;  %v4462_v26 = vpop.f32.mrb[9].mxu0  ;;  %vm1728_vm8 = vcmp.eq.s32.totalorder %v1693_v51, %v5567_v50  ;;  %vm1502_vm3 = vcmp.eq.s32.totalorder %v6142_v19, %v5567_v50 }
 0x18a   : > { %4732 = vmatprep.mubr.msk.bf16.mxu1 %vm5280_vm0, %v8261_v2  ;;  %v6216_v20 = vpop.f32.mrb[10].mxu0  ;;  %vm4241_vm10 = vmpackc.low %vm1728_vm8, %vm1727_vm7  ;;  %vm1504_vm8 = vcmp.eq.s32.totalorder %v6152_v29, %v5567_v50 }
 0x18b   : > { %8496 = vst [vmem:[#allocation13_spill] sm:$0xff] %v6216_v20  ;;  %4773 = vmatmul.mubr.msk.bf16.gmra.mrb[96].mxu0 %vm4239_vm4, %v8267_v53  ;;  %v4463_v24 = vpop.f32.mrb[11].mxu0  ;;  %vm4231_vm5 = vmpackc.low %vm1503_vm2, %vm1502_vm3  ;;  %v1908_v22 = vpop.permute.xlu0 %1907  ;;  %vm1735_vm2 = vcmp.eq.s32.totalorder %v1714_v4, %v5567_v50 }
 0x18c   : > { %4776 = vmatprep.mubr.msk.bf16.mxu0 %vm5280_vm0, %v8261_v2  ;;  %v6223_v36 = vpop.f32.mrb[4].mxu1  ;;  %v1699_v40 = vpop.permute.xlu1 %1698 }
 0x18d   : > { %8497 = vst [vmem:[#allocation14_spill] sm:$0xff] %v6223_v36  ;;  %v4474_v52 = vpop.f32.mrb[5].mxu1  ;;  %vm1730_vm14 = vcmp.eq.s32.totalorder %v1699_v40, %v5567_v50 }
 0x18e   : > { %v6229_v30 = vpop.f32.mrb[6].mxu1  ;;  %vm4243_vm1 = vmpackc.low %vm1730_vm14, %vm1729_vm13  ;;  %vm1955_vm13 = vcmp.eq.s32.totalorder %v1908_v22, %v5567_v50 }
 0x18f   : > { %8498 = vst [vmem:[#allocation15_spill] sm:$0xff] %v6229_v30  ;;  %v4475_v35 = vpop.f32.mrb[7].mxu1  ;;  %v1917_v24 = vpop.permute.xlu0 %1916 }
 0x190   : > { %v6231_v54 = vpop.f32.mrb[12].mxu0  ;;  %v1705_v0 = vpop.permute.xlu1 %1704 }
 0x191   : > { %8499 = vst [vmem:[#allocation16_spill] sm:$0xff] %v6231_v54  ;;  %4733 = vmatmul.mubr.msk.bf16.gmra.mrb[112].mxu1 %vm4227_vm9, %v8267_v53  ;;  %v4466_v57 = vpop.f32.mrb[13].mxu0  ;;  %vm1732_vm4 = vcmp.eq.s32.totalorder %v1705_v0, %v5567_v50 }
 0x192   : > { %4736 = vmatprep.mubr.msk.bf16.mxu1 %vm5280_vm0, %v8261_v2  ;;  %v6236_v58 = vpop.f32.mrb[14].mxu0  ;;  %vm4245_vm7 = vmpackc.low %vm1732_vm4, %vm1731_vm6  ;;  %vm1737_vm6 = vcmp.eq.s32.totalorder %v1720_v17, %v5567_v50 }
 0x193   : > { %8500 = vst [vmem:[#allocation17_spill] sm:$0xff] %v6236_v58  ;;  %4777 = vmatmul.mubr.msk.bf16.gmra.mrb[100].mxu0 %vm4241_vm10, %v8267_v53  ;;  %v4467_v60 = vpop.f32.mrb[15].mxu0  ;;  %vm4233_vm10 = vmpackc.low %vm1504_vm8, %vm1504_vm8  ;;  %v1923_v17 = vpop.permute.xlu0 %1922 }
 0x194   : > { %4780 = vmatprep.mubr.msk.bf16.mxu0 %vm5280_vm0, %v8261_v2  ;;  %v6243_v61 = vpop.f32.mrb[8].mxu1  ;;  %v1711_v6 = vpop.permute.xlu1 %1710  ;;  %vm4251_vm8 = vmpackc.low %vm1737_vm6, %vm1737_vm6 }
 0x195   : > { %8501 = vst [vmem:[#allocation18_spill] sm:$0xff] %v6243_v61  ;;  %v4478_v62 = vpop.f32.mrb[9].mxu1  ;;  %vm1734_vm9 = vcmp.eq.s32.totalorder %v1711_v6, %v5567_v50 }
 0x196   : > { %v6249_v63 = vpop.f32.mrb[10].mxu1  ;;  %vm4247_vm12 = vmpackc.low %vm1734_vm9, %vm1733_vm11  ;;  %vm1958_vm9 = vcmp.eq.s32.totalorder %v1917_v24, %v5567_v50 }
 0x197   : > { %8502 = vst [vmem:[#allocation19_spill] sm:$0xff] %v6249_v63  ;;  %v4479_v3 = vpop.f32.mrb[11].mxu1 }
 0x198   : > { %v1717_v15 = vpop.permute.xlu1 %1716 }
 0x199   : > { %4737 = vmatmul.mubr.msk.bf16.gmra.mrb[116].mxu1 %vm4229_vm15, %v8267_v53 }
 0x19a   : > { %4740 = vmatprep.mubr.msk.bf16.mxu1 %vm5280_vm0, %v8261_v2 }
 0x19b   : > { %4781 = vmatmul.mubr.msk.bf16.gmra.mrb[104].mxu0 %vm4243_vm1, %v8267_v53  ;;  %vm1736_vm1 = vcmp.eq.s32.totalorder %v1717_v15, %v5567_v50 }
 0x19c   : > { %v6255_v7 = vpop.f32.mrb[12].mxu1  ;;  %4784 = vmatprep.mubr.msk.bf16.mxu0 %vm5280_vm0, %v8261_v2  ;;  %vm4249_vm3 = vmpackc.low %vm1736_vm1, %vm1735_vm2 }
 0x19d   : > { %8503 = vst [vmem:[#allocation20_spill] sm:$0xff] %v6255_v7  ;;  %v4482_v10 = vpop.f32.mrb[13].mxu1  ;;  %v1905_v18 = vpop.permute.xlu1 %1904 }
 0x19e   : > { %v6261_v11 = vpop.f32.mrb[14].mxu1  ;;  %vm1954_vm14 = vcmp.eq.s32.totalorder %v1905_v18, %v5567_v50 }
 0x19f   : > { %8504 = vst [vmem:[#allocation21_spill] sm:$0xff] %v6261_v11  ;;  %v4483_v14 = vpop.f32.mrb[15].mxu1  ;;  %vm4253_vm15 = vmpackc.low %vm1955_vm13, %vm1954_vm14 }
 0x1a1   : > { %4741 = vmatmul.mubr.msk.bf16.gmra.mrb[120].mxu1 %vm4231_vm5, %v8267_v53  ;;  %v1911_v32 = vpop.permute.xlu1 %1910 }
 0x1a2   : > { %4744 = vmatprep.mubr.msk.bf16.mxu1 %vm5280_vm0, %v8261_v2  ;;  %vm1956_vm4 = vcmp.eq.s32.totalorder %v1911_v32, %v5567_v50 }
 0x1a3   : > { %4785 = vmatmul.mubr.msk.bf16.gmra.mrb[108].mxu0 %vm4245_vm7, %v8267_v53 }
 0x1a4   : > { %v6271_v28 = vpop.f32.mrb[16].mxu1  ;;  %4788 = vmatprep.mubr.msk.bf16.mxu0 %vm5280_vm0, %v8261_v2 }
 0x1a5   : > { %8505 = vst [vmem:[#allocation22_spill] sm:$0xff] %v6271_v28  ;;  %v4486_v19 = vpop.f32.mrb[17].mxu1  ;;  %v1914_v47 = vpop.permute.xlu1 %1913 }
 0x1a6   : > { %v468_v13 = vpop.f32.mrb[18].mxu1  ;;  %vm1957_vm5 = vcmp.eq.s32.totalorder %v1914_v47, %v5567_v50 }
 0x1a7   : > { %v4487_v33 = vpop.f32.mrb[19].mxu1  ;;  %vm4255_vm7 = vmpackc.low %vm1957_vm5, %vm1956_vm4 }
 0x1a9   : > { %4745 = vmatmul.mubr.msk.bf16.gmra.mrb[124].mxu1 %vm4233_vm10, %v8267_v53  ;;  %v1920_v40 = vpop.permute.xlu1 %1919 }
 0x1aa   : > { %4816 = vmatprep.mubr.msk.bf16.mxu1 %vm5280_vm0, %v8261_v2  ;;  %vm1959_vm10 = vcmp.eq.s32.totalorder %v1920_v40, %v5567_v50 }
 0x1ab   : > { %4789 = vmatmul.mubr.msk.bf16.gmra.mrb[112].mxu0 %vm4247_vm12, %v8267_v53  ;;  %vm4257_vm11 = vmpackc.low %vm1959_vm10, %vm1958_vm9  ;;  %vm1960_vm12 = vcmp.eq.s32.totalorder %v1923_v17, %v5567_v50 }
 0x1ac   : > { %v6285_v29 = vpop.f32.mrb[20].mxu1  ;;  %4792 = vmatprep.mubr.msk.bf16.mxu0 %vm5280_vm0, %v8261_v2 }
 0x1ad   : > { %8506 = vst [vmem:[#allocation23_spill] sm:$0xff] %v6285_v29  ;;  %v721_v27 = vadd.f32 %v6285_v29, %v6169_v34  ;;  %v4506_v39 = vpop.f32.mrb[21].mxu1  ;;  %v1926_v14 = vpop.permute.xlu1 %1925 }
 0x1ae   : > { %v6291_v42 = vpop.f32.mrb[22].mxu1  ;;  %vm1961_vm13 = vcmp.eq.s32.totalorder %v1926_v14, %v5567_v50 }
 0x1af   : > { %8507 = vst [vmem:[#allocation24_spill] sm:$0xff] %v6291_v42  ;;  %v722_v37 = vadd.f32 %v6291_v42, %v6174_v38  ;;  %v4507_v41 = vpop.f32.mrb[23].mxu1  ;;  %vm4259_vm14 = vmpackc.low %vm1961_vm13, %vm1960_vm12 }
 0x1b1   : > { %4817 = vmatmul.mubr.msk.bf16.vlgmr.msra.gmra.mrb[128].mxu1 %vm4253_vm15, %v8267_v53 }
 0x1b2   : > { %4820 = vmatprep.mubr.msk.bf16.mxu1 %vm5280_vm0, %v8261_v2 }
 0x1b3   : > { %4793 = vmatmul.mubr.msk.bf16.gmra.mrb[116].mxu0 %vm4249_vm3, %v8267_v53 }
 0x1b4   : > { %v6301_v48 = vpop.f32.mrb[24].mxu1  ;;  %4796 = vmatprep.mubr.msk.bf16.mxu0 %vm5280_vm0, %v8261_v2 }
 0x1b5   : > { %8508 = vst [vmem:[#allocation25_spill] sm:$0xff] %v6301_v48  ;;  %v723_v16 = vadd.f32 %v6301_v48, %v6188_v9  ;;  %v4510_v49 = vpop.f32.mrb[25].mxu1 }
 0x1b6   : > { %v6309_v51 = vpop.f32.mrb[26].mxu1  ;;  %v1932_v49 = vpop.permute.xlu1 %1931 }
 0x1b7   : > { %8509 = vst [vmem:[#allocation26_spill] sm:$0xff] %v6309_v51  ;;  %v724_v26 = vadd.f32 %v6309_v51, %v6193_v8  ;;  %v4511_v31 = vpop.f32.mrb[27].mxu1  ;;  %vm1963_vm15 = vcmp.eq.s32.totalorder %v1932_v49, %v5567_v50 }
 0x1b8   : > { %v1929_v31 = vpop.permute.xlu0 %1928 }
 0x1b9   : > { %4821 = vmatmul.mubr.msk.bf16.gmra.mrb[132].mxu1 %vm4255_vm7, %v8267_v53  ;;  %vm1962_vm1 = vcmp.eq.s32.totalorder %v1929_v31, %v5567_v50 }
 0x1ba   : > { %v6315_v52 = vpop.f32.mrb[16].mxu0  ;;  %4824 = vmatprep.mubr.msk.bf16.mxu1 %vm5280_vm0, %v8261_v2  ;;  %vm4261_vm2 = vmpackc.low %vm1963_vm15, %vm1962_vm1  ;;  %vm2910_vm15 = vcmask 23552   ;;  %vm2928_vm1 = vcmask 31744  }
 0x1bb   : > { %8510 = vst [vmem:[#allocation27_spill] sm:$0xff] %v6315_v52  ;;  %v6320_v35 = vadd.f32 %v6315_v52, %v721_v27  ;;  %v4558_v55 = vpop.f32.mrb[17].mxu0  ;;  %4797 = vmatmul.mubr.msk.bf16.gmra.mrb[120].mxu0 %vm4251_vm8, %v8267_v53 }
 0x1bc   : > { %v6323_v57 = vpop.f32.mrb[28].mxu1  ;;  %v6325_v60 = vpop.f32.mrb[18].mxu0  ;;  %4868 = vmatprep.mubr.msk.bf16.mxu0 %vm5280_vm0, %v8261_v2 }
 0x1bd   : > { %8511 = vst [vmem:[#allocation28_spill] sm:$0xff] %v6323_v57  ;;  %8512 = vst [vmem:[#allocation29_spill] sm:$0xff] %v6325_v60  ;;  %v725_v0 = vadd.f32 %v6323_v57, %v6211_v21  ;;  %v6334_v62 = vadd.f32 %v6325_v60, %v722_v37  ;;  %v4514_v5 = vpop.f32.mrb[29].mxu1  ;;  %v4559_v6 = vpop.f32.mrb[19].mxu0  ;;  %v5130_v37 = vld [vmem:[%s8243_s2] sm:$0xff]  }
 0x1be   : > { %v6336_v3 = vpop.f32.mrb[30].mxu1  ;;  %4853 = vmatpush3.bf16.msra.mxu0 %v5130_v37 }
 0x1bf   : > { %8513 = vst [vmem:[#allocation30_spill] sm:$0xff] %v6336_v3  ;;  %v726_v10 = vadd.f32 %v6336_v3, %v6216_v20  ;;  %v4515_v4 = vpop.f32.mrb[31].mxu1  ;;  %4854 = vmatprep.subr.bf16.mxu0 %v8261_v2 }
 0x1c1   : > { %4825 = vmatmul.mubr.msk.bf16.gmra.mrb[136].mxu1 %vm4257_vm11, %v8267_v53 }
 0x1c2   : > { %v6341_v15 = vpop.f32.mrb[20].mxu0  ;;  %4828 = vmatprep.mubr.msk.bf16.mxu1 %vm5280_vm0, %v8261_v2 }
 0x1c3   : > { %8514 = vst [vmem:[#allocation31_spill] sm:$0xff] %v6341_v15  ;;  %v6346_v19 = vadd.f32 %v6341_v15, %v723_v16  ;;  %v4562_v13 = vpop.f32.mrb[21].mxu0 }
 0x1c4   : > { %v6348_v33 = vpop.f32.mrb[32].mxu1  ;;  %v6350_v18 = vpop.f32.mrb[22].mxu0 }
 0x1c5   : > { %8515 = vst [vmem:[#allocation32_spill] sm:$0xff] %v6348_v33  ;;  %8516 = vst [vmem:[#allocation33_spill] sm:$0xff] %v6350_v18  ;;  %v727_v22 = vadd.f32 %v6348_v33, %v6231_v54  ;;  %v6357_v27 = vadd.f32 %v6350_v18, %v724_v26  ;;  %v4518_v39 = vpop.f32.mrb[33].mxu1  ;;  %v4563_v32 = vpop.f32.mrb[23].mxu0 }
 0x1c6   : > { %v6362_v41 = vpop.f32.mrb[34].mxu1  ;;  %v5131_v32 = vld [vmem:[%s8243_s2 + $0x8] sm:$0xff]  }
 0x1c7   : > { %8517 = vst [vmem:[#allocation34_spill] sm:$0xff] %v6362_v41  ;;  %v728_v47 = vadd.f32 %v6362_v41, %v6236_v58  ;;  %v4519_v16 = vpop.f32.mrb[35].mxu1  ;;  %4855 = vmatpush3.bf16.msra.mxu0 %v5131_v32 }
 0x1c8   : > { %4856 = vmatprep.subr.bf16.mxu0 %v8261_v2  ;;  %v1935_v16 = vpop.permute.xlu0 %1934 }
 0x1c9   : > { %4829 = vmatmul.mubr.msk.bf16.gmra.mrb[140].mxu1 %vm4259_vm14, %v8267_v53  ;;  %vm1964_vm4 = vcmp.eq.s32.totalorder %v1935_v16, %v5567_v50  ;;  %vm2892_vm14 = vcmask 15360  }
 0x1ca   : > { %v6368_v26 = vpop.f32.mrb[24].mxu0  ;;  %4832 = vmatprep.mubr.msk.bf16.mxu1 %vm5280_vm0, %v8261_v2 }
 0x1cb   : > { %8518 = vst [vmem:[#allocation35_spill] sm:$0xff] %v6368_v26  ;;  %v6373_v24 = vadd.f32 %v6368_v26, %v725_v0  ;;  %v4566_v40 = vpop.f32.mrb[25].mxu0 }
 0x1cc   : > { %v6375_v55 = vpop.f32.mrb[36].mxu1  ;;  %v6377_v5 = vpop.f32.mrb[26].mxu0 }
 0x1cd   : > { %8519 = vst [vmem:[#allocation36_spill] sm:$0xff] %v6375_v55  ;;  %8520 = vst [vmem:[#allocation37_spill] sm:$0xff] %v6377_v5  ;;  %v729_v6 = vadd.f32 %v6375_v55, %v6206_v12  ;;  %v6383_v4 = vadd.f32 %v6377_v5, %v726_v10  ;;  %v4522_v14 = vpop.f32.mrb[37].mxu1  ;;  %v4567_v17 = vpop.f32.mrb[27].mxu0 }
 0x1ce   : > { %v6385_v13 = vpop.f32.mrb[38].mxu1  ;;  %v1938_v10 = vpop.permute.xlu1 %1937 }
 0x1cf   : > { %8521 = vst [vmem:[#allocation38_spill] sm:$0xff] %v6385_v13  ;;  %v730_v0 = vadd.f32 %v6385_v13, %v6208_v43  ;;  %v4523_v39 = vpop.f32.mrb[39].mxu1  ;;  %vm1965_vm3 = vcmp.eq.s32.totalorder %v1938_v10, %v5567_v50  ;;  %v5132_v10 = vld [vmem:[%s8243_s2 + $0x10] sm:$0xff]  }
 0x1d0   : > { %vm4263_vm5 = vmpackc.low %vm1965_vm3, %vm1964_vm4  ;;  %4857 = vmatpush3.bf16.msra.mxu0 %v5132_v10  ;;  %vm2964_vm3 = vcmask 48128   ;;  %vm2982_vm4 = vcmask 56320  }
 0x1d1   : > { %4833 = vmatmul.mubr.msk.bf16.gmra.mrb[144].mxu1 %vm4261_vm2, %v8267_v53  ;;  %4858 = vmatprep.subr.bf16.mxu0 %v8261_v2  ;;  %vm2946_vm2 = vcmask 39936  }
 0x1d2   : > { %v6394_v37 = vpop.f32.mrb[28].mxu0  ;;  %4836 = vmatprep.mubr.msk.bf16.mxu1 %vm5280_vm0, %v8261_v2 }
 0x1d3   : > { %8522 = vst [vmem:[#allocation39_spill] sm:$0xff] %v6394_v37  ;;  %v6400_v49 = vadd.f32 %v6394_v37, %v727_v22  ;;  %v4570_v31 = vpop.f32.mrb[29].mxu0 }
 0x1d4   : > { %v6402_v40 = vpop.f32.mrb[40].mxu1  ;;  %v6404_v14 = vpop.f32.mrb[30].mxu0 }
 0x1d5   : > { %8523 = vst [vmem:[#allocation40_spill] sm:$0xff] %v6402_v40  ;;  %8524 = vst [vmem:[#allocation41_spill] sm:$0xff] %v6404_v14  ;;  %v731_v17 = vadd.f32 %v6402_v40, %v6223_v36  ;;  %v6410_v39 = vadd.f32 %v6404_v14, %v728_v47  ;;  %v4526_v32 = vpop.f32.mrb[41].mxu1  ;;  %v4571_v1 = vpop.f32.mrb[31].mxu0 }
 0x1d6   : > { %v6412_v23 = vpop.f32.mrb[42].mxu1  ;;  %v1944_v47 = vpop.permute.xlu1 %1943 }
 0x1d7   : > { %8525 = vst [vmem:[#allocation42_spill] sm:$0xff] %v6412_v23  ;;  %v732_v22 = vadd.f32 %v6412_v23, %v6229_v30  ;;  %v4527_v31 = vpop.f32.mrb[43].mxu1  ;;  %v1941_v1 = vpop.permute.xlu0 %1940  ;;  %vm1967_vm6 = vcmp.eq.s32.totalorder %v1944_v47, %v5567_v50  ;;  %v5133_v47 = vld [vmem:[%s8243_s2 + $0x18] sm:$0xff]   ;;  %v8535_v23 = vmov 1.0|1.0  }
 0x1d8   : > { %vm1966_vm7 = vcmp.eq.s32.totalorder %v1941_v1, %v5567_v50  ;;  %4859 = vmatpush3.bf16.msra.mxu0 %v5133_v47 }
 0x1d9   : > { %4837 = vmatmul.mubr.msk.bf16.gmra.mrb[148].mxu1 %vm4263_vm5, %v8267_v53  ;;  %vm4265_vm8 = vmpackc.low %vm1967_vm6, %vm1966_vm7  ;;  %vm3000_vm5 = vcmask 64512  }
 0x1da   : > { %v6421_v59 = vpop.f32.mrb[32].mxu0  ;;  %4840 = vmatprep.mubr.msk.bf16.mxu1 %vm5280_vm0, %v8261_v2  ;;  %v1950_v2 = vpop.permute.xlu1 %1949 }
 0x1db   : > { %8526 = vst [vmem:[#allocation43_spill] sm:$0xff] %v6421_v59  ;;  %v6427_v16 = vadd.f32 %v6421_v59, %v729_v6  ;;  %v4574_v32 = vpop.f32.mrb[33].mxu0  ;;  %vm1969_vm9 = vcmp.eq.s32.totalorder %v1950_v2, %v5567_v50  ;;  %v5134_v2 = vld [vmem:[%s8243_s2 + $0x20] sm:$0xff]  }
 0x1dc   : > { %v6429_v31 = vpop.f32.mrb[44].mxu1  ;;  %v6431_v25 = vpop.f32.mrb[34].mxu0 }
 0x1dd   : > { %8527 = vst [vmem:[#allocation44_spill] sm:$0xff] %v6429_v31  ;;  %8528 = vst [vmem:[#allocation45_spill] sm:$0xff] %v6431_v25  ;;  %v733_v10 = vadd.f32 %v6429_v31, %v6243_v61  ;;  %v6437_v56 = vadd.f32 %v6431_v25, %v730_v0  ;;  %v4530_v46 = vpop.f32.mrb[45].mxu1  ;;  %v4575_v45 = vpop.f32.mrb[35].mxu0 }
 0x1de   : > { %v6439_v44 = vpop.f32.mrb[46].mxu1  ;;  %v8531_v46 = vmov 0.0   ;;  %v1947_v45 = vpop.permute.xlu0 %1946 }
 0x1df   : > { %8529 = vst [vmem:[#allocation46_spill] sm:$0xff] %v6439_v44  ;;  %v734_v6 = vadd.f32 %v6439_v44, %v6249_v63  ;;  %v4531_v32 = vpop.f32.mrb[47].mxu1  ;;  %4860 = vmatprep.subr.bf16.mxu0 %v8531_v46  ;;  %vm1968_vm10 = vcmp.eq.s32.totalorder %v1947_v45, %v5567_v50 }
 0x1e0   : > { %vm4267_vm11 = vmpackc.low %vm1969_vm9, %vm1968_vm10  ;;  %4861 = vmatpush3.bf16.msra.mxu0 %v5134_v2  ;;  %v5135_v2 = vld [vmem:[%s8243_s2 + $0x28] sm:$0xff]  }
 0x1e1   : > { %4841 = vmatmul.mubr.msk.bf16.gmra.mrb[152].mxu1 %vm4265_vm8, %v8267_v53  ;;  %4862 = vmatprep.subr.bf16.mxu0 %v8531_v46 }
 0x1e2   : > { %v6448_v0 = vpop.f32.mrb[36].mxu0  ;;  %4844 = vmatprep.mubr.msk.bf16.mxu1 %vm5280_vm0, %v8531_v46 }
 0x1e3   : > { %8530 = vst [vmem:[#allocation47_spill] sm:$0xff] %v6448_v0  ;;  %v6453_v1 = vadd.f32 %v6448_v0, %v731_v17  ;;  %v4578_v61 = vpop.f32.mrb[37].mxu0 }
 0x1e4   : > { %v6455_v32 = vpop.f32.mrb[48].mxu1  ;;  %v6457_v44 = vpop.f32.mrb[38].mxu0  ;;  %4863 = vmatpush3.bf16.msra.mxu0 %v5135_v2 }
 0x1e5   : > { %8532 = vst [vmem:[#allocation48_spill] sm:$0xff] %v6455_v32  ;;  %8533 = vst [vmem:[#allocation49_spill] sm:$0xff] %v6457_v44  ;;  %v735_v53 = vadd.f32 %v6455_v32, %v6255_v7  ;;  %v6464_v63 = vadd.f32 %v6457_v44, %v732_v22  ;;  %v4534_v31 = vpop.f32.mrb[49].mxu1  ;;  %v4579_v30 = vpop.f32.mrb[39].mxu0  ;;  %4864 = vmatprep.subr.bf16.mxu0 %v8531_v46 }
 0x1e6   : > { %v6466_v17 = vpop.f32.mrb[50].mxu1  ;;  %v1953_v7 = vpop.permute.xlu0 %1952 }
 0x1e7   : > { %8534 = vst [vmem:[#allocation50_spill] sm:$0xff] %v6466_v17  ;;  %v736_v61 = vadd.f32 %v6466_v17, %v6261_v11  ;;  %v4535_v47 = vpop.f32.mrb[51].mxu1  ;;  %vm1970_vm12 = vcmp.eq.s32.totalorder %v1953_v7, %v5567_v50 }
 0x1e8   : > { %vm4269_vm13 = vmpackc.low %vm1970_vm12, %vm1970_vm12 }
 0x1e9   : > { %4845 = vmatmul.mubr.msk.bf16.gmra.mrb[156].mxu1 %vm4267_vm11, %v8535_v23 }
 0x1ea   : > { %v6475_v22 = vpop.f32.mrb[40].mxu0  ;;  %4848 = vmatprep.mubr.msk.bf16.mxu1 %vm5280_vm0, %v8531_v46 }
 0x1eb   : > { %8536 = vst [vmem:[#allocation51_spill] sm:$0xff] %v6475_v22  ;;  %v6480_v30 = vadd.f32 %v6475_v22, %v733_v10  ;;  %v4582_v31 = vpop.f32.mrb[41].mxu0 }
 0x1ec   : > { %v6482_v45 = vpop.f32.mrb[52].mxu1  ;;  %v6484_v47 = vpop.f32.mrb[42].mxu0 }
 0x1ed   : > { %8537 = vst [vmem:[#allocation52_spill] sm:$0xff] %v6482_v45  ;;  %8538 = vst [vmem:[#allocation53_spill] sm:$0xff] %v6484_v47  ;;  %v737_v17 = vadd.f32 %v6482_v45, %v6271_v28  ;;  %v6491_v11 = vadd.f32 %v6484_v47, %v734_v6  ;;  %v4538_v32 = vpop.f32.mrb[53].mxu1  ;;  %v4583_v44 = vpop.f32.mrb[43].mxu0 }
 0x1ee   : > { %v700_v10 = vpop.f32.mrb[54].mxu1 }
 0x1ef   : > { %v4539_v22 = vpop.f32.mrb[55].mxu1 }
 0x1f1   : > { %4849 = vmatmul.mubr.msk.bf16.gmra.mrb[160].mxu1 %vm4269_vm13, %v8535_v23 }
 0x1f2   : > { %v6497_v31 = vpop.f32.mrb[44].mxu0 }
 0x1f3   : > { %8539 = vst [vmem:[#allocation54_spill] sm:$0xff] %v6497_v31  ;;  %v6500_v50 = vadd.f32 %v6497_v31, %v735_v53  ;;  %v4586_v7 = vpop.f32.mrb[45].mxu0 }
 0x1f4   : > { %v6502_v6 = vpop.f32.mrb[46].mxu0  ;;  %v6504_v32 = vpop.f32.mrb[56].mxu1  ;;  %v5136_v7 = vld [vmem:[%s8243_s2 + $0x30] sm:$0xff]  }
 0x1f5   : > { %8540 = vst [vmem:[#allocation55_spill] sm:$0xff] %v6502_v6  ;;  %8541 = vst [vmem:[#allocation56_spill] sm:$0xff] %v6504_v32  ;;  %v6508_v44 = vadd.f32 %v6502_v6, %v736_v61  ;;  %v1187_v23 = vadd.f32 %v6504_v32, %v6320_v35  ;;  %v4587_v22 = vpop.f32.mrb[47].mxu0  ;;  %v4610_v10 = vpop.f32.mrb[57].mxu1  ;;  %4865 = vmatpush3.bf16.msra.mxu0 %v5136_v7 }
 0x1f6   : > { %v6512_v28 = vpop.f32.mrb[58].mxu1  ;;  %4866 = vmatprep.subr.bf16.mxu0 %v8531_v46 }
 0x1f7   : > { %8542 = vst [vmem:[#allocation57_spill] sm:$0xff] %v6512_v28  ;;  %v1188_v53 = vadd.f32 %v6512_v28, %v6334_v62  ;;  %v4611_v2 = vpop.f32.mrb[59].mxu1 }
 0x1fa   : > { %v6519_v45 = vpop.f32.mrb[48].mxu0 }
 0x1fb   : > { %8543 = vst [vmem:[#allocation58_spill] sm:$0xff] %v6519_v45  ;;  %v6522_v61 = vadd.f32 %v6519_v45, %v737_v17  ;;  %v4590_v6 = vpop.f32.mrb[49].mxu0 }
 0x1fc   : > { %v933_v35 = vpop.f32.mrb[50].mxu0  ;;  %v6524_v22 = vpop.f32.mrb[60].mxu1 }
 0x1fd   : > { %8544 = vst [vmem:[#allocation59_spill] sm:$0xff] %v6524_v22  ;;  %v1189_v62 = vadd.f32 %v6524_v22, %v6346_v19  ;;  %v4591_v10 = vpop.f32.mrb[51].mxu0  ;;  %v4614_v2 = vpop.f32.mrb[61].mxu1 }
 0x1fe   : > { %v6529_v31 = vpop.f32.mrb[62].mxu1 }
 0x1ff   : > { %8545 = vst [vmem:[#allocation60_spill] sm:$0xff] %v6529_v31  ;;  %v1190_v47 = vadd.f32 %v6529_v31, %v6357_v27  ;;  %v4615_v0 = vpop.f32.mrb[63].mxu1 }
 0x204   : > { %v6533_v17 = vpop.f32.mrb[64].mxu1  ;;  %v6535_v6 = vpop.f32.mrb[52].mxu0 }
 0x205   : > { %8546 = vst [vmem:[#allocation61_spill] sm:$0xff] %v6533_v17  ;;  %8547 = vst [vmem:[#allocation62_spill] sm:$0xff] %v6535_v6  ;;  %v1191_v7 = vadd.f32 %v6533_v17, %v6373_v24  ;;  %v6540_v35 = vadd.f32 %v6535_v6, %v1187_v23  ;;  %v4618_v45 = vpop.f32.mrb[65].mxu1  ;;  %v4662_v19 = vpop.f32.mrb[53].mxu0  ;;  %v5137_v24 = vld [vmem:[%s8243_s2 + $0x38] sm:$0xff]  }
 0x206   : > { %v6542_v10 = vpop.f32.mrb[66].mxu1  ;;  %v6544_v2 = vpop.f32.mrb[54].mxu0  ;;  %4867 = vmatpush3.bf16.msra.mxu0 %v5137_v24 }
 0x207   : > { %8548 = vst [vmem:[#allocation63_spill] sm:$0xff] %v6542_v10  ;;  %8549 = vst [vmem:[#allocation64_spill] sm:$0xff] %v6544_v2  ;;  %v1192_v27 = vadd.f32 %v6542_v10, %v6383_v4  ;;  %v6549_v0 = vadd.f32 %v6544_v2, %v1188_v53  ;;  %v4619_v36 = vpop.f32.mrb[67].mxu1  ;;  %v4663_v40 = vpop.f32.mrb[55].mxu0 }
 0x20c   : > { %v6554_v23 = vpop.f32.mrb[68].mxu1  ;;  %v6556_v45 = vpop.f32.mrb[56].mxu0 }
 0x20d   : > { %8550 = vst [vmem:[#allocation65_spill] sm:$0xff] %v6554_v23  ;;  %8551 = vst [vmem:[#allocation66_spill] sm:$0xff] %v6556_v45  ;;  %v1193_v19 = vadd.f32 %v6554_v23, %v6400_v49  ;;  %v6561_v25 = vadd.f32 %v6556_v45, %v1189_v62  ;;  %v4622_v4 = vpop.f32.mrb[69].mxu1  ;;  %v4666_v53 = vpop.f32.mrb[57].mxu0 }
 0x20e   : > { %v6563_v43 = vpop.f32.mrb[70].mxu1  ;;  %v6565_v36 = vpop.f32.mrb[58].mxu0 }
 0x20f   : > { %8552 = vst [vmem:[#allocation67_spill] sm:$0xff] %v6563_v43  ;;  %8553 = vst [vmem:[#allocation68_spill] sm:$0xff] %v6565_v36  ;;  %v1194_v40 = vadd.f32 %v6563_v43, %v6410_v39  ;;  %v6570_v24 = vadd.f32 %v6565_v36, %v1190_v47  ;;  %v4623_v13 = vpop.f32.mrb[71].mxu1  ;;  %v4667_v59 = vpop.f32.mrb[59].mxu0 }
 0x214   : > { %v6572_v12 = vpop.f32.mrb[72].mxu1  ;;  %v6574_v49 = vpop.f32.mrb[60].mxu0 }
 0x215   : > { %8554 = vst [vmem:[#allocation69_spill] sm:$0xff] %v6572_v12  ;;  %8555 = vst [vmem:[#allocation70_spill] sm:$0xff] %v6574_v49  ;;  %v1195_v62 = vadd.f32 %v6572_v12, %v6427_v16  ;;  %v6579_v4 = vadd.f32 %v6574_v49, %v1191_v7  ;;  %v4626_v53 = vpop.f32.mrb[73].mxu1  ;;  %v4670_v55 = vpop.f32.mrb[61].mxu0 }
 0x216   : > { %v6581_v14 = vpop.f32.mrb[74].mxu1  ;;  %v6583_v39 = vpop.f32.mrb[62].mxu0 }
 0x217   : > { %8556 = vst [vmem:[#allocation71_spill] sm:$0xff] %v6581_v14  ;;  %8557 = vst [vmem:[#allocation72_spill] sm:$0xff] %v6583_v39  ;;  %v1196_v13 = vadd.f32 %v6581_v14, %v6437_v56  ;;  %v6588_v59 = vadd.f32 %v6583_v39, %v1192_v27  ;;  %v4627_v47 = vpop.f32.mrb[75].mxu1  ;;  %v4671_v43 = vpop.f32.mrb[63].mxu0 }
 0x21c   : > { %v6590_v58 = vpop.f32.mrb[76].mxu1  ;;  %v6592_v16 = vpop.f32.mrb[64].mxu0 }
 0x21d   : > { %8558 = vst [vmem:[#allocation73_spill] sm:$0xff] %v6590_v58  ;;  %8559 = vst [vmem:[#allocation74_spill] sm:$0xff] %v6592_v16  ;;  %v1197_v7 = vadd.f32 %v6590_v58, %v6453_v1  ;;  %v6597_v55 = vadd.f32 %v6592_v16, %v1193_v19  ;;  %v4630_v53 = vpop.f32.mrb[77].mxu1  ;;  %v4674_v12 = vpop.f32.mrb[65].mxu0 }
 0x21e   : > { %v6599_v41 = vpop.f32.mrb[78].mxu1  ;;  %v6601_v56 = vpop.f32.mrb[66].mxu0 }
 0x21f   : > { %8560 = vst [vmem:[#allocation75_spill] sm:$0xff] %v6599_v41  ;;  %8561 = vst [vmem:[#allocation76_spill] sm:$0xff] %v6601_v56  ;;  %v1198_v27 = vadd.f32 %v6599_v41, %v6464_v63  ;;  %v6606_v43 = vadd.f32 %v6601_v56, %v1194_v40  ;;  %v4631_v47 = vpop.f32.mrb[79].mxu1  ;;  %v4675_v14 = vpop.f32.mrb[67].mxu0 }
 0x224   : > { %v6608_v37 = vpop.f32.mrb[80].mxu1  ;;  %v6610_v1 = vpop.f32.mrb[68].mxu0 }
 0x225   : > { %8562 = vst [vmem:[#allocation77_spill] sm:$0xff] %v6608_v37  ;;  %8563 = vst [vmem:[#allocation78_spill] sm:$0xff] %v6610_v1  ;;  %v1199_v19 = vadd.f32 %v6608_v37, %v6480_v30  ;;  %v6615_v12 = vadd.f32 %v6610_v1, %v1195_v62  ;;  %v4634_v53 = vpop.f32.mrb[81].mxu1  ;;  %v4678_v58 = vpop.f32.mrb[69].mxu0 }
 0x226   : > { %v6617_v16 = vpop.f32.mrb[82].mxu1  ;;  %v6619_v63 = vpop.f32.mrb[70].mxu0 }
 0x227   : > { %8564 = vst [vmem:[#allocation79_spill] sm:$0xff] %v6617_v16  ;;  %8565 = vst [vmem:[#allocation80_spill] sm:$0xff] %v6619_v63  ;;  %v1200_v40 = vadd.f32 %v6617_v16, %v6491_v11  ;;  %v6624_v14 = vadd.f32 %v6619_v63, %v1196_v13  ;;  %v4635_v47 = vpop.f32.mrb[83].mxu1  ;;  %v4679_v41 = vpop.f32.mrb[71].mxu0 }
 0x22c   : > { %v6626_v56 = vpop.f32.mrb[84].mxu1  ;;  %v6628_v30 = vpop.f32.mrb[72].mxu0 }
 0x22d   : > { %8566 = vst [vmem:[#allocation81_spill] sm:$0xff] %v6626_v56  ;;  %8567 = vst [vmem:[#allocation82_spill] sm:$0xff] %v6628_v30  ;;  %v1201_v62 = vadd.f32 %v6626_v56, %v6500_v50  ;;  %v6633_v58 = vadd.f32 %v6628_v30, %v1197_v7  ;;  %v4638_v53 = vpop.f32.mrb[85].mxu1  ;;  %v4682_v37 = vpop.f32.mrb[73].mxu0 }
 0x22e   : > { %v6635_v1 = vpop.f32.mrb[86].mxu1  ;;  %v6637_v11 = vpop.f32.mrb[74].mxu0 }
 0x22f   : > { %8568 = vst [vmem:[#allocation83_spill] sm:$0xff] %v6635_v1  ;;  %8569 = vst [vmem:[#allocation84_spill] sm:$0xff] %v6637_v11  ;;  %v1202_v13 = vadd.f32 %v6635_v1, %v6508_v44  ;;  %v6642_v41 = vadd.f32 %v6637_v11, %v1198_v27  ;;  %v4639_v47 = vpop.f32.mrb[87].mxu1  ;;  %v4683_v16 = vpop.f32.mrb[75].mxu0 }
 0x234   : > { %v6644_v63 = vpop.f32.mrb[88].mxu1  ;;  %v6646_v50 = vpop.f32.mrb[76].mxu0 }
 0x235   : > { %8570 = vst [vmem:[#allocation85_spill] sm:$0xff] %v6644_v63  ;;  %8571 = vst [vmem:[#allocation86_spill] sm:$0xff] %v6646_v50  ;;  %v1203_v7 = vadd.f32 %v6644_v63, %v6522_v61  ;;  %v6651_v37 = vadd.f32 %v6646_v50, %v1199_v19  ;;  %v4642_v53 = vpop.f32.mrb[89].mxu1  ;;  %v4686_v56 = vpop.f32.mrb[77].mxu0 }
 0x236   : > { %v1166_v30 = vpop.f32.mrb[90].mxu1  ;;  %v6653_v23 = vpop.f32.mrb[78].mxu0 }
 0x237   : > { %8572 = vst [vmem:[#allocation87_spill] sm:$0xff] %v6653_v23  ;;  %v6656_v44 = vadd.f32 %v6653_v23, %v1200_v40  ;;  %v4643_v27 = vpop.f32.mrb[91].mxu1  ;;  %v4687_v16 = vpop.f32.mrb[79].mxu0 }
 0x23c   : > { %v6658_v47 = vpop.f32.mrb[80].mxu0  ;;  %v6660_v1 = vpop.f32.mrb[92].mxu1 }
 0x23d   : > { %8573 = vst [vmem:[#allocation88_spill] sm:$0xff] %v6658_v47  ;;  %8574 = vst [vmem:[#allocation89_spill] sm:$0xff] %v6660_v1  ;;  %v6663_v11 = vadd.f32 %v6658_v47, %v1201_v62  ;;  %v1653_v61 = vadd.f32 %v6660_v1, %v6540_v35  ;;  %v4690_v19 = vpop.f32.mrb[81].mxu0  ;;  %v4714_v56 = vpop.f32.mrb[93].mxu1 }
 0x23e   : > { %v6667_v30 = vpop.f32.mrb[82].mxu0  ;;  %v6669_v53 = vpop.f32.mrb[94].mxu1 }
 0x23f   : > { %8575 = vst [vmem:[#allocation90_spill] sm:$0xff] %v6667_v30  ;;  %8576 = vst [vmem:[#allocation91_spill] sm:$0xff] %v6669_v53  ;;  %v6672_v40 = vadd.f32 %v6667_v30, %v1202_v13  ;;  %v1654_v27 = vadd.f32 %v6669_v53, %v6549_v0  ;;  %v4691_v16 = vpop.f32.mrb[83].mxu0  ;;  %v4715_v63 = vpop.f32.mrb[95].mxu1 }
 0x244   : > { %v6676_v23 = vpop.f32.mrb[84].mxu0  ;;  %v6678_v62 = vpop.f32.mrb[96].mxu1 }
 0x245   : > { %8577 = vst [vmem:[#allocation92_spill] sm:$0xff] %v6676_v23  ;;  %8578 = vst [vmem:[#allocation93_spill] sm:$0xff] %v6678_v62  ;;  %v6681_v35 = vadd.f32 %v6676_v23, %v1203_v7  ;;  %v1655_v19 = vadd.f32 %v6678_v62, %v6561_v25  ;;  %v4694_v56 = vpop.f32.mrb[85].mxu0  ;;  %v4718_v47 = vpop.f32.mrb[97].mxu1 }
 0x246   : > { %v1399_v50 = vpop.f32.mrb[86].mxu0  ;;  %v6685_v13 = vpop.f32.mrb[98].mxu1 }
 0x247   : > { %8579 = vst [vmem:[#allocation94_spill] sm:$0xff] %v6685_v13  ;;  %v1656_v0 = vadd.f32 %v6685_v13, %v6570_v24  ;;  %v4695_v16 = vpop.f32.mrb[87].mxu0  ;;  %v4719_v63 = vpop.f32.mrb[99].mxu1 }
 0x24c   : > { %v6689_v30 = vpop.f32.mrb[100].mxu1 }
 0x24d   : > { %8580 = vst [vmem:[#allocation95_spill] sm:$0xff] %v6689_v30  ;;  %v1657_v54 = vadd.f32 %v6689_v30, %v6579_v4  ;;  %v4722_v7 = vpop.f32.mrb[101].mxu1 }
 0x24e   : > { %v6693_v23 = vpop.f32.mrb[102].mxu1  ;;  %v6695_v33 = vpop.f32.mrb[88].mxu0 }
 0x24f   : > { %8581 = vst [vmem:[#allocation96_spill] sm:$0xff] %v6693_v23  ;;  %8582 = vst [vmem:[#allocation97_spill] sm:$0xff] %v6695_v33  ;;  %v1658_v25 = vadd.f32 %v6693_v23, %v6588_v59  ;;  %v6700_v50 = vadd.f32 %v6695_v33, %v1653_v61  ;;  %v4723_v47 = vpop.f32.mrb[103].mxu1  ;;  %v4766_v24 = vpop.f32.mrb[89].mxu0 }
 0x250   : > { %v6702_v56 = vpop.f32.mrb[90].mxu0 }
 0x251   : > { %8583 = vst [vmem:[#allocation98_spill] sm:$0xff] %v6702_v56  ;;  %v6705_v16 = vadd.f32 %v6702_v56, %v1654_v27  ;;  %v4767_v63 = vpop.f32.mrb[91].mxu0 }
 0x254   : > { %v6707_v4 = vpop.f32.mrb[104].mxu1 }
 0x255   : > { %8584 = vst [vmem:[#allocation99_spill] sm:$0xff] %v6707_v4  ;;  %v1659_v7 = vadd.f32 %v6707_v4, %v6597_v55  ;;  %v4726_v39 = vpop.f32.mrb[105].mxu1 }
 0x256   : > { %v6711_v5 = vpop.f32.mrb[106].mxu1  ;;  %v6713_v59 = vpop.f32.mrb[92].mxu0 }
 0x257   : > { %8585 = vst [vmem:[#allocation100_spill] sm:$0xff] %v6711_v5  ;;  %8586 = vst [vmem:[#allocation101_spill] sm:$0xff] %v6713_v59  ;;  %v1660_v61 = vadd.f32 %v6711_v5, %v6606_v43  ;;  %v6718_v47 = vadd.f32 %v6713_v59, %v1655_v19  ;;  %v4727_v24 = vpop.f32.mrb[107].mxu1  ;;  %v4770_v27 = vpop.f32.mrb[93].mxu0 }
 0x258   : > { %v6720_v23 = vpop.f32.mrb[94].mxu0 }
 0x259   : > { %8587 = vst [vmem:[#allocation102_spill] sm:$0xff] %v6720_v23  ;;  %v6723_v63 = vadd.f32 %v6720_v23, %v1656_v0  ;;  %v4771_v10 = vpop.f32.mrb[95].mxu0 }
 0x25c   : > { %v6725_v55 = vpop.f32.mrb[108].mxu1 }
 0x25d   : > { %8588 = vst [vmem:[#allocation103_spill] sm:$0xff] %v6725_v55  ;;  %v1661_v39 = vadd.f32 %v6725_v55, %v6615_v12  ;;  %v4730_v4 = vpop.f32.mrb[109].mxu1 }
 0x25e   : > { %v6729_v20 = vpop.f32.mrb[110].mxu1  ;;  %v6731_v43 = vpop.f32.mrb[96].mxu0 }
 0x25f   : > { %8589 = vst [vmem:[#allocation104_spill] sm:$0xff] %v6729_v20  ;;  %8590 = vst [vmem:[#allocation105_spill] sm:$0xff] %v6731_v43  ;;  %v1662_v19 = vadd.f32 %v6729_v20, %v6624_v14  ;;  %v6736_v24 = vadd.f32 %v6731_v43, %v1657_v54  ;;  %v4731_v27 = vpop.f32.mrb[111].mxu1  ;;  %v4774_v0 = vpop.f32.mrb[97].mxu0 }
 0x260   : > { %v6738_v5 = vpop.f32.mrb[98].mxu0 }
 0x261   : > { %8591 = vst [vmem:[#allocation106_spill] sm:$0xff] %v6738_v5  ;;  %v6741_v10 = vadd.f32 %v6738_v5, %v1658_v25  ;;  %v4775_v3 = vpop.f32.mrb[99].mxu0 }
 0x264   : > { %v6743_v12 = vpop.f32.mrb[112].mxu1 }
 0x265   : > { %8592 = vst [vmem:[#allocation107_spill] sm:$0xff] %v6743_v12  ;;  %v1663_v4 = vadd.f32 %v6743_v12, %v6633_v58  ;;  %v4734_v55 = vpop.f32.mrb[113].mxu1 }
 0x266   : > { %v6747_v49 = vpop.f32.mrb[114].mxu1  ;;  %v6749_v14 = vpop.f32.mrb[100].mxu0 }
 0x267   : > { %8593 = vst [vmem:[#allocation108_spill] sm:$0xff] %v6747_v49  ;;  %8594 = vst [vmem:[#allocation109_spill] sm:$0xff] %v6749_v14  ;;  %v1664_v54 = vadd.f32 %v6747_v49, %v6642_v41  ;;  %v6754_v27 = vadd.f32 %v6749_v14, %v1659_v7  ;;  %v4735_v0 = vpop.f32.mrb[115].mxu1  ;;  %v4778_v25 = vpop.f32.mrb[101].mxu0 }
 0x268   : > { %v6756_v20 = vpop.f32.mrb[102].mxu0 }
 0x269   : > { %8595 = vst [vmem:[#allocation110_spill] sm:$0xff] %v6756_v20  ;;  %v6759_v3 = vadd.f32 %v6756_v20, %v1660_v61  ;;  %v4779_v5 = vpop.f32.mrb[103].mxu0 }
 0x26c   : > { %v6761_v58 = vpop.f32.mrb[116].mxu1 }
 0x26d   : > { %8596 = vst [vmem:[#allocation111_spill] sm:$0xff] %v6761_v58  ;;  %v1665_v55 = vadd.f32 %v6761_v58, %v6651_v37  ;;  %v4738_v12 = vpop.f32.mrb[117].mxu1 }
 0x26e   : > { %v6765_v43 = vpop.f32.mrb[118].mxu1  ;;  %v6767_v41 = vpop.f32.mrb[104].mxu0 }
 0x26f   : > { %8597 = vst [vmem:[#allocation112_spill] sm:$0xff] %v6765_v43  ;;  %8598 = vst [vmem:[#allocation113_spill] sm:$0xff] %v6767_v41  ;;  %v1666_v7 = vadd.f32 %v6765_v43, %v6656_v44  ;;  %v6772_v0 = vadd.f32 %v6767_v41, %v1661_v39  ;;  %v4739_v25 = vpop.f32.mrb[119].mxu1  ;;  %v4782_v61 = vpop.f32.mrb[105].mxu0 }
 0x270   : > { %v6774_v49 = vpop.f32.mrb[106].mxu0 }
 0x271   : > { %8599 = vst [vmem:[#allocation114_spill] sm:$0xff] %v6774_v49  ;;  %v6777_v5 = vadd.f32 %v6774_v49, %v1662_v19  ;;  %v4783_v20 = vpop.f32.mrb[107].mxu0 }
 0x274   : > { %v6779_v37 = vpop.f32.mrb[120].mxu1 }
 0x275   : > { %8600 = vst [vmem:[#allocation115_spill] sm:$0xff] %v6779_v37  ;;  %v1667_v12 = vadd.f32 %v6779_v37, %v6663_v11  ;;  %v4742_v58 = vpop.f32.mrb[121].mxu1 }
 0x276   : > { %v6783_v14 = vpop.f32.mrb[122].mxu1  ;;  %v6785_v44 = vpop.f32.mrb[108].mxu0 }
 0x277   : > { %8601 = vst [vmem:[#allocation116_spill] sm:$0xff] %v6783_v14  ;;  %8602 = vst [vmem:[#allocation117_spill] sm:$0xff] %v6785_v44  ;;  %v1668_v39 = vadd.f32 %v6783_v14, %v6672_v40  ;;  %v6790_v25 = vadd.f32 %v6785_v44, %v1663_v4  ;;  %v4743_v61 = vpop.f32.mrb[123].mxu1  ;;  %v4786_v19 = vpop.f32.mrb[109].mxu0 }
 0x278   : > { %v6792_v43 = vpop.f32.mrb[110].mxu0 }
 0x279   : > { %8603 = vst [vmem:[#allocation118_spill] sm:$0xff] %v6792_v43  ;;  %v6795_v20 = vadd.f32 %v6792_v43, %v1664_v54  ;;  %v4787_v49 = vpop.f32.mrb[111].mxu0 }
 0x27c   : > { %v6797_v11 = vpop.f32.mrb[124].mxu1 }
 0x27d   : > { %8604 = vst [vmem:[#allocation119_spill] sm:$0xff] %v6797_v11  ;;  %v1669_v58 = vadd.f32 %v6797_v11, %v6681_v35  ;;  %v4746_v37 = vpop.f32.mrb[125].mxu1 }
 0x27e   : > { %v1632_v41 = vpop.f32.mrb[126].mxu1  ;;  %v6801_v30 = vpop.f32.mrb[112].mxu0 }
 0x27f   : > { %8605 = vst [vmem:[#allocation120_spill] sm:$0xff] %v6801_v30  ;;  %v6804_v40 = vadd.f32 %v6801_v30, %v1665_v55  ;;  %v4747_v4 = vpop.f32.mrb[127].mxu1  ;;  %v4790_v61 = vpop.f32.mrb[113].mxu0 }
 0x280   : > { %v6806_v19 = vpop.f32.mrb[114].mxu0 }
 0x281   : > { %8606 = vst [vmem:[#allocation121_spill] sm:$0xff] %v6806_v19  ;;  %v6809_v54 = vadd.f32 %v6806_v19, %v1666_v7  ;;  %v4791_v49 = vpop.f32.mrb[115].mxu0 }
 0x284   : > { %v6811_v14 = vpop.f32.mrb[128].mxu1 }
 0x285   : > { %8607 = vst [vmem:[#allocation122_spill] sm:$0xff] %v6811_v14  ;;  %v2119_v35 = vadd.f32 %v6811_v14, %v6700_v50  ;;  %v4818_v37 = vpop.f32.mrb[129].mxu1 }
 0x286   : > { %v6815_v41 = vpop.f32.mrb[116].mxu0  ;;  %v6817_v11 = vpop.f32.mrb[130].mxu1 }
 0x287   : > { %8608 = vst [vmem:[#allocation123_spill] sm:$0xff] %v6815_v41  ;;  %8609 = vst [vmem:[#allocation124_spill] sm:$0xff] %v6817_v11  ;;  %v6820_v55 = vadd.f32 %v6815_v41, %v1667_v12  ;;  %v2120_v4 = vadd.f32 %v6817_v11, %v6705_v16  ;;  %v4794_v61 = vpop.f32.mrb[117].mxu0  ;;  %v4819_v7 = vpop.f32.mrb[131].mxu1  ;;  %v2136_v49 = vmul.f32 0.125, %v2119_v35 }
 0x288   : > { %v6824_v19 = vpop.f32.mrb[118].mxu0 }
 0x289   : > { %8610 = vst [vmem:[#allocation125_spill] sm:$0xff] %v6824_v19  ;;  %v2137_v30 = vmul.f32 0.125, %v2120_v4  ;;  %v6827_v43 = vadd.f32 %v6824_v19, %v1668_v39  ;;  %v4795_v50 = vpop.f32.mrb[119].mxu0 }
 0x28b   : > { %v2153_v37 = vpack.c.bf16 %v2137_v30, %v2136_v49 }
 0x28c   : > { %v6829_v44 = vpop.f32.mrb[132].mxu1 }
 0x28d   : > { %8611 = vst [vmem:[#allocation126_spill] sm:$0xff] %v6829_v44  ;;  %v2121_v12 = vadd.f32 %v6829_v44, %v6718_v47  ;;  %v4822_v41 = vpop.f32.mrb[133].mxu1  ;;  %4869 = vmatmul.mubr.bf16.vlgmr.msra.gmra.mrb[124].mxu0 %v2153_v37 }
 0x28e   : > { %v6833_v26 = vpop.f32.mrb[120].mxu0  ;;  %v6835_v16 = vpop.f32.mrb[134].mxu1  ;;  %4872 = vmatprep.mubr.msk.bf16.mxu0 %vm5280_vm0, %v8531_v46 }
 0x28f   : > { %8612 = vst [vmem:[#allocation127_spill] sm:$0xff] %v6835_v16  ;;  %v6840_v35 = vadd.f32 %v6833_v26, %v1669_v58  ;;  %v2122_v30 = vadd.f32 %v6835_v16, %v6723_v63  ;;  %v4798_v39 = vpop.f32.mrb[121].mxu0  ;;  %v4823_v4 = vpop.f32.mrb[135].mxu1  ;;  %v2138_v7 = vmul.f32 0.125, %v2121_v12 }
 0x290   : > { %v1865_v61 = vpop.f32.mrb[122].mxu0 }
 0x291   : > { %v2139_v47 = vmul.f32 0.125, %v2122_v30  ;;  %v4799_v41 = vpop.f32.mrb[123].mxu0 }
 0x293   : > { %v2154_v49 = vpack.c.bf16 %v2139_v47, %v2138_v7 }
 0x294   : > { %v6844_v50 = vpop.f32.mrb[136].mxu1 }
 0x295   : > { %8613 = vst [vmem:[#allocation128_spill] sm:$0xff] %v6844_v50  ;;  %v2123_v37 = vadd.f32 %v6844_v50, %v6736_v24  ;;  %v4826_v19 = vpop.f32.mrb[137].mxu1  ;;  %4873 = vmatmul.mubr.bf16.gmra.mrb[128].mxu0 %v2154_v49 }
 0x296   : > { %v6848_v17 = vpop.f32.mrb[138].mxu1  ;;  %4876 = vmatprep.mubr.msk.bf16.mxu0 %vm5280_vm0, %v8531_v46 }
 0x297   : > { %8614 = vst [vmem:[#allocation129_spill] sm:$0xff] %v6848_v17  ;;  %v2124_v63 = vadd.f32 %v6848_v17, %v6741_v10  ;;  %v4827_v58 = vpop.f32.mrb[139].mxu1  ;;  %v2140_v12 = vmul.f32 0.125, %v2123_v37 }
 0x299   : > { %v2141_v30 = vmul.f32 0.125, %v2124_v63 }
 0x29b   : > { %v2155_v39 = vpack.c.bf16 %v2141_v30, %v2140_v12 }
 0x29c   : > { %v6854_v4 = vpop.f32.mrb[140].mxu1 }
 0x29d   : > { %8615 = vst [vmem:[#allocation130_spill] sm:$0xff] %v6854_v4  ;;  %v2125_v61 = vadd.f32 %v6854_v4, %v6754_v27  ;;  %v4830_v24 = vpop.f32.mrb[141].mxu1  ;;  %4877 = vmatmul.mubr.bf16.gmra.mrb[132].mxu0 %v2155_v39 }
 0x29e   : > { %v6858_v19 = vpop.f32.mrb[142].mxu1  ;;  %4880 = vmatprep.mubr.msk.bf16.mxu0 %vm5280_vm0, %v8531_v46 }
 0x29f   : > { %8616 = vst [vmem:[#allocation131_spill] sm:$0xff] %v6858_v19  ;;  %v2126_v7 = vadd.f32 %v6858_v19, %v6759_v3  ;;  %v4831_v10 = vpop.f32.mrb[143].mxu1  ;;  %v2142_v47 = vmul.f32 0.125, %v2125_v61 }
 0x2a1   : > { %v2143_v41 = vmul.f32 0.125, %v2126_v7 }
 0x2a3   : > { %v2156_v49 = vpack.c.bf16 %v2143_v41, %v2142_v47 }
 0x2a4   : > { %v6864_v37 = vpop.f32.mrb[144].mxu1 }
 0x2a5   : > { %8617 = vst [vmem:[#allocation132_spill] sm:$0xff] %v6864_v37  ;;  %v2127_v63 = vadd.f32 %v6864_v37, %v6772_v0  ;;  %v4834_v27 = vpop.f32.mrb[145].mxu1  ;;  %4881 = vmatmul.mubr.bf16.gmra.mrb[136].mxu0 %v2156_v49 }
 0x2a6   : > { %v6868_v58 = vpop.f32.mrb[146].mxu1  ;;  %4884 = vmatprep.mubr.msk.bf16.mxu0 %vm5280_vm0, %v8531_v46 }
 0x2a7   : > { %8618 = vst [vmem:[#allocation133_spill] sm:$0xff] %v6868_v58  ;;  %v2128_v12 = vadd.f32 %v6868_v58, %v6777_v5  ;;  %v4835_v3 = vpop.f32.mrb[147].mxu1  ;;  %v2144_v30 = vmul.f32 0.125, %v2127_v63 }
 0x2a9   : > { %v2145_v39 = vmul.f32 0.125, %v2128_v12 }
 0x2ab   : > { %v2157_v61 = vpack.c.bf16 %v2145_v39, %v2144_v30 }
 0x2ac   : > { %v6874_v24 = vpop.f32.mrb[148].mxu1 }
 0x2ad   : > { %8619 = vst [vmem:[#allocation134_spill] sm:$0xff] %v6874_v24  ;;  %v2129_v7 = vadd.f32 %v6874_v24, %v6790_v25  ;;  %v4838_v0 = vpop.f32.mrb[149].mxu1  ;;  %4885 = vmatmul.mubr.bf16.gmra.mrb[140].mxu0 %v2157_v61 }
 0x2ae   : > { %v6878_v10 = vpop.f32.mrb[150].mxu1  ;;  %4888 = vmatprep.mubr.msk.bf16.mxu0 %vm5280_vm0, %v8531_v46 }
 0x2af   : > { %8620 = vst [vmem:[#allocation135_spill] sm:$0xff] %v6878_v10  ;;  %v2130_v47 = vadd.f32 %v6878_v10, %v6795_v20  ;;  %v4839_v5 = vpop.f32.mrb[151].mxu1  ;;  %v2146_v41 = vmul.f32 0.125, %v2129_v7 }
 0x2b1   : > { %v2147_v49 = vmul.f32 0.125, %v2130_v47 }
 0x2b3   : > { %v2158_v63 = vpack.c.bf16 %v2147_v49, %v2146_v41 }
 0x2b4   : > { %v6884_v27 = vpop.f32.mrb[152].mxu1 }
 0x2b5   : > { %8621 = vst [vmem:[#allocation136_spill] sm:$0xff] %v6884_v27  ;;  %v2131_v12 = vadd.f32 %v6884_v27, %v6804_v40  ;;  %v4842_v25 = vpop.f32.mrb[153].mxu1  ;;  %4889 = vmatmul.mubr.bf16.gmra.mrb[144].mxu0 %v2158_v63 }
 0x2b6   : > { %v6888_v3 = vpop.f32.mrb[154].mxu1  ;;  %4892 = vmatprep.mubr.msk.bf16.mxu0 %vm5280_vm0, %v8531_v46 }
 0x2b7   : > { %8622 = vst [vmem:[#allocation137_spill] sm:$0xff] %v6888_v3  ;;  %v2132_v30 = vadd.f32 %v6888_v3, %v6809_v54  ;;  %v4843_v20 = vpop.f32.mrb[155].mxu1  ;;  %v2148_v39 = vmul.f32 0.125, %v2131_v12 }
 0x2b9   : > { %v2149_v61 = vmul.f32 0.125, %v2132_v30 }
 0x2bb   : > { %v2159_v7 = vpack.c.bf16 %v2149_v61, %v2148_v39 }
 0x2bc   : > { %v6894_v0 = vpop.f32.mrb[156].mxu1 }
 0x2bd   : > { %8623 = vst [vmem:[#allocation138_spill] sm:$0xff] %v6894_v0  ;;  %v2133_v47 = vadd.f32 %v6894_v0, %v6820_v55  ;;  %v4846_v40 = vpop.f32.mrb[157].mxu1  ;;  %4893 = vmatmul.mubr.bf16.gmra.mrb[148].mxu0 %v2159_v7 }
 0x2be   : > { %v6898_v5 = vpop.f32.mrb[158].mxu1  ;;  %4896 = vmatprep.mubr.msk.bf16.mxu0 %vm5280_vm0, %v8531_v46 }
 0x2bf   : > { %8624 = vst [vmem:[#allocation139_spill] sm:$0xff] %v6898_v5  ;;  %v2134_v41 = vadd.f32 %v6898_v5, %v6827_v43  ;;  %v4847_v54 = vpop.f32.mrb[159].mxu1  ;;  %v2150_v49 = vmul.f32 0.125, %v2133_v47 }
 0x2c1   : > { %v2151_v63 = vmul.f32 0.125, %v2134_v41 }
 0x2c3   : > { %v2160_v12 = vpack.c.bf16 %v2151_v63, %v2150_v49 }
 0x2c4   : > { %v6904_v25 = vpop.f32.mrb[160].mxu1 }
 0x2c5   : > { %v2135_v30 = vadd.f32 %v6904_v25, %v6840_v35  ;;  %v4850_v55 = vpop.f32.mrb[161].mxu1  ;;  %4897 = vmatmul.mubr.bf16.gmra.mrb[152].mxu0 %v2160_v12 }
 0x2c6   : > { %v2098_v20 = vpop.f32.mrb[162].mxu1  ;;  %4900 = vmatprep.mubr.msk.bf16.mxu0 %vm5280_vm0, %v8531_v46  ;;  %vm2874_vm0 = vcmask 7168  }
 0x2c7   : > { %v2152_v39 = vmul.f32 0.125, %v2135_v30  ;;  %v4851_v61 = vpop.f32.mrb[163].mxu1 }
 0x2c9   : > { %v2161_v7 = vpack.c.bf16 %v2152_v39, %v2152_v39 }
 0x2cd   : > { %4901 = vmatmul.mubr.bf16.gmra.mrb[156].mxu0 %v2161_v7 }
 0x360   : > { %v2260_v43 = vpop.f32.mrb[124].mxu0 }
 0x361   : > { %v4870_v40 = vpop.f32.mrb[125].mxu0  ;;  %v2483_v47 = vmul.f32 %v2260_v43, %v6315_v52  ;;  %v2347_v41 = vmul.f32 %v2260_v43, %v6169_v34  ;;  %v2619_v54 = vmul.f32 %v2260_v43, %v6535_v6  ;;  %v2415_v35 = vmul.f32 %v2260_v43, %v6285_v29  ;;  %v8642_v34 = vld [vmem:[#allocation99_spill] sm:$0xff] }
 0x362   : > { %v2263_v49 = vpop.f32.mrb[126].mxu0  ;;  %v2755_v63 = vmul.f32 %v2260_v43, %v6695_v33  ;;  %v2551_v12 = vmul.f32 %v2260_v43, %v6504_v32  ;;  %v2687_v46 = vmul.f32 %v2260_v43, %v6660_v1  ;;  %v2823_v30 = vmul.f32 %v2260_v43, %v6811_v14 }
 0x363   : > { %2500 = vadd.xlane.f32.xlu0 %v2483_v47  ;;  %2364 = vadd.xlane.f32.xlu1 %v2347_v41  ;;  %v4871_v55 = vpop.f32.mrb[127].mxu0  ;;  %v2348_v20 = vmul.f32 %v2263_v49, %v6174_v38  ;;  %v2416_v39 = vmul.f32 %v2263_v49, %v6291_v42  ;;  %v2484_v61 = vmul.f32 %v2263_v49, %v6325_v60 }
 0x364   : > { %v2552_v7 = vmul.f32 %v2263_v49, %v6512_v28  ;;  %v6923_v40 = vmul.f32 %v2263_v49, %v6544_v2  ;;  %v6926_v33 = vmul.f32 %v2263_v49, %v6669_v53  ;;  %v6929_v1 = vmul.f32 %v2263_v49, %v6702_v56 }
 0x365   : > { %v6932_v43 = vmul.f32 %v2263_v49, %v6817_v11 }
 0x367   : > { %2636 = vadd.xlane.f32.xlu0 %v2619_v54  ;;  %2432 = vadd.xlane.f32.xlu1 %v2415_v35 }
 0x368   : > { %v2268_v47 = vpop.f32.mrb[128].mxu0 }
 0x369   : > { %v4874_v41 = vpop.f32.mrb[129].mxu0  ;;  %v6935_v55 = vmul.f32 %v2268_v47, %v6301_v48  ;;  %v6938_v14 = vmul.f32 %v2268_v47, %v6188_v9  ;;  %v6941_v2 = vmul.f32 %v2268_v47, %v6524_v22  ;;  %v6944_v53 = vmul.f32 %v2268_v47, %v6341_v15  ;;  %v8627_v9 = vld [vmem:[#allocation95_spill] sm:$0xff] }
 0x36a   : > { %v2271_v56 = vpop.f32.mrb[130].mxu0  ;;  %v6947_v49 = vmul.f32 %v2268_v47, %v6678_v62  ;;  %v6950_v54 = vmul.f32 %v2268_v47, %v6556_v45  ;;  %v6953_v35 = vmul.f32 %v2268_v47, %v6829_v44  ;;  %v6956_v41 = vmul.f32 %v2268_v47, %v6713_v59 }
 0x36b   : > { %2772 = vadd.xlane.f32.xlu0 %v2755_v63  ;;  %2568 = vadd.xlane.f32.xlu1 %v2551_v12  ;;  %v4875_v22 = vpop.f32.mrb[131].mxu0  ;;  %v6959_v48 = vmul.f32 %v2271_v56, %v6309_v51  ;;  %v6962_v15 = vmul.f32 %v2271_v56, %v6193_v8  ;;  %v6965_v62 = vmul.f32 %v2271_v56, %v6529_v31 }
 0x36c   : > { %v6968_v45 = vmul.f32 %v2271_v56, %v6350_v18  ;;  %v6971_v44 = vmul.f32 %v2271_v56, %v6685_v13  ;;  %v6974_v47 = vmul.f32 %v2271_v56, %v6565_v36  ;;  %v6977_v22 = vmul.f32 %v2271_v56, %v6835_v16  ;;  %v8625_v13 = vld [vmem:[#allocation61_spill] sm:$0xff]  ;;  %v8626_v36 = vld [vmem:[#allocation35_spill] sm:$0xff] }
 0x36d   : > { %v6980_v63 = vmul.f32 %v2271_v56, %v6720_v23  ;;  %v8629_v23 = vld [vmem:[#allocation105_spill] sm:$0xff] }
 0x36f   : > { %2704 = vadd.xlane.f32.xlu1 %v2687_v46  ;;  %2366 = vadd.xlane.f32.xlu0 %v2348_v20  ;;  %v8628_v46 = vld [vmem:[#allocation70_spill] sm:$0xff] }
 0x370   : > { %v2276_v12 = vpop.f32.mrb[132].mxu0 }
 0x371   : > { %v4878_v31 = vpop.f32.mrb[133].mxu0  ;;  %v6983_v8 = vmul.f32 %v2276_v12, %v6323_v57  ;;  %v6986_v18 = vmul.f32 %v2276_v12, %v6211_v21  ;;  %v6989_v51 = vmul.f32 %v2276_v12, %v8625_v13  ;;  %v6992_v59 = vmul.f32 %v2276_v12, %v8626_v36  ;;  %v8630_v21 = vld [vmem:[#allocation30_spill] sm:$0xff]  ;;  %v8631_v36 = vld [vmem:[#allocation13_spill] sm:$0xff] }
 0x372   : > { %v2279_v16 = vpop.f32.mrb[134].mxu0  ;;  %v6995_v56 = vmul.f32 %v2276_v12, %v8627_v9  ;;  %v6998_v20 = vmul.f32 %v2276_v12, %v8628_v46  ;;  %v7001_v31 = vmul.f32 %v2276_v12, %v6844_v50  ;;  %v7004_v57 = vmul.f32 %v2276_v12, %v8629_v23  ;;  %v8632_v9 = vld [vmem:[#allocation63_spill] sm:$0xff]  ;;  %v8633_v46 = vld [vmem:[#allocation37_spill] sm:$0xff]  ;;  %v8634_v50 = vld [vmem:[#allocation96_spill] sm:$0xff] }
 0x373   : > { %2840 = vadd.xlane.f32.xlu1 %v2823_v30  ;;  %2434 = vadd.xlane.f32.xlu0 %v2416_v39  ;;  %v4879_v13 = vpop.f32.mrb[135].mxu0  ;;  %v7007_v11 = vmul.f32 %v2279_v16, %v8630_v21  ;;  %v7010_v6 = vmul.f32 %v2279_v16, %v8631_v36  ;;  %v7013_v28 = vmul.f32 %v2279_v16, %v8632_v9  ;;  %v8635_v12 = vld [vmem:[#allocation72_spill] sm:$0xff]  ;;  %v8636_v30 = vld [vmem:[#allocation106_spill] sm:$0xff] }
 0x374   : > { %v7016_v32 = vmul.f32 %v2279_v16, %v8633_v46  ;;  %v7019_v60 = vmul.f32 %v2279_v16, %v8634_v50  ;;  %v7022_v23 = vmul.f32 %v2279_v16, %v8635_v12  ;;  %v7025_v13 = vmul.f32 %v2279_v16, %v6848_v17  ;;  %v8637_v21 = vld [vmem:[#allocation32_spill] sm:$0xff]  ;;  %v8639_v50 = vld [vmem:[#allocation65_spill] sm:$0xff]  ;;  %v8640_v12 = vld [vmem:[#allocation39_spill] sm:$0xff] }
 0x375   : > { %v7028_v39 = vmul.f32 %v2279_v16, %v8636_v30  ;;  %v8638_v46 = vld [vmem:[#allocation16_spill] sm:$0xff]  ;;  %v8647_v30 = vld [vmem:[#allocation109_spill] sm:$0xff] }
 0x377   : > { %2502 = vadd.xlane.f32.xlu1 %v2484_v61  ;;  %2570 = vadd.xlane.f32.xlu0 %v2552_v7  ;;  %v8644_v61 = vld [vmem:[#allocation74_spill] sm:$0xff] }
 0x378   : > { %v2284_v36 = vpop.f32.mrb[136].mxu0 }
 0x379   : > { %v4882_v9 = vpop.f32.mrb[137].mxu0  ;;  %v7031_v52 = vmul.f32 %v2284_v36, %v8637_v21  ;;  %v7034_v42 = vmul.f32 %v2284_v36, %v8638_v46  ;;  %v7037_v38 = vmul.f32 %v2284_v36, %v8639_v50  ;;  %v7040_v29 = vmul.f32 %v2284_v36, %v8640_v12  ;;  %v8648_v12 = vld [vmem:[#allocation34_spill] sm:$0xff] }
 0x37a   : > { %v2287_v17 = vpop.f32.mrb[138].mxu0  ;;  %v7043_v16 = vmul.f32 %v2284_v36, %v8642_v34  ;;  %v7046_v7 = vmul.f32 %v2284_v36, %v8644_v61  ;;  %v7049_v9 = vmul.f32 %v2284_v36, %v6854_v4  ;;  %v7052_v21 = vmul.f32 %v2284_v36, %v8647_v30  ;;  %v8655_v30 = vld [vmem:[#allocation76_spill] sm:$0xff] }
 0x37b   : > { %8641 = vst [vmem:[#allocation140_spill] sm:$0xff] %v7040_v29  ;;  %2638 = vadd.xlane.f32.xlu1 %v6923_v40  ;;  %2706 = vadd.xlane.f32.xlu0 %v6926_v33  ;;  %v4883_v50 = vpop.f32.mrb[139].mxu0  ;;  %v7057_v46 = vmul.f32 %v2287_v17, %v8648_v12  ;;  %v8649_v29 = vld [vmem:[#allocation17_spill] sm:$0xff]  ;;  %v7072_v40 = vmul.f32 %v2287_v17, %v8655_v30 }
 0x37c   : > { %8643 = vst [vmem:[#allocation141_spill] sm:$0xff] %v7043_v16  ;;  %8645 = vst [vmem:[#allocation142_spill] sm:$0xff] %v7046_v7  ;;  %v7060_v34 = vmul.f32 %v2287_v17, %v8649_v29  ;;  %v8650_v16 = vld [vmem:[#allocation67_spill] sm:$0xff]  ;;  %v8651_v7 = vld [vmem:[#allocation41_spill] sm:$0xff]  ;;  %v7075_v33 = vmul.f32 %v2287_v17, %v6858_v19 }
 0x37d   : > { %8646 = vst [vmem:[#allocation143_spill] sm:$0xff] %v7049_v9  ;;  %v7063_v61 = vmul.f32 %v2287_v17, %v8650_v16  ;;  %v7066_v4 = vmul.f32 %v2287_v17, %v8651_v7  ;;  %v8653_v9 = vld [vmem:[#allocation100_spill] sm:$0xff]  ;;  %8656 = vst [vmem:[#allocation146_spill] sm:$0xff] %v7072_v40  ;;  %v8658_v50 = vld [vmem:[#allocation110_spill] sm:$0xff] }
 0x37e   : > { %v7069_v36 = vmul.f32 %v2287_v17, %v8653_v9  ;;  %8657 = vst [vmem:[#allocation147_spill] sm:$0xff] %v7075_v33  ;;  %v7078_v12 = vmul.f32 %v2287_v17, %v8658_v50  ;;  %v8660_v7 = vld [vmem:[#allocation36_spill] sm:$0xff]  ;;  %v8662_v9 = vld [vmem:[#allocation10_spill] sm:$0xff]  ;;  %v8663_v30 = vld [vmem:[#allocation69_spill] sm:$0xff] }
 0x37f   : > { %8652 = vst [vmem:[#allocation144_spill] sm:$0xff] %v7066_v4  ;;  %2774 = vadd.xlane.f32.xlu1 %v6929_v1  ;;  %2842 = vadd.xlane.f32.xlu0 %v6932_v43  ;;  %v8664_v19 = vld [vmem:[#allocation43_spill] sm:$0xff]  ;;  %v8668_v1 = vld [vmem:[#allocation78_spill] sm:$0xff] }
 0x380   : > { %8654 = vst [vmem:[#allocation145_spill] sm:$0xff] %v7069_v36  ;;  %8659 = vst [vmem:[#allocation148_spill] sm:$0xff] %v7078_v12  ;;  %v2292_v16 = vpop.f32.mrb[140].mxu0  ;;  %v8666_v50 = vld [vmem:[#allocation103_spill] sm:$0xff] }
 0x381   : > { %v4886_v29 = vpop.f32.mrb[141].mxu0  ;;  %v7083_v4 = vmul.f32 %v2292_v16, %v8660_v7  ;;  %v7086_v36 = vmul.f32 %v2292_v16, %v8662_v9  ;;  %v7089_v40 = vmul.f32 %v2292_v16, %v8663_v30  ;;  %v7092_v33 = vmul.f32 %v2292_v16, %v8664_v19  ;;  %v8671_v7 = vld [vmem:[#allocation113_spill] sm:$0xff]  ;;  %v8672_v19 = vld [vmem:[#allocation38_spill] sm:$0xff] }
 0x382   : > { %v2295_v17 = vpop.f32.mrb[142].mxu0  ;;  %v7095_v12 = vmul.f32 %v2292_v16, %v8666_v50  ;;  %v7098_v43 = vmul.f32 %v2292_v16, %v8668_v1  ;;  %v7101_v29 = vmul.f32 %v2292_v16, %v6864_v37 }
 0x383   : > { %8661 = vst [vmem:[#allocation149_spill] sm:$0xff] %v7083_v4  ;;  %8665 = vst [vmem:[#allocation150_spill] sm:$0xff] %v7092_v33  ;;  %v7104_v4 = vmul.f32 %v2292_v16, %v8671_v7  ;;  %2436 = vadd.xlane.f32.xlu1 %v6935_v55  ;;  %2368 = vadd.xlane.f32.xlu0 %v6938_v14  ;;  %v4887_v30 = vpop.f32.mrb[143].mxu0  ;;  %v7109_v9 = vmul.f32 %v2295_v17, %v8672_v19  ;;  %v8673_v33 = vld [vmem:[#allocation11_spill] sm:$0xff]  ;;  %v8679_v7 = vld [vmem:[#allocation80_spill] sm:$0xff] }
 0x384   : > { %8667 = vst [vmem:[#allocation151_spill] sm:$0xff] %v7095_v12  ;;  %8669 = vst [vmem:[#allocation152_spill] sm:$0xff] %v7098_v43  ;;  %v7112_v50 = vmul.f32 %v2295_v17, %v8673_v33  ;;  %v8674_v12 = vld [vmem:[#allocation71_spill] sm:$0xff]  ;;  %v8675_v43 = vld [vmem:[#allocation45_spill] sm:$0xff]  ;;  %v7124_v55 = vmul.f32 %v2295_v17, %v8679_v7  ;;  %v7127_v14 = vmul.f32 %v2295_v17, %v6868_v58 }
 0x385   : > { %8670 = vst [vmem:[#allocation153_spill] sm:$0xff] %v7101_v29  ;;  %v7115_v1 = vmul.f32 %v2295_v17, %v8674_v12  ;;  %v7118_v37 = vmul.f32 %v2295_v17, %v8675_v43  ;;  %v8677_v29 = vld [vmem:[#allocation104_spill] sm:$0xff]  ;;  %v8682_v30 = vld [vmem:[#allocation114_spill] sm:$0xff]  ;;  %v8687_v7 = vld [vmem:[#allocation73_spill] sm:$0xff] }
 0x386   : > { %v7121_v16 = vmul.f32 %v2295_v17, %v8677_v29  ;;  %8680 = vst [vmem:[#allocation156_spill] sm:$0xff] %v7124_v55  ;;  %8681 = vst [vmem:[#allocation157_spill] sm:$0xff] %v7127_v14  ;;  %v7130_v19 = vmul.f32 %v2295_v17, %v8682_v30  ;;  %v8684_v43 = vld [vmem:[#allocation40_spill] sm:$0xff]  ;;  %v8686_v29 = vld [vmem:[#allocation14_spill] sm:$0xff] }
 0x387   : > { %8676 = vst [vmem:[#allocation154_spill] sm:$0xff] %v7118_v37  ;;  %2572 = vadd.xlane.f32.xlu1 %v6941_v2  ;;  %2504 = vadd.xlane.f32.xlu0 %v6944_v53  ;;  %v8688_v58 = vld [vmem:[#allocation47_spill] sm:$0xff]  ;;  %v8692_v2 = vld [vmem:[#allocation82_spill] sm:$0xff] }
 0x388   : > { %8678 = vst [vmem:[#allocation155_spill] sm:$0xff] %v7121_v16  ;;  %8683 = vst [vmem:[#allocation158_spill] sm:$0xff] %v7130_v19  ;;  %v2300_v12 = vpop.f32.mrb[144].mxu0  ;;  %v8690_v30 = vld [vmem:[#allocation107_spill] sm:$0xff] }
 0x389   : > { %v4890_v33 = vpop.f32.mrb[145].mxu0  ;;  %v7135_v37 = vmul.f32 %v2300_v12, %v8684_v43  ;;  %v7138_v16 = vmul.f32 %v2300_v12, %v8686_v29  ;;  %v7141_v55 = vmul.f32 %v2300_v12, %v8687_v7  ;;  %v7144_v14 = vmul.f32 %v2300_v12, %v8688_v58  ;;  %v8695_v43 = vld [vmem:[#allocation117_spill] sm:$0xff]  ;;  %v8696_v58 = vld [vmem:[#allocation42_spill] sm:$0xff] }
 0x38a   : > { %v2303_v17 = vpop.f32.mrb[146].mxu0  ;;  %v7147_v19 = vmul.f32 %v2300_v12, %v8690_v30  ;;  %v7150_v53 = vmul.f32 %v2300_v12, %v8692_v2  ;;  %v7153_v33 = vmul.f32 %v2300_v12, %v6874_v24 }
 0x38b   : > { %8685 = vst [vmem:[#allocation159_spill] sm:$0xff] %v7135_v37  ;;  %8689 = vst [vmem:[#allocation160_spill] sm:$0xff] %v7144_v14  ;;  %v7156_v37 = vmul.f32 %v2300_v12, %v8695_v43  ;;  %2708 = vadd.xlane.f32.xlu1 %v6947_v49  ;;  %2640 = vadd.xlane.f32.xlu0 %v6950_v54  ;;  %v4891_v7 = vpop.f32.mrb[147].mxu0  ;;  %v7161_v29 = vmul.f32 %v2303_v17, %v8696_v58  ;;  %v8697_v14 = vld [vmem:[#allocation15_spill] sm:$0xff]  ;;  %v8703_v43 = vld [vmem:[#allocation108_spill] sm:$0xff] }
 0x38c   : > { %8691 = vst [vmem:[#allocation161_spill] sm:$0xff] %v7147_v19  ;;  %8693 = vst [vmem:[#allocation162_spill] sm:$0xff] %v7150_v53  ;;  %v7164_v30 = vmul.f32 %v2303_v17, %v8697_v14  ;;  %v8698_v19 = vld [vmem:[#allocation75_spill] sm:$0xff]  ;;  %v8699_v53 = vld [vmem:[#allocation49_spill] sm:$0xff]  ;;  %v7176_v49 = vmul.f32 %v2303_v17, %v8703_v43  ;;  %v7182_v58 = vmul.f32 %v2303_v17, %v6878_v10 }
 0x38d   : > { %8694 = vst [vmem:[#allocation163_spill] sm:$0xff] %v7153_v33  ;;  %v7167_v2 = vmul.f32 %v2303_v17, %v8698_v19  ;;  %v7170_v24 = vmul.f32 %v2303_v17, %v8699_v53  ;;  %v8701_v33 = vld [vmem:[#allocation84_spill] sm:$0xff]  ;;  %v8705_v54 = vld [vmem:[#allocation118_spill] sm:$0xff]  ;;  %v8711_v43 = vld [vmem:[#allocation77_spill] sm:$0xff] }
 0x38e   : > { %v7173_v12 = vmul.f32 %v2303_v17, %v8701_v33  ;;  %8704 = vst [vmem:[#allocation166_spill] sm:$0xff] %v7176_v49  ;;  %v7179_v7 = vmul.f32 %v2303_v17, %v8705_v54  ;;  %8707 = vst [vmem:[#allocation168_spill] sm:$0xff] %v7182_v58  ;;  %v8708_v53 = vld [vmem:[#allocation44_spill] sm:$0xff]  ;;  %v8710_v33 = vld [vmem:[#allocation18_spill] sm:$0xff] }
 0x38f   : > { %8700 = vst [vmem:[#allocation164_spill] sm:$0xff] %v7170_v24  ;;  %2844 = vadd.xlane.f32.xlu1 %v6953_v35  ;;  %2776 = vadd.xlane.f32.xlu0 %v6956_v41  ;;  %v8712_v54 = vld [vmem:[#allocation51_spill] sm:$0xff]  ;;  %v8716_v35 = vld [vmem:[#allocation86_spill] sm:$0xff] }
 0x390   : > { %8702 = vst [vmem:[#allocation165_spill] sm:$0xff] %v7173_v12  ;;  %8706 = vst [vmem:[#allocation167_spill] sm:$0xff] %v7179_v7  ;;  %v2308_v19 = vpop.f32.mrb[148].mxu0  ;;  %v8714_v10 = vld [vmem:[#allocation111_spill] sm:$0xff] }
 0x391   : > { %v4894_v14 = vpop.f32.mrb[149].mxu0  ;;  %v7187_v24 = vmul.f32 %v2308_v19, %v8708_v53  ;;  %v7190_v12 = vmul.f32 %v2308_v19, %v8710_v33  ;;  %v7193_v49 = vmul.f32 %v2308_v19, %v8711_v43  ;;  %v7196_v7 = vmul.f32 %v2308_v19, %v8712_v54  ;;  %v8719_v53 = vld [vmem:[#allocation120_spill] sm:$0xff]  ;;  %v8720_v54 = vld [vmem:[#allocation19_spill] sm:$0xff] }
 0x392   : > { %v2311_v17 = vpop.f32.mrb[150].mxu0  ;;  %v7199_v58 = vmul.f32 %v2308_v19, %v8714_v10  ;;  %v7202_v41 = vmul.f32 %v2308_v19, %v8716_v35  ;;  %v7205_v14 = vmul.f32 %v2308_v19, %v6884_v27 }
 0x393   : > { %8709 = vst [vmem:[#allocation169_spill] sm:$0xff] %v7187_v24  ;;  %8713 = vst [vmem:[#allocation170_spill] sm:$0xff] %v7196_v7  ;;  %v7208_v24 = vmul.f32 %v2308_v19, %v8719_v53  ;;  %2438 = vadd.xlane.f32.xlu0 %v6959_v48  ;;  %2370 = vadd.xlane.f32.xlu1 %v6962_v15  ;;  %v4895_v43 = vpop.f32.mrb[151].mxu0  ;;  %v7213_v33 = vmul.f32 %v2311_v17, %v8720_v54  ;;  %v8721_v7 = vld [vmem:[#allocation46_spill] sm:$0xff]  ;;  %v8727_v53 = vld [vmem:[#allocation112_spill] sm:$0xff] }
 0x394   : > { %8715 = vst [vmem:[#allocation171_spill] sm:$0xff] %v7199_v58  ;;  %8717 = vst [vmem:[#allocation172_spill] sm:$0xff] %v7202_v41  ;;  %v7216_v10 = vmul.f32 %v2311_v17, %v8721_v7  ;;  %v8722_v58 = vld [vmem:[#allocation53_spill] sm:$0xff]  ;;  %v8723_v41 = vld [vmem:[#allocation79_spill] sm:$0xff]  ;;  %v7228_v48 = vmul.f32 %v2311_v17, %v8727_v53  ;;  %v7234_v54 = vmul.f32 %v2311_v17, %v6888_v3 }
 0x395   : > { %8718 = vst [vmem:[#allocation173_spill] sm:$0xff] %v7205_v14  ;;  %v7219_v35 = vmul.f32 %v2311_v17, %v8722_v58  ;;  %v7222_v27 = vmul.f32 %v2311_v17, %v8723_v41  ;;  %v8725_v14 = vld [vmem:[#allocation87_spill] sm:$0xff]  ;;  %v8729_v15 = vld [vmem:[#allocation121_spill] sm:$0xff]  ;;  %v8732_v41 = vld [vmem:[#allocation48_spill] sm:$0xff] }
 0x396   : > { %v7225_v19 = vmul.f32 %v2311_v17, %v8725_v14  ;;  %8728 = vst [vmem:[#allocation176_spill] sm:$0xff] %v7228_v48  ;;  %v7231_v43 = vmul.f32 %v2311_v17, %v8729_v15  ;;  %8731 = vst [vmem:[#allocation178_spill] sm:$0xff] %v7234_v54  ;;  %v8734_v14 = vld [vmem:[#allocation20_spill] sm:$0xff]  ;;  %v8735_v53 = vld [vmem:[#allocation81_spill] sm:$0xff] }
 0x397   : > { %8724 = vst [vmem:[#allocation174_spill] sm:$0xff] %v7222_v27  ;;  %2574 = vadd.xlane.f32.xlu0 %v6965_v62  ;;  %2506 = vadd.xlane.f32.xlu1 %v6968_v45  ;;  %v8736_v15 = vld [vmem:[#allocation54_spill] sm:$0xff]  ;;  %v8738_v3 = vld [vmem:[#allocation115_spill] sm:$0xff]  ;;  %v8740_v62 = vld [vmem:[#allocation88_spill] sm:$0xff] }
 0x398   : > { %8726 = vst [vmem:[#allocation175_spill] sm:$0xff] %v7225_v19  ;;  %8730 = vst [vmem:[#allocation177_spill] sm:$0xff] %v7231_v43  ;;  %v2316_v58 = vpop.f32.mrb[152].mxu0 }
 0x399   : > { %v4898_v7 = vpop.f32.mrb[153].mxu0  ;;  %v7239_v27 = vmul.f32 %v2316_v58, %v8732_v41  ;;  %v7242_v19 = vmul.f32 %v2316_v58, %v8734_v14  ;;  %v7245_v48 = vmul.f32 %v2316_v58, %v8735_v53  ;;  %v7248_v43 = vmul.f32 %v2316_v58, %v8736_v15  ;;  %v8743_v41 = vld [vmem:[#allocation123_spill] sm:$0xff]  ;;  %v8744_v15 = vld [vmem:[#allocation21_spill] sm:$0xff] }
 0x39a   : > { %v2319_v17 = vpop.f32.mrb[154].mxu0  ;;  %v7251_v54 = vmul.f32 %v2316_v58, %v8738_v3  ;;  %v7254_v45 = vmul.f32 %v2316_v58, %v8740_v62  ;;  %v7257_v7 = vmul.f32 %v2316_v58, %v6894_v0 }
 0x39b   : > { %8733 = vst [vmem:[#allocation179_spill] sm:$0xff] %v7239_v27  ;;  %8737 = vst [vmem:[#allocation180_spill] sm:$0xff] %v7248_v43  ;;  %v7260_v27 = vmul.f32 %v2316_v58, %v8743_v41  ;;  %2710 = vadd.xlane.f32.xlu0 %v6971_v44  ;;  %2642 = vadd.xlane.f32.xlu1 %v6974_v47  ;;  %v4899_v53 = vpop.f32.mrb[155].mxu0  ;;  %v7265_v14 = vmul.f32 %v2319_v17, %v8744_v15  ;;  %v8745_v43 = vld [vmem:[#allocation50_spill] sm:$0xff]  ;;  %v8751_v41 = vld [vmem:[#allocation116_spill] sm:$0xff] }
 0x39c   : > { %8739 = vst [vmem:[#allocation181_spill] sm:$0xff] %v7251_v54  ;;  %8741 = vst [vmem:[#allocation182_spill] sm:$0xff] %v7254_v45  ;;  %v7268_v3 = vmul.f32 %v2319_v17, %v8745_v43  ;;  %v8746_v54 = vld [vmem:[#allocation55_spill] sm:$0xff]  ;;  %v7280_v44 = vmul.f32 %v2319_v17, %v8751_v41  ;;  %v8753_v47 = vld [vmem:[#allocation125_spill] sm:$0xff]  ;;  %v7286_v15 = vmul.f32 %v2319_v17, %v6898_v5 }
 0x39d   : > { %8742 = vst [vmem:[#allocation183_spill] sm:$0xff] %v7257_v7  ;;  %v7271_v62 = vmul.f32 %v2319_v17, %v8746_v54  ;;  %v8747_v45 = vld [vmem:[#allocation83_spill] sm:$0xff]  ;;  %v8749_v7 = vld [vmem:[#allocation90_spill] sm:$0xff]  ;;  %v7283_v53 = vmul.f32 %v2319_v17, %v8753_v47  ;;  %v8758_v41 = vld [vmem:[#allocation85_spill] sm:$0xff] }
 0x39e   : > { %v7274_v0 = vmul.f32 %v2319_v17, %v8747_v45  ;;  %v7277_v58 = vmul.f32 %v2319_v17, %v8749_v7  ;;  %8752 = vst [vmem:[#allocation186_spill] sm:$0xff] %v7280_v44  ;;  %8755 = vst [vmem:[#allocation188_spill] sm:$0xff] %v7286_v15  ;;  %v8756_v45 = vld [vmem:[#allocation52_spill] sm:$0xff]  ;;  %v8757_v7 = vld [vmem:[#allocation22_spill] sm:$0xff] }
 0x39f   : > { %8754 = vst [vmem:[#allocation187_spill] sm:$0xff] %v7283_v53  ;;  %2846 = vadd.xlane.f32.xlu0 %v6977_v22  ;;  %2778 = vadd.xlane.f32.xlu1 %v6980_v63  ;;  %v8759_v47 = vld [vmem:[#allocation58_spill] sm:$0xff]  ;;  %v8760_v5 = vld [vmem:[#allocation119_spill] sm:$0xff]  ;;  %v8761_v22 = vld [vmem:[#allocation92_spill] sm:$0xff] }
 0x3a0   : > { %8748 = vst [vmem:[#allocation184_spill] sm:$0xff] %v7274_v0  ;;  %8750 = vst [vmem:[#allocation185_spill] sm:$0xff] %v7277_v58  ;;  %v2324_v54 = vpop.f32.mrb[156].mxu0 }
 0x3a1   : > { %v4902_v43 = vpop.f32.mrb[157].mxu0  ;;  %v7291_v0 = vmul.f32 %v2324_v54, %v8756_v45  ;;  %v7294_v58 = vmul.f32 %v2324_v54, %v8757_v7  ;;  %v7297_v44 = vmul.f32 %v2324_v54, %v8758_v41  ;;  %v7300_v53 = vmul.f32 %v2324_v54, %v8759_v47 }
 0x3a2   : > { %v2327_v17 = vpop.f32.mrb[158].mxu0  ;;  %v7303_v15 = vmul.f32 %v2324_v54, %v8760_v5  ;;  %v7306_v63 = vmul.f32 %v2324_v54, %v8761_v22  ;;  %v7309_v43 = vmul.f32 %v2324_v54, %v6904_v25  ;;  %v7312_v45 = vmul.f32 %v2324_v54, %v6833_v26 }
 0x3a3   : > { %2440 = vadd.xlane.f32.xlu1 %v6983_v8  ;;  %2372 = vadd.xlane.f32.xlu0 %v6986_v18  ;;  %v4903_v41 = vpop.f32.mrb[159].mxu0  ;;  %v8762_v8 = vld [vmem:[#allocation140_spill] sm:$0xff]  ;;  %v8779_v17 = vld [vmem:[#allocation157_spill] sm:$0xff] }
 0x3a4   : > { %v8770_v18 = vld [vmem:[#allocation148_spill] sm:$0xff] }
 0x3a7   : > { %2576 = vadd.xlane.f32.xlu1 %v6989_v51  ;;  %2508 = vadd.xlane.f32.xlu0 %v6992_v59  ;;  %v8763_v51 = vld [vmem:[#allocation141_spill] sm:$0xff] }
 0x3ab   : > { %2712 = vadd.xlane.f32.xlu1 %v6995_v56  ;;  %2644 = vadd.xlane.f32.xlu0 %v6998_v20 }
 0x3af   : > { %2848 = vadd.xlane.f32.xlu1 %v7001_v31  ;;  %2780 = vadd.xlane.f32.xlu0 %v7004_v57  ;;  %v8765_v57 = vld [vmem:[#allocation143_spill] sm:$0xff] }
 0x3b3   : > { %2442 = vadd.xlane.f32.xlu0 %v7007_v11  ;;  %2374 = vadd.xlane.f32.xlu1 %v7010_v6  ;;  %v8774_v6 = vld [vmem:[#allocation152_spill] sm:$0xff] }
 0x3b7   : > { %2578 = vadd.xlane.f32.xlu0 %v7013_v28  ;;  %2510 = vadd.xlane.f32.xlu1 %v7016_v32  ;;  %v8764_v28 = vld [vmem:[#allocation142_spill] sm:$0xff]  ;;  %v8771_v32 = vld [vmem:[#allocation149_spill] sm:$0xff] }
 0x3bb   : > { %2714 = vadd.xlane.f32.xlu0 %v7019_v60  ;;  %2646 = vadd.xlane.f32.xlu1 %v7022_v23  ;;  %v8769_v60 = vld [vmem:[#allocation147_spill] sm:$0xff]  ;;  %v8775_v23 = vld [vmem:[#allocation153_spill] sm:$0xff] }
 0x3bf   : > { %2850 = vadd.xlane.f32.xlu0 %v7025_v13  ;;  %2782 = vadd.xlane.f32.xlu1 %v7028_v39  ;;  %v8776_v13 = vld [vmem:[#allocation154_spill] sm:$0xff] }
 0x3c3   : > { %2444 = vadd.xlane.f32.xlu1 %v7031_v52  ;;  %2376 = vadd.xlane.f32.xlu0 %v7034_v42  ;;  %v8766_v52 = vld [vmem:[#allocation144_spill] sm:$0xff]  ;;  %v8767_v42 = vld [vmem:[#allocation145_spill] sm:$0xff] }
 0x3c7   : > { %2580 = vadd.xlane.f32.xlu1 %v7037_v38  ;;  %2512 = vadd.xlane.f32.xlu0 %v8762_v8  ;;  %v8768_v38 = vld [vmem:[#allocation146_spill] sm:$0xff] }
 0x3c8   : > { %v8780_v8 = vld [vmem:[#allocation158_spill] sm:$0xff] }
 0x3cb   : > { %2716 = vadd.xlane.f32.xlu1 %v8763_v51  ;;  %2648 = vadd.xlane.f32.xlu0 %v8764_v28 }
 0x3cf   : > { %2852 = vadd.xlane.f32.xlu1 %v8765_v57  ;;  %2784 = vadd.xlane.f32.xlu0 %v7052_v21  ;;  %v8772_v21 = vld [vmem:[#allocation150_spill] sm:$0xff] }
 0x3d3   : > { %2446 = vadd.xlane.f32.xlu0 %v7057_v46  ;;  %2378 = vadd.xlane.f32.xlu1 %v7060_v34  ;;  %v8773_v34 = vld [vmem:[#allocation151_spill] sm:$0xff] }
 0x3d7   : > { %2582 = vadd.xlane.f32.xlu0 %v7063_v61  ;;  %2514 = vadd.xlane.f32.xlu1 %v8766_v52 }
 0x3db   : > { %2718 = vadd.xlane.f32.xlu0 %v8767_v42  ;;  %2650 = vadd.xlane.f32.xlu1 %v8768_v38  ;;  %v8781_v42 = vld [vmem:[#allocation159_spill] sm:$0xff] }
 0x3df   : > { %2854 = vadd.xlane.f32.xlu0 %v8769_v60  ;;  %2786 = vadd.xlane.f32.xlu1 %v8770_v18 }
 0x3e3   : > { %2448 = vadd.xlane.f32.xlu1 %v8771_v32  ;;  %2380 = vadd.xlane.f32.xlu0 %v7086_v36  ;;  %v8777_v36 = vld [vmem:[#allocation155_spill] sm:$0xff] }
 0x3e7   : > { %2584 = vadd.xlane.f32.xlu1 %v7089_v40  ;;  %2516 = vadd.xlane.f32.xlu0 %v8772_v21  ;;  %v8778_v40 = vld [vmem:[#allocation156_spill] sm:$0xff] }
 0x3e8   : > { %v8782_v21 = vld [vmem:[#allocation160_spill] sm:$0xff] }
 0x3eb   : > { %2720 = vadd.xlane.f32.xlu1 %v8773_v34  ;;  %2652 = vadd.xlane.f32.xlu0 %v8774_v6 }
 0x3ef   : > { %2856 = vadd.xlane.f32.xlu1 %v8775_v23  ;;  %2788 = vadd.xlane.f32.xlu0 %v7104_v4 }
 0x3f0   : > { %v2365_v59 = vpop.xlane.xlu1 %2364  ;;  %v2501_v11 = vpop.xlane.xlu0 %2500 }
 0x3f3   : > { %2450 = vadd.xlane.f32.xlu0 %v7109_v9  ;;  %2382 = vadd.xlane.f32.xlu1 %v7112_v50 }
 0x3f4   : > { %v2433_v56 = vpop.xlane.xlu1 %2432  ;;  %v2637_v46 = vpop.xlane.xlu0 %2636 }
 0x3f5   : > { %v2875_v20 = vsel %vm2874_vm0, %v2365_v59, %v2433_v56  ;;  %v8784_v56 = vld [vmem:[#allocation162_spill] sm:$0xff] }
 0x3f6   : > { %v2893_v31 = vsel %vm2892_vm14, %v2875_v20, %v2501_v11  ;;  %v8783_v11 = vld [vmem:[#allocation161_spill] sm:$0xff] }
 0x3f7   : > { %2586 = vadd.xlane.f32.xlu0 %v7115_v1  ;;  %2518 = vadd.xlane.f32.xlu1 %v8776_v13 }
 0x3f8   : > { %v2569_v4 = vpop.xlane.xlu1 %2568  ;;  %v2773_v39 = vpop.xlane.xlu0 %2772 }
 0x3f9   : > { %v2911_v61 = vsel %vm2910_vm15, %v2893_v31, %v2569_v4 }
 0x3fa   : > { %v2929_v9 = vsel %vm2928_vm1, %v2911_v61, %v2637_v46 }
 0x3fb   : > { %2722 = vadd.xlane.f32.xlu0 %v8777_v36  ;;  %2654 = vadd.xlane.f32.xlu1 %v8778_v40 }
 0x3fc   : > { %v2705_v50 = vpop.xlane.xlu1 %2704  ;;  %v2367_v54 = vpop.xlane.xlu0 %2366 }
 0x3fd   : > { %v2947_v41 = vsel %vm2946_vm2, %v2929_v9, %v2705_v50  ;;  %v8786_v50 = vld [vmem:[#allocation164_spill] sm:$0xff] }
 0x3fe   : > { %v2965_v1 = vsel %vm2964_vm3, %v2947_v41, %v2773_v39 }
 0x3ff   : > { %2858 = vadd.xlane.f32.xlu0 %v8779_v17  ;;  %2790 = vadd.xlane.f32.xlu1 %v8780_v8  ;;  %v8787_v17 = vld [vmem:[#allocation165_spill] sm:$0xff] }
 0x400   : > { %v2841_v51 = vpop.xlane.xlu1 %2840  ;;  %v2435_v28 = vpop.xlane.xlu0 %2434 }
 0x401   : > { %v7369_v57 = vsel %vm2982_vm4, %v2965_v1, %v2841_v51  ;;  %v2876_v52 = vsel %vm2874_vm0, %v2367_v54, %v2435_v28 }
 0x403   : > { %2452 = vadd.xlane.f32.xlu1 %v8781_v42  ;;  %2384 = vadd.xlane.f32.xlu0 %v7138_v16 }
 0x404   : > { %v2503_v38 = vpop.xlane.xlu1 %2502  ;;  %v2571_v60 = vpop.xlane.xlu0 %2570 }
 0x405   : > { %v2894_v18 = vsel %vm2892_vm14, %v2876_v52, %v2503_v38  ;;  %v8790_v52 = vld [vmem:[#allocation168_spill] sm:$0xff] }
 0x406   : > { %v2912_v32 = vsel %vm2910_vm15, %v2894_v18, %v2571_v60  ;;  %v8791_v18 = vld [vmem:[#allocation169_spill] sm:$0xff] }
 0x407   : > { %2588 = vadd.xlane.f32.xlu1 %v7141_v55  ;;  %2520 = vadd.xlane.f32.xlu0 %v8782_v21  ;;  %v8785_v55 = vld [vmem:[#allocation163_spill] sm:$0xff] }
 0x408   : > { %v2639_v34 = vpop.xlane.xlu1 %2638  ;;  %v2707_v6 = vpop.xlane.xlu0 %2706 }
 0x409   : > { %v2930_v23 = vsel %vm2928_vm1, %v2912_v32, %v2639_v34 }
 0x40a   : > { %v2948_v59 = vsel %vm2946_vm2, %v2930_v23, %v2707_v6  ;;  %v8792_v23 = vld [vmem:[#allocation170_spill] sm:$0xff] }
 0x40b   : > { %2724 = vadd.xlane.f32.xlu1 %v8783_v11  ;;  %2656 = vadd.xlane.f32.xlu0 %v8784_v56 }
 0x40c   : > { %v2775_v16 = vpop.xlane.xlu1 %2774  ;;  %v2843_v46 = vpop.xlane.xlu0 %2842 }
 0x40d   : > { %v2966_v20 = vsel %vm2964_vm3, %v2948_v59, %v2775_v16 }
 0x40e   : > { %v7384_v31 = vsel %vm2982_vm4, %v2966_v20, %v2843_v46  ;;  %v8793_v46 = vld [vmem:[#allocation171_spill] sm:$0xff]  ;;  %v8794_v20 = vld [vmem:[#allocation172_spill] sm:$0xff] }
 0x40f   : > { %2860 = vadd.xlane.f32.xlu1 %v8785_v55  ;;  %2792 = vadd.xlane.f32.xlu0 %v7156_v37 }
 0x410   : > { %v2437_v13 = vpop.xlane.xlu1 %2436  ;;  %v2369_v4 = vpop.xlane.xlu0 %2368 }
 0x411   : > { %v2877_v39 = vsel %vm2874_vm0, %v2369_v4, %v2437_v13 }
 0x413   : > { %2454 = vadd.xlane.f32.xlu0 %v7161_v29  ;;  %2386 = vadd.xlane.f32.xlu1 %v7164_v30  ;;  %v8788_v29 = vld [vmem:[#allocation166_spill] sm:$0xff] }
 0x414   : > { %v2573_v61 = vpop.xlane.xlu1 %2572  ;;  %v2505_v9 = vpop.xlane.xlu0 %2504 }
 0x415   : > { %v2895_v36 = vsel %vm2892_vm14, %v2877_v39, %v2505_v9 }
 0x416   : > { %v2913_v40 = vsel %vm2910_vm15, %v2895_v36, %v2573_v61 }
 0x417   : > { %2590 = vadd.xlane.f32.xlu0 %v7167_v2  ;;  %2522 = vadd.xlane.f32.xlu1 %v8786_v50  ;;  %v8789_v2 = vld [vmem:[#allocation167_spill] sm:$0xff] }
 0x418   : > { %v2709_v54 = vpop.xlane.xlu1 %2708  ;;  %v2641_v37 = vpop.xlane.xlu0 %2640 }
 0x419   : > { %v2931_v41 = vsel %vm2928_vm1, %v2913_v40, %v2641_v37  ;;  %v8796_v37 = vld [vmem:[#allocation174_spill] sm:$0xff] }
 0x41a   : > { %v2949_v1 = vsel %vm2946_vm2, %v2931_v41, %v2709_v54 }
 0x41b   : > { %2658 = vadd.xlane.f32.xlu1 %v8787_v17  ;;  %2726 = vadd.xlane.f32.xlu0 %v8788_v29  ;;  %v8798_v17 = vld [vmem:[#allocation176_spill] sm:$0xff]  ;;  %v8799_v29 = vld [vmem:[#allocation177_spill] sm:$0xff] }
 0x41c   : > { %v2845_v30 = vpop.xlane.xlu1 %2844  ;;  %v2777_v8 = vpop.xlane.xlu0 %2776 }
 0x41d   : > { %v2967_v51 = vsel %vm2964_vm3, %v2949_v1, %v2777_v8  ;;  %v8797_v1 = vld [vmem:[#allocation175_spill] sm:$0xff] }
 0x41e   : > { %v7401_v28 = vsel %vm2982_vm4, %v2967_v51, %v2845_v30  ;;  %v8800_v30 = vld [vmem:[#allocation178_spill] sm:$0xff] }
 0x41f   : > { %2794 = vadd.xlane.f32.xlu1 %v8789_v2  ;;  %2862 = vadd.xlane.f32.xlu0 %v8790_v52 }
 0x420   : > { %v2371_v42 = vpop.xlane.xlu1 %2370  ;;  %v2439_v38 = vpop.xlane.xlu0 %2438 }
 0x421   : > { %v2878_v60 = vsel %vm2874_vm0, %v2371_v42, %v2439_v38  ;;  %v8802_v42 = vld [vmem:[#allocation180_spill] sm:$0xff] }
 0x423   : > { %2456 = vadd.xlane.f32.xlu1 %v8791_v18  ;;  %2388 = vadd.xlane.f32.xlu0 %v7190_v12  ;;  %v8803_v18 = vld [vmem:[#allocation181_spill] sm:$0xff] }
 0x424   : > { %v2507_v32 = vpop.xlane.xlu1 %2506  ;;  %v2575_v21 = vpop.xlane.xlu0 %2574 }
 0x425   : > { %v2896_v34 = vsel %vm2892_vm14, %v2878_v60, %v2507_v32  ;;  %v8804_v32 = vld [vmem:[#allocation182_spill] sm:$0xff] }
 0x426   : > { %v2914_v6 = vsel %vm2910_vm15, %v2896_v34, %v2575_v21 }
 0x427   : > { %2592 = vadd.xlane.f32.xlu1 %v7193_v49  ;;  %2524 = vadd.xlane.f32.xlu0 %v8792_v23  ;;  %v8795_v49 = vld [vmem:[#allocation173_spill] sm:$0xff] }
 0x428   : > { %v2643_v59 = vpop.xlane.xlu1 %2642  ;;  %v2711_v11 = vpop.xlane.xlu0 %2710 }
 0x429   : > { %v2932_v56 = vsel %vm2928_vm1, %v2914_v6, %v2643_v59  ;;  %v8805_v6 = vld [vmem:[#allocation183_spill] sm:$0xff] }
 0x42a   : > { %v2950_v16 = vsel %vm2946_vm2, %v2932_v56, %v2711_v11  ;;  %v8806_v11 = vld [vmem:[#allocation184_spill] sm:$0xff] }
 0x42b   : > { %2728 = vadd.xlane.f32.xlu1 %v8793_v46  ;;  %2660 = vadd.xlane.f32.xlu0 %v8794_v20  ;;  %v8807_v46 = vld [vmem:[#allocation185_spill] sm:$0xff]  ;;  %v8808_v20 = vld [vmem:[#allocation186_spill] sm:$0xff] }
 0x42c   : > { %v2779_v12 = vpop.xlane.xlu1 %2778  ;;  %v2847_v55 = vpop.xlane.xlu0 %2846 }
 0x42d   : > { %v2968_v13 = vsel %vm2964_vm3, %v2950_v16, %v2779_v12 }
 0x42e   : > { %v7418_v4 = vsel %vm2982_vm4, %v2968_v13, %v2847_v55  ;;  %v8809_v55 = vld [vmem:[#allocation187_spill] sm:$0xff] }
 0x42f   : > { %2864 = vadd.xlane.f32.xlu1 %v8795_v49  ;;  %2796 = vadd.xlane.f32.xlu0 %v7208_v24 }
 0x430   : > { %v2441_v39 = vpop.xlane.xlu1 %2440  ;;  %v2373_v61 = vpop.xlane.xlu0 %2372 }
 0x431   : > { %v2879_v9 = vsel %vm2874_vm0, %v2373_v61, %v2441_v39 }
 0x433   : > { %2390 = vadd.xlane.f32.xlu1 %v7213_v33  ;;  %2458 = vadd.xlane.f32.xlu0 %v7216_v10 }
 0x434   : > { %v2577_v36 = vpop.xlane.xlu1 %2576  ;;  %v2509_v40 = vpop.xlane.xlu0 %2508 }
 0x435   : > { %v2897_v50 = vsel %vm2892_vm14, %v2879_v9, %v2509_v40 }
 0x436   : > { %v2915_v54 = vsel %vm2910_vm15, %v2897_v50, %v2577_v36 }
 0x437   : > { %2526 = vadd.xlane.f32.xlu1 %v7219_v35  ;;  %2594 = vadd.xlane.f32.xlu0 %v8796_v37  ;;  %v8801_v35 = vld [vmem:[#allocation179_spill] sm:$0xff] }
 0x438   : > { %v7429_v41 = vpop.xlane.xlu1 %2712  ;;  %v2645_v24 = vpop.xlane.xlu0 %2644 }
 0x43b   : > { %2662 = vadd.xlane.f32.xlu1 %v8797_v1  ;;  %2730 = vadd.xlane.f32.xlu0 %v8798_v17 }
 0x43c   : > { %v7433_v33 = vpop.xlane.xlu1 %2848  ;;  %v7435_v10 = vpop.xlane.xlu0 %2780 }
 0x43f   : > { %2798 = vadd.xlane.f32.xlu1 %v8799_v29  ;;  %2866 = vadd.xlane.f32.xlu0 %v8800_v30 }
 0x440   : > { %v2375_v8 = vpop.xlane.xlu1 %2374  ;;  %v2443_v51 = vpop.xlane.xlu0 %2442 }
 0x441   : > { %v2880_v9 = vsel %vm2874_vm0, %v2375_v8, %v2443_v51 }
 0x443   : > { %2460 = vadd.xlane.f32.xlu1 %v8801_v35  ;;  %2392 = vadd.xlane.f32.xlu0 %v7242_v19 }
 0x444   : > { %v2511_v2 = vpop.xlane.xlu1 %2510  ;;  %v2579_v52 = vpop.xlane.xlu0 %2578 }
 0x445   : > { %v2898_v36 = vsel %vm2892_vm14, %v2880_v9, %v2511_v2 }
 0x446   : > { %v2916_v50 = vsel %vm2910_vm15, %v2898_v36, %v2579_v52 }
 0x447   : > { %2596 = vadd.xlane.f32.xlu1 %v7245_v48  ;;  %2528 = vadd.xlane.f32.xlu0 %v8802_v42 }
 0x448   : > { %v2647_v38 = vpop.xlane.xlu1 %2646  ;;  %v2715_v60 = vpop.xlane.xlu0 %2714 }
 0x44b   : > { %2732 = vadd.xlane.f32.xlu1 %v8803_v18  ;;  %2664 = vadd.xlane.f32.xlu0 %v8804_v32 }
 0x44c   : > { %v2783_v21 = vpop.xlane.xlu1 %2782  ;;  %v7445_v34 = vpop.xlane.xlu0 %2850 }
 0x44f   : > { %2868 = vadd.xlane.f32.xlu1 %v8805_v6  ;;  %2800 = vadd.xlane.f32.xlu0 %v7260_v27 }
 0x450   : > { %v2445_v19 = vpop.xlane.xlu1 %2444  ;;  %v2377_v23 = vpop.xlane.xlu0 %2376 }
 0x453   : > { %2394 = vadd.xlane.f32.xlu1 %v7265_v14  ;;  %2462 = vadd.xlane.f32.xlu0 %v7268_v3  ;;  %v8810_v14 = vld [vmem:[#allocation188_spill] sm:$0xff] }
 0x454   : > { %v2581_v48 = vpop.xlane.xlu1 %2580  ;;  %v2513_v59 = vpop.xlane.xlu0 %2512 }
 0x457   : > { %2530 = vadd.xlane.f32.xlu1 %v7271_v62  ;;  %2598 = vadd.xlane.f32.xlu0 %v8806_v11 }
 0x458   : > { %v2717_v56 = vpop.xlane.xlu1 %2716  ;;  %v2649_v16 = vpop.xlane.xlu0 %2648 }
 0x45b   : > { %2666 = vadd.xlane.f32.xlu1 %v8807_v46  ;;  %2734 = vadd.xlane.f32.xlu0 %v8808_v20 }
 0x45c   : > { %v7455_v12 = vpop.xlane.xlu1 %2852  ;;  %v2785_v27 = vpop.xlane.xlu0 %2784 }
 0x45f   : > { %2802 = vadd.xlane.f32.xlu1 %v8809_v55  ;;  %2870 = vadd.xlane.f32.xlu0 %v8810_v14 }
 0x460   : > { %v2379_v3 = vpop.xlane.xlu1 %2378  ;;  %v2447_v13 = vpop.xlane.xlu0 %2446 }
 0x463   : > { %2464 = vadd.xlane.f32.xlu1 %v7291_v0  ;;  %2396 = vadd.xlane.f32.xlu0 %v7294_v58  ;;  %v2933_v58 = vsel %vm2928_vm1, %v2915_v54, %v2645_v24 }
 0x464   : > { %v2515_v62 = vpop.xlane.xlu1 %2514  ;;  %v2583_v49 = vpop.xlane.xlu0 %2582  ;;  %v2951_v54 = vsel %vm2946_vm2, %v2933_v58, %v7429_v41 }
 0x465   : > { %v2969_v24 = vsel %vm2964_vm3, %v2951_v54, %v7435_v10 }
 0x466   : > { %v7498_v18 = vsel %vm2982_vm4, %v2969_v24, %v7433_v33 }
 0x467   : > { %2600 = vadd.xlane.f32.xlu1 %v7297_v44  ;;  %2532 = vadd.xlane.f32.xlu0 %v7300_v53  ;;  %v2881_v44 = vsel %vm2874_vm0, %v2377_v23, %v2445_v19  ;;  %v2882_v53 = vsel %vm2874_vm0, %v2379_v3, %v2447_v13 }
 0x468   : > { %v2651_v39 = vpop.xlane.xlu1 %2650  ;;  %v2719_v61 = vpop.xlane.xlu0 %2718  ;;  %v2900_v37 = vsel %vm2892_vm14, %v2882_v53, %v2515_v62 }
 0x469   : > { %v2918_v8 = vsel %vm2910_vm15, %v2900_v37, %v2583_v49 }
 0x46a   : > { %v2936_v10 = vsel %vm2928_vm1, %v2918_v8, %v2651_v39 }
 0x46b   : > { %2736 = vadd.xlane.f32.xlu1 %v7303_v15  ;;  %2668 = vadd.xlane.f32.xlu0 %v7306_v63  ;;  %v2934_v15 = vsel %vm2928_vm1, %v2916_v50, %v2647_v38  ;;  %v2899_v63 = vsel %vm2892_vm14, %v2881_v44, %v2513_v59  ;;  %v3010_v38 = vsel %vm3000_vm5, %v7418_v4, -inf  ;;  %v2954_v6 = vsel %vm2946_vm2, %v2936_v10, %v2719_v61 }
 0x46c   : > { %v2787_v40 = vpop.xlane.xlu1 %2786  ;;  %v2855_v0 = vpop.xlane.xlu0 %2854  ;;  %v2952_v29 = vsel %vm2946_vm2, %v2934_v15, %v2715_v60  ;;  %v2917_v30 = vsel %vm2910_vm15, %v2899_v63, %v2581_v48  ;;  %v3007_v60 = vsel %vm3000_vm5, %v7401_v28, -inf }
 0x46d   : > { %v2970_v51 = vsel %vm2964_vm3, %v2952_v29, %v2783_v21  ;;  %v2935_v41 = vsel %vm2928_vm1, %v2917_v30, %v2649_v16  ;;  %v2972_v23 = vsel %vm2964_vm3, %v2954_v6, %v2787_v40 }
 0x46e   : > { %v7502_v32 = vsel %vm2982_vm4, %v2970_v51, %v7445_v34  ;;  %v2953_v21 = vsel %vm2946_vm2, %v2935_v41, %v2717_v56  ;;  %v3013_v34 = vsel %vm3000_vm5, %v7498_v18, -inf  ;;  %v7515_v16 = vsel %vm2982_vm4, %v2972_v23, %v2855_v0 }
 0x46f   : > { %2872 = vadd.xlane.f32.xlu1 %v7309_v43  ;;  %2804 = vadd.xlane.f32.xlu0 %v7312_v45  ;;  %v3004_v43 = vsel %vm3000_vm5, %v7384_v31, -inf  ;;  %v3001_v45 = vsel %vm3000_vm5, %v7369_v57, -inf  ;;  %v2971_v19 = vsel %vm2964_vm3, %v2953_v21, %v2785_v27  ;;  %v3016_v56 = vsel %vm3000_vm5, %v7502_v32, -inf }
 0x470   : > { %v2449_v1 = vpop.xlane.xlu1 %2448  ;;  %v2381_v17 = vpop.xlane.xlu0 %2380  ;;  %v7519_v46 = vsel %vm2982_vm4, %v2971_v19, %v7455_v12  ;;  %v3022_v13 = vsel %vm3000_vm5, %v7515_v16, -inf }
 0x471   : > { %v2883_v35 = vsel %vm2874_vm0, %v2381_v17, %v2449_v1  ;;  %v3019_v3 = vsel %vm3000_vm5, %v7519_v46, -inf }
 0x473   : > { %3005 = vmax.xlane.f32.xlu1 %v3004_v43  ;;  %3002 = vmax.xlane.f32.xlu0 %v3001_v45 }
 0x474   : > { %v2585_v2 = vpop.xlane.xlu1 %2584  ;;  %v2517_v52 = vpop.xlane.xlu0 %2516 }
 0x475   : > { %v2901_v42 = vsel %vm2892_vm14, %v2883_v35, %v2517_v52 }
 0x476   : > { %v2919_v59 = vsel %vm2910_vm15, %v2901_v42, %v2585_v2 }
 0x477   : > { %3011 = vmax.xlane.f32.xlu1 %v3010_v38  ;;  %3008 = vmax.xlane.f32.xlu0 %v3007_v60 }
 0x478   : > { %v2721_v48 = vpop.xlane.xlu1 %2720  ;;  %v2653_v11 = vpop.xlane.xlu0 %2652 }
 0x479   : > { %v2937_v33 = vsel %vm2928_vm1, %v2919_v59, %v2653_v11 }
 0x47a   : > { %v2955_v27 = vsel %vm2946_vm2, %v2937_v33, %v2721_v48 }
 0x47b   : > { %3014 = vmax.xlane.f32.xlu0 %v3013_v34  ;;  %3017 = vmax.xlane.f32.xlu1 %v3016_v56 }
 0x47c   : > { %v2857_v20 = vpop.xlane.xlu1 %2856  ;;  %v2789_v55 = vpop.xlane.xlu0 %2788 }
 0x47d   : > { %v2973_v14 = vsel %vm2964_vm3, %v2955_v27, %v2789_v55 }
 0x47e   : > { %v7528_v62 = vsel %vm2982_vm4, %v2973_v14, %v2857_v20 }
 0x47f   : > { %3020 = vmax.xlane.f32.xlu0 %v3019_v3  ;;  %3023 = vmax.xlane.f32.xlu1 %v3022_v13  ;;  %v3025_v39 = vsel %vm3000_vm5, %v7528_v62, -inf }
 0x480   : > { %v2383_v49 = vpop.xlane.xlu1 %2382  ;;  %v2451_v12 = vpop.xlane.xlu0 %2450 }
 0x481   : > { %v2884_v61 = vsel %vm2874_vm0, %v2383_v49, %v2451_v12 }
 0x483   : > { %3026 = vmax.xlane.f32.xlu0 %v3025_v39 }
 0x484   : > { %v2519_v9 = vpop.xlane.xlu1 %2518  ;;  %v2587_v36 = vpop.xlane.xlu0 %2586 }
 0x485   : > { %v2902_v40 = vsel %vm2892_vm14, %v2884_v61, %v2519_v9 }
 0x486   : > { %v2920_v0 = vsel %vm2910_vm15, %v2902_v40, %v2587_v36 }
 0x488   : > { %v2655_v58 = vpop.xlane.xlu1 %2654  ;;  %v2723_v50 = vpop.xlane.xlu0 %2722 }
 0x489   : > { %v2938_v44 = vsel %vm2928_vm1, %v2920_v0, %v2655_v58 }
 0x48a   : > { %v2956_v53 = vsel %vm2946_vm2, %v2938_v44, %v2723_v50 }
 0x48c   : > { %v2791_v15 = vpop.xlane.xlu1 %2790  ;;  %v2859_v63 = vpop.xlane.xlu0 %2858 }
 0x48d   : > { %v2974_v37 = vsel %vm2964_vm3, %v2956_v53, %v2791_v15 }
 0x48e   : > { %v7539_v1 = vsel %vm2982_vm4, %v2974_v37, %v2859_v63 }
 0x48f   : > { %v3028_v17 = vsel %vm3000_vm5, %v7539_v1, -inf }
 0x490   : > { %v2453_v54 = vpop.xlane.xlu1 %2452  ;;  %3029 = vmax.xlane.f32.xlu1 %v3028_v17  ;;  %v2385_v24 = vpop.xlane.xlu0 %2384 }
 0x491   : > { %v2885_v43 = vsel %vm2874_vm0, %v2385_v24, %v2453_v54 }
 0x494   : > { %v2589_v45 = vpop.xlane.xlu1 %2588  ;;  %v2521_v29 = vpop.xlane.xlu0 %2520 }
 0x495   : > { %v2903_v30 = vsel %vm2892_vm14, %v2885_v43, %v2521_v29 }
 0x496   : > { %v2921_v51 = vsel %vm2910_vm15, %v2903_v30, %v2589_v45 }
 0x498   : > { %v2725_v8 = vpop.xlane.xlu1 %2724  ;;  %v2657_v41 = vpop.xlane.xlu0 %2656 }
 0x499   : > { %v2939_v10 = vsel %vm2928_vm1, %v2921_v51, %v2657_v41 }
 0x49a   : > { %v2957_v2 = vsel %vm2946_vm2, %v2939_v10, %v2725_v8 }
 0x49c   : > { %v2861_v35 = vpop.xlane.xlu1 %2860  ;;  %v2793_v52 = vpop.xlane.xlu0 %2792 }
 0x49d   : > { %v2975_v42 = vsel %vm2964_vm3, %v2957_v2, %v2793_v52 }
 0x49e   : > { %v7550_v38 = vsel %vm2982_vm4, %v2975_v42, %v2861_v35 }
 0x49f   : > { %v3031_v60 = vsel %vm3000_vm5, %v7550_v38, -inf }
 0x4a0   : > { %v2387_v21 = vpop.xlane.xlu1 %2386  ;;  %3032 = vmax.xlane.f32.xlu0 %v3031_v60  ;;  %v2455_v6 = vpop.xlane.xlu0 %2454 }
 0x4a1   : > { %v2886_v19 = vsel %vm2874_vm0, %v2387_v21, %v2455_v6 }
 0x4a4   : > { %v2523_v23 = vpop.xlane.xlu1 %2522  ;;  %v2591_v48 = vpop.xlane.xlu0 %2590 }
 0x4a5   : > { %v2904_v59 = vsel %vm2892_vm14, %v2886_v19, %v2523_v23 }
 0x4a6   : > { %v2922_v11 = vsel %vm2910_vm15, %v2904_v59, %v2591_v48 }
 0x4a8   : > { %v2659_v33 = vpop.xlane.xlu1 %2658  ;;  %v2727_v34 = vpop.xlane.xlu0 %2726 }
 0x4a9   : > { %v2940_v56 = vsel %vm2928_vm1, %v2922_v11, %v2659_v33 }
 0x4aa   : > { %v2958_v20 = vsel %vm2946_vm2, %v2940_v56, %v2727_v34 }
 0x4ac   : > { %v2795_v27 = vpop.xlane.xlu1 %2794  ;;  %v2863_v55 = vpop.xlane.xlu0 %2862 }
 0x4ad   : > { %v2976_v14 = vsel %vm2964_vm3, %v2958_v20, %v2795_v27 }
 0x4ae   : > { %v7561_v3 = vsel %vm2982_vm4, %v2976_v14, %v2863_v55 }
 0x4af   : > { %v3034_v13 = vsel %vm3000_vm5, %v7561_v3, -inf }
 0x4b0   : > { %v2457_v49 = vpop.xlane.xlu1 %2456  ;;  %3035 = vmax.xlane.f32.xlu1 %v3034_v13  ;;  %v2389_v12 = vpop.xlane.xlu0 %2388 }
 0x4b1   : > { %v2887_v39 = vsel %vm2874_vm0, %v2389_v12, %v2457_v49 }
 0x4b4   : > { %v2593_v61 = vpop.xlane.xlu1 %2592  ;;  %v2525_v9 = vpop.xlane.xlu0 %2524 }
 0x4b5   : > { %v2905_v36 = vsel %vm2892_vm14, %v2887_v39, %v2525_v9 }
 0x4b6   : > { %v2923_v0 = vsel %vm2910_vm15, %v2905_v36, %v2593_v61 }
 0x4b8   : > { %v2729_v40 = vpop.xlane.xlu1 %2728  ;;  %v2661_v58 = vpop.xlane.xlu0 %2660 }
 0x4b9   : > { %v2941_v50 = vsel %vm2928_vm1, %v2923_v0, %v2661_v58 }
 0x4ba   : > { %v2959_v53 = vsel %vm2946_vm2, %v2941_v50, %v2729_v40 }
 0x4bc   : > { %v2865_v44 = vpop.xlane.xlu1 %2864  ;;  %v2797_v15 = vpop.xlane.xlu0 %2796 }
 0x4bd   : > { %v2977_v63 = vsel %vm2964_vm3, %v2959_v53, %v2797_v15 }
 0x4be   : > { %v7572_v37 = vsel %vm2982_vm4, %v2977_v63, %v2865_v44 }
 0x4bf   : > { %v3037_v17 = vsel %vm3000_vm5, %v7572_v37, -inf }
 0x4c0   : > { %v2391_v54 = vpop.xlane.xlu1 %2390  ;;  %3038 = vmax.xlane.f32.xlu0 %v3037_v17  ;;  %v2459_v24 = vpop.xlane.xlu0 %2458 }
 0x4c1   : > { %v2888_v43 = vsel %vm2874_vm0, %v2391_v54, %v2459_v24 }
 0x4c4   : > { %v2527_v45 = vpop.xlane.xlu1 %2526  ;;  %v2595_v29 = vpop.xlane.xlu0 %2594 }
 0x4c5   : > { %v2906_v30 = vsel %vm2892_vm14, %v2888_v43, %v2527_v45 }
 0x4c6   : > { %v2924_v8 = vsel %vm2910_vm15, %v2906_v30, %v2595_v29 }
 0x4c8   : > { %v2663_v51 = vpop.xlane.xlu1 %2662  ;;  %v2731_v41 = vpop.xlane.xlu0 %2730 }
 0x4c9   : > { %v2942_v10 = vsel %vm2928_vm1, %v2924_v8, %v2663_v51 }
 0x4ca   : > { %v2960_v35 = vsel %vm2946_vm2, %v2942_v10, %v2731_v41 }
 0x4cc   : > { %v2799_v2 = vpop.xlane.xlu1 %2798  ;;  %v2867_v52 = vpop.xlane.xlu0 %2866 }
 0x4cd   : > { %v2978_v42 = vsel %vm2964_vm3, %v2960_v35, %v2799_v2 }
 0x4ce   : > { %v7583_v60 = vsel %vm2982_vm4, %v2978_v42, %v2867_v52 }
 0x4cf   : > { %v3040_v21 = vsel %vm3000_vm5, %v7583_v60, -inf }
 0x4d0   : > { %v2461_v6 = vpop.xlane.xlu1 %2460  ;;  %3041 = vmax.xlane.f32.xlu1 %v3040_v21  ;;  %v2393_v19 = vpop.xlane.xlu0 %2392 }
 0x4d1   : > { %v2889_v23 = vsel %vm2874_vm0, %v2393_v19, %v2461_v6 }
 0x4d4   : > { %v2597_v48 = vpop.xlane.xlu1 %2596  ;;  %v2529_v59 = vpop.xlane.xlu0 %2528 }
 0x4d5   : > { %v2907_v11 = vsel %vm2892_vm14, %v2889_v23, %v2529_v59 }
 0x4d6   : > { %v2925_v34 = vsel %vm2910_vm15, %v2907_v11, %v2597_v48 }
 0x4d8   : > { %v2733_v33 = vpop.xlane.xlu1 %2732  ;;  %v2665_v56 = vpop.xlane.xlu0 %2664 }
 0x4d9   : > { %v2943_v20 = vsel %vm2928_vm1, %v2925_v34, %v2665_v56 }
 0x4da   : > { %v2961_v55 = vsel %vm2946_vm2, %v2943_v20, %v2733_v33 }
 0x4dc   : > { %v2869_v27 = vpop.xlane.xlu1 %2868  ;;  %v2801_v14 = vpop.xlane.xlu0 %2800 }
 0x4dd   : > { %v2979_v13 = vsel %vm2964_vm3, %v2961_v55, %v2801_v14 }
 0x4de   : > { %v7594_v49 = vsel %vm2982_vm4, %v2979_v13, %v2869_v27 }
 0x4df   : > { %v3043_v12 = vsel %vm3000_vm5, %v7594_v49, -inf }
 0x4e0   : > { %v2395_v39 = vpop.xlane.xlu1 %2394  ;;  %3044 = vmax.xlane.f32.xlu0 %v3043_v12  ;;  %v2463_v61 = vpop.xlane.xlu0 %2462 }
 0x4e1   : > { %v2890_v9 = vsel %vm2874_vm0, %v2395_v39, %v2463_v61 }
 0x4e4   : > { %v2531_v36 = vpop.xlane.xlu1 %2530  ;;  %v2599_v40 = vpop.xlane.xlu0 %2598 }
 0x4e5   : > { %v2908_v0 = vsel %vm2892_vm14, %v2890_v9, %v2531_v36 }
 0x4e6   : > { %v2926_v58 = vsel %vm2910_vm15, %v2908_v0, %v2599_v40 }
 0x4e8   : > { %v2667_v50 = vpop.xlane.xlu1 %2666  ;;  %v2735_v44 = vpop.xlane.xlu0 %2734 }
 0x4e9   : > { %v2944_v53 = vsel %vm2928_vm1, %v2926_v58, %v2667_v50 }
 0x4ea   : > { %v2962_v15 = vsel %vm2946_vm2, %v2944_v53, %v2735_v44 }
 0x4ec   : > { %v2803_v63 = vpop.xlane.xlu1 %2802  ;;  %v2871_v17 = vpop.xlane.xlu0 %2870 }
 0x4ed   : > { %v2980_v54 = vsel %vm2964_vm3, %v2962_v15, %v2803_v63 }
 0x4ee   : > { %v7605_v24 = vsel %vm2982_vm4, %v2980_v54, %v2871_v17 }
 0x4ef   : > { %v3046_v43 = vsel %vm3000_vm5, %v7605_v24, -inf }
 0x4f0   : > { %v2465_v45 = vpop.xlane.xlu1 %2464  ;;  %3047 = vmax.xlane.f32.xlu1 %v3046_v43  ;;  %v2397_v29 = vpop.xlane.xlu0 %2396 }
 0x4f1   : > { %v2891_v30 = vsel %vm2874_vm0, %v2397_v29, %v2465_v45 }
 0x4f4   : > { %v2601_v8 = vpop.xlane.xlu1 %2600  ;;  %v2533_v51 = vpop.xlane.xlu0 %2532 }
 0x4f5   : > { %v2909_v41 = vsel %vm2892_vm14, %v2891_v30, %v2533_v51 }
 0x4f6   : > { %v2927_v35 = vsel %vm2910_vm15, %v2909_v41, %v2601_v8 }
 0x4f8   : > { %v2737_v10 = vpop.xlane.xlu1 %2736  ;;  %v2669_v2 = vpop.xlane.xlu0 %2668 }
 0x4f9   : > { %v2945_v52 = vsel %vm2928_vm1, %v2927_v35, %v2669_v2 }
 0x4fa   : > { %v2963_v21 = vsel %vm2946_vm2, %v2945_v52, %v2737_v10 }
 0x4fc   : > { %v2873_v42 = vpop.xlane.xlu1 %2872  ;;  %v2805_v6 = vpop.xlane.xlu0 %2804 }
 0x4fd   : > { %v2981_v19 = vsel %vm2964_vm3, %v2963_v21, %v2805_v6 }
 0x4fe   : > { %v7616_v23 = vsel %vm2982_vm4, %v2981_v19, %v2873_v42 }
 0x4ff   : > { %v3049_v48 = vsel %vm3000_vm5, %v7616_v23, -inf }
 0x500   : > { %v3006_v59 = vpop.xlane.xlu1 %3005  ;;  %3050 = vmax.xlane.f32.xlu0 %v3049_v48  ;;  %v3003_v11 = vpop.xlane.xlu0 %3002 }
 0x501   : > { %v3053_v33 = vsub.f32 %v7384_v31, %v3006_v59  ;;  %v3052_v34 = vsub.f32 %v7369_v57, %v3003_v11 }
 0x503   : > { %v3071_v56 = vmul.f32 1.442695, %v3053_v33  ;;  %v3069_v20 = vmul.f32 1.442695, %v3052_v34 }
 0x504   : > { %v3012_v27 = vpop.xlane.xlu1 %3011  ;;  %v3009_v55 = vpop.xlane.xlu0 %3008 }
 0x505   : > { %5138 = vpow2.f32 %v3071_v56  ;;  %v3055_v14 = vsub.f32 %v7418_v4, %v3012_v27  ;;  %v3054_v13 = vsub.f32 %v7401_v28, %v3009_v55 }
 0x506   : > { %5140 = vpow2.f32 %v3069_v20 }
 0x507   : > { %v3075_v12 = vmul.f32 1.442695, %v3055_v14  ;;  %v3073_v39 = vmul.f32 1.442695, %v3054_v13 }
 0x508   : > { %v3018_v61 = vpop.xlane.xlu1 %3017  ;;  %v3015_v9 = vpop.xlane.xlu0 %3014 }
 0x509   : > { %5142 = vpow2.f32 %v3075_v12  ;;  %v3057_v36 = vsub.f32 %v7502_v32, %v3018_v61  ;;  %v3056_v31 = vsub.f32 %v7498_v18, %v3015_v9 }
 0x50a   : > { %5144 = vpow2.f32 %v3073_v39 }
 0x50b   : > { %v3079_v57 = vmul.f32 1.442695, %v3057_v36  ;;  %v3077_v40 = vmul.f32 1.442695, %v3056_v31 }
 0x50c   : > { %v3024_v0 = vpop.xlane.xlu1 %3023  ;;  %v3021_v58 = vpop.xlane.xlu0 %3020 }
 0x50d   : > { %5146 = vpow2.f32 %v3079_v57  ;;  %v3059_v4 = vsub.f32 %v7515_v16, %v3024_v0  ;;  %v3058_v28 = vsub.f32 %v7519_v46, %v3021_v58 }
 0x50e   : > { %5148 = vpow2.f32 %v3077_v40 }
 0x50f   : > { %v7628_v50 = vpop.eup %5138  ;;  %v3083_v44 = vmul.f32 1.442695, %v3059_v4  ;;  %v3081_v53 = vmul.f32 1.442695, %v3058_v28 }
 0x510   : > { %v7630_v15 = vpop.eup %5140  ;;  %v3027_v32 = vpop.xlane.xlu0 %3026  ;;  %v3106_v18 = vsel %vm3000_vm5, %v7628_v50, 0.0 }
 0x511   : > { %5150 = vpow2.f32 %v3083_v44  ;;  %v3060_v63 = vsub.f32 %v7528_v62, %v3027_v32  ;;  %3107 = vadd.xlane.f32.xlu0 %v3106_v18  ;;  %v3103_v16 = vsel %vm3000_vm5, %v7630_v15, 0.0 }
 0x512   : > { %5152 = vpow2.f32 %v3081_v53  ;;  %3104 = vadd.xlane.f32.xlu1 %v3103_v16 }
 0x513   : > { %v7637_v46 = vpop.eup %5142  ;;  %v3085_v17 = vmul.f32 1.442695, %v3060_v63 }
 0x514   : > { %v7639_v54 = vpop.eup %5144  ;;  %v3112_v43 = vsel %vm3000_vm5, %v7637_v46, 0.0 }
 0x515   : > { %5154 = vpow2.f32 %v3085_v17  ;;  %3113 = vadd.xlane.f32.xlu0 %v3112_v43  ;;  %v3109_v45 = vsel %vm3000_vm5, %v7639_v54, 0.0 }
 0x516   : > { %3110 = vadd.xlane.f32.xlu1 %v3109_v45 }
 0x517   : > { %v7645_v62 = vpop.eup %5146 }
 0x518   : > { %v7647_v29 = vpop.eup %5148  ;;  %v3118_v30 = vsel %vm3000_vm5, %v7645_v62, 0.0 }
 0x519   : > { %3119 = vadd.xlane.f32.xlu0 %v3118_v30  ;;  %v3115_v8 = vsel %vm3000_vm5, %v7647_v29, 0.0 }
 0x51a   : > { %3116 = vadd.xlane.f32.xlu1 %v3115_v8 }
 0x51b   : > { %v7653_v51 = vpop.eup %5150 }
 0x51c   : > { %v7655_v41 = vpop.eup %5152  ;;  %v3124_v10 = vsel %vm3000_vm5, %v7653_v51, 0.0 }
 0x51d   : > { %v3030_v35 = vpop.xlane.xlu1 %3029  ;;  %3125 = vadd.xlane.f32.xlu0 %v3124_v10  ;;  %v3121_v2 = vsel %vm3000_vm5, %v7655_v41, 0.0 }
 0x51e   : > { %v3061_v52 = vsub.f32 %v7539_v1, %v3030_v35  ;;  %3122 = vadd.xlane.f32.xlu1 %v3121_v2  ;;  %v8812_v35 = vmov 2   ;;  %v8813_v2 = vmov 3  }
 0x51f   : > { %v7662_v42 = vpop.eup %5154 }
 0x520   : > { %v3087_v21 = vmul.f32 1.442695, %v3061_v52  ;;  %v3127_v6 = vsel %vm3000_vm5, %v7662_v42, 0.0 }
 0x522   : > { %5156 = vpow2.f32 %v3087_v21  ;;  %3128 = vadd.xlane.f32.xlu1 %v3127_v6  ;;  %v8815_v21 = vmov 5   ;;  %v8816_v6 = vmov 6  }
 0x52c   : > { %v7666_v19 = vpop.eup %5156 }
 0x52d   : > { %v3033_v48 = vpop.xlane.xlu0 %3032  ;;  %v3130_v59 = vsel %vm3000_vm5, %v7666_v19, 0.0 }
 0x52e   : > { %v3062_v11 = vsub.f32 %v7550_v38, %v3033_v48  ;;  %3131 = vadd.xlane.f32.xlu0 %v3130_v59  ;;  %v8817_v48 = vmov 7  }
 0x530   : > { %v3089_v33 = vmul.f32 1.442695, %v3062_v11 }
 0x532   : > { %5158 = vpow2.f32 %v3089_v33 }
 0x53c   : > { %v7671_v1 = vpop.eup %5158 }
 0x53d   : > { %v3036_v34 = vpop.xlane.xlu1 %3035  ;;  %v3133_v56 = vsel %vm3000_vm5, %v7671_v1, 0.0 }
 0x53e   : > { %v3063_v20 = vsub.f32 %v7561_v3, %v3036_v34  ;;  %3134 = vadd.xlane.f32.xlu1 %v3133_v56  ;;  %v8818_v56 = vmov 0  }
 0x540   : > { %v3091_v27 = vmul.f32 1.442695, %v3063_v20 }
 0x542   : > { %5160 = vpow2.f32 %v3091_v27 }
 0x54c   : > { %v7676_v55 = vpop.eup %5160 }
 0x54d   : > { %v3039_v14 = vpop.xlane.xlu0 %3038  ;;  %v3136_v38 = vsel %vm3000_vm5, %v7676_v55, 0.0 }
 0x54e   : > { %v3064_v13 = vsub.f32 %v7572_v37, %v3039_v14  ;;  %3137 = vadd.xlane.f32.xlu0 %v3136_v38 }
 0x550   : > { %v3093_v12 = vmul.f32 1.442695, %v3064_v13 }
 0x552   : > { %5162 = vpow2.f32 %v3093_v12 }
 0x55c   : > { %v7681_v39 = vpop.eup %5162 }
 0x55d   : > { %v3042_v61 = vpop.xlane.xlu1 %3041  ;;  %v3139_v3 = vsel %vm3000_vm5, %v7681_v39, 0.0 }
 0x55e   : > { %v3065_v9 = vsub.f32 %v7583_v60, %v3042_v61  ;;  %3140 = vadd.xlane.f32.xlu1 %v3139_v3 }
 0x560   : > { %v3095_v36 = vmul.f32 1.442695, %v3065_v9 }
 0x562   : > { %5164 = vpow2.f32 %v3095_v36 }
 0x56c   : > { %v7686_v31 = vpop.eup %5164 }
 0x56d   : > { %v3045_v57 = vpop.xlane.xlu0 %3044  ;;  %v3142_v37 = vsel %vm3000_vm5, %v7686_v31, 0.0 }
 0x56e   : > { %v3066_v40 = vsub.f32 %v7594_v49, %v3045_v57  ;;  %3143 = vadd.xlane.f32.xlu0 %v3142_v37 }
 0x570   : > { %v3097_v0 = vmul.f32 1.442695, %v3066_v40 }
 0x572   : > { %5166 = vpow2.f32 %v3097_v0 }
 0x57c   : > { %v7691_v58 = vpop.eup %5166 }
 0x57d   : > { %v3048_v4 = vpop.xlane.xlu1 %3047  ;;  %v3145_v60 = vsel %vm3000_vm5, %v7691_v58, 0.0 }
 0x57e   : > { %v3067_v28 = vsub.f32 %v7605_v24, %v3048_v4  ;;  %3146 = vadd.xlane.f32.xlu1 %v3145_v60 }
 0x580   : > { %v3099_v44 = vmul.f32 1.442695, %v3067_v28 }
 0x582   : > { %5168 = vpow2.f32 %v3099_v44 }
 0x58c   : > { %v7696_v53 = vpop.eup %5168 }
 0x58d   : > { %v3051_v32 = vpop.xlane.xlu0 %3050  ;;  %v3148_v49 = vsel %vm3000_vm5, %v7696_v53, 0.0 }
 0x58e   : > { %v3068_v18 = vsub.f32 %v7616_v23, %v3051_v32  ;;  %3149 = vadd.xlane.f32.xlu0 %v3148_v49  ;;  %v8811_v23 = vmov 1   ;;  %v8819_v49 = vld [vmem:[#allocation6_spill] sm:$0xff] }
 0x590   : > { %v3101_v63 = vmul.f32 1.442695, %v3068_v18 }
 0x592   : > { %5170 = vpow2.f32 %v3101_v63  ;;  %v8820_v63 = vld [vmem:[#allocation23_spill] sm:$0xff] }
 0x59c   : > { %v7701_v16 = vpop.eup %5170 }
 0x59d   : > { %v3151_v17 = vsel %vm3000_vm5, %v7701_v16, 0.0 }
 0x59e   : > { %3152 = vadd.xlane.f32.xlu1 %v3151_v17  ;;  %v3108_v24 = vpop.xlane.xlu0 %3107 }
 0x59f   : > { %v3105_v43 = vpop.xlane.xlu1 %3104  ;;  %5172 = vrcp.f32 %v3108_v24 }
 0x5a0   : > { %5174 = vrcp.f32 %v3105_v43 }
 0x5a3   : > { %v3111_v52 = vpop.xlane.xlu1 %3110 }
 0x5a9   : > { %v5173_v45 = vpop.eup %5172 }
 0x5aa   : > { %v5175_v30 = vpop.eup %5174  ;;  %v3172_v10 = vmul.f32 %v5173_v45, %v7628_v50  ;;  %v8814_v50 = vmov 4  }
 0x5ab   : > { %v3171_v8 = vmul.f32 %v5175_v30, %v7630_v15  ;;  %v3114_v15 = vpop.xlane.xlu0 %3113  ;;  %v8822_v30 = vld [vmem:[#allocation24_spill] sm:$0xff] }
 0x5ac   : > { %5176 = vrcp.f32 %v3114_v15 }
 0x5ad   : > { %3190 = vperm.xlu0 %4989, %v3171_v8   ;;  %5178 = vrcp.f32 %v3111_v52  ;;  %v8823_v52 = vld [vmem:[#allocation27_spill] sm:$0xff] }
 0x5af   : > { %3195 = vperm.xlu1 %4997, %v3172_v10  }
 0x5b1   : > { %4990 = vset.pattern.permute.xlu0 %v8811_v23 }
 0x5b2   : > { %3308 = vperm.xlu0 %4990, %v3171_v8  }
 0x5b3   : > { %4998 = vset.pattern.permute.xlu1 %v8811_v23 }
 0x5b4   : > { %3312 = vperm.xlu1 %4998, %v3172_v10  }
 0x5b6   : > { %4991 = vset.pattern.permute.xlu0 %v8812_v35  ;;  %v5177_v59 = vpop.eup %5176 }
 0x5b7   : > { %3410 = vperm.xlu0 %4991, %v3171_v8   ;;  %v5179_v11 = vpop.eup %5178  ;;  %v3174_v33 = vmul.f32 %v5177_v59, %v7637_v46  ;;  %v3120_v46 = vpop.xlane.xlu0 %3119 }
 0x5b8   : > { %4999 = vset.pattern.permute.xlu1 %v8812_v35  ;;  %v3173_v34 = vmul.f32 %v5179_v11, %v7639_v54  ;;  %5180 = vrcp.f32 %v3120_v46  ;;  %v3117_v54 = vpop.xlane.xlu1 %3116  ;;  %v8824_v46 = vld [vmem:[#allocation29_spill] sm:$0xff] }
 0x5b9   : > { %3414 = vperm.xlu1 %4999, %v3172_v10   ;;  %5182 = vrcp.f32 %v3117_v54 }
 0x5bb   : > { %4992 = vset.pattern.permute.xlu0 %v8813_v2 }
 0x5bc   : > { %3512 = vperm.xlu0 %4992, %v3171_v8  }
 0x5bd   : > { %5000 = vset.pattern.permute.xlu1 %v8813_v2 }
 0x5be   : > { %3516 = vperm.xlu1 %5000, %v3172_v10  }
 0x5c0   : > { %4993 = vset.pattern.permute.xlu0 %v8814_v50 }
 0x5c1   : > { %3614 = vperm.xlu0 %4993, %v3171_v8  }
 0x5c2   : > { %5001 = vset.pattern.permute.xlu1 %v8814_v50  ;;  %v5181_v20 = vpop.eup %5180 }
 0x5c3   : > { %3618 = vperm.xlu1 %5001, %v3172_v10   ;;  %v3176_v27 = vmul.f32 %v5181_v20, %v7645_v62  ;;  %v5183_v14 = vpop.eup %5182  ;;  %v3126_v62 = vpop.xlane.xlu0 %3125 }
 0x5c4   : > { %v3175_v38 = vmul.f32 %v5183_v14, %v7647_v29  ;;  %5184 = vrcp.f32 %v3126_v62  ;;  %v3123_v29 = vpop.xlane.xlu1 %3122 }
 0x5c5   : > { %4994 = vset.pattern.permute.xlu0 %v8815_v21  ;;  %5186 = vrcp.f32 %v3123_v29 }
 0x5c6   : > { %3716 = vperm.xlu0 %4994, %v3171_v8  }
 0x5c7   : > { %5002 = vset.pattern.permute.xlu1 %v8815_v21  ;;  %v3132_v3 = vpop.xlane.xlu0 %3131 }
 0x5c8   : > { %3720 = vperm.xlu1 %5002, %v3172_v10   ;;  %v7756_v61 = vpop.xlane.xlu1 %3128  ;;  %5188 = vrcp.f32 %v3132_v3  ;;  %v8826_v3 = vld [vmem:[#allocation57_spill] sm:$0xff] }
 0x5c9   : > { %5190 = vrcp.f32 %v7756_v61 }
 0x5ca   : > { %4995 = vset.pattern.permute.xlu0 %v8816_v6 }
 0x5cb   : > { %3818 = vperm.xlu0 %4995, %v3171_v8  }
 0x5cc   : > { %5003 = vset.pattern.permute.xlu1 %v8816_v6  ;;  %v7760_v9 = vpop.xlane.xlu1 %3134 }
 0x5cd   : > { %3822 = vperm.xlu1 %5003, %v3172_v10  }
 0x5ce   : > { %v5185_v13 = vpop.eup %5184 }
 0x5cf   : > { %4996 = vset.pattern.permute.xlu0 %v8817_v48  ;;  %v7753_v12 = vmul.f32 %v5185_v13, %v7653_v51  ;;  %v5187_v0 = vpop.eup %5186 }
 0x5d0   : > { %3920 = vperm.xlu0 %4996, %v3171_v8   ;;  %v7784_v28 = vmul.f32 %v5187_v0, %v7655_v41  ;;  %v8821_v41 = vld [vmem:[#allocation7_spill] sm:$0xff] }
 0x5d1   : > { %5004 = vset.pattern.permute.xlu1 %v8817_v48 }
 0x5d2   : > { %3924 = vperm.xlu1 %5004, %v3172_v10  }
 0x5d4   : > { %5014 = vset.pattern.permute.xlu0 %v8811_v23 }
 0x5d5   : > { %3320 = vperm.xlu0 %5014, %v3174_v33  }
 0x5d6   : > { %5005 = vset.pattern.permute.xlu1 %v8818_v56 }
 0x5d7   : > { %3200 = vperm.xlu1 %5005, %v3173_v34  }
 0x5d9   : > { %5015 = vset.pattern.permute.xlu0 %v8812_v35 }
 0x5da   : > { %3422 = vperm.xlu0 %5015, %v3174_v33  }
 0x5db   : > { %5006 = vset.pattern.permute.xlu1 %v8811_v23  ;;  %v7763_v36 = vpop.xlane.xlu0 %3137 }
 0x5dc   : > { %3316 = vperm.xlu1 %5006, %v3173_v34   ;;  %5192 = vrcp.f32 %v7763_v36 }
 0x5dd   : > { %5194 = vrcp.f32 %v7760_v9  ;;  %v8842_v9 = vld [vmem:[#allocation126_spill] sm:$0xff] }
 0x5de   : > { %5016 = vset.pattern.permute.xlu0 %v8813_v2 }
 0x5df   : > { %3524 = vperm.xlu0 %5016, %v3174_v33  }
 0x5e0   : > { %5007 = vset.pattern.permute.xlu1 %v8812_v35 }
 0x5e1   : > { %3418 = vperm.xlu1 %5007, %v3173_v34  }
 0x5e3   : > { %5017 = vset.pattern.permute.xlu0 %v8814_v50 }
 0x5e4   : > { %3626 = vperm.xlu0 %5017, %v3174_v33  }
 0x5e5   : > { %5008 = vset.pattern.permute.xlu1 %v8813_v2 }
 0x5e6   : > { %3520 = vperm.xlu1 %5008, %v3173_v34  }
 0x5e8   : > { %5018 = vset.pattern.permute.xlu0 %v8815_v21 }
 0x5e9   : > { %3728 = vperm.xlu0 %5018, %v3174_v33  }
 0x5ea   : > { %5009 = vset.pattern.permute.xlu1 %v8814_v50 }
 0x5eb   : > { %3622 = vperm.xlu1 %5009, %v3173_v34   ;;  %v7767_v51 = vpop.xlane.xlu1 %3140 }
 0x5ed   : > { %5019 = vset.pattern.permute.xlu0 %v8816_v6 }
 0x5ee   : > { %3830 = vperm.xlu0 %5019, %v3174_v33  }
 0x5ef   : > { %5010 = vset.pattern.permute.xlu1 %v8815_v21 }
 0x5f0   : > { %3724 = vperm.xlu1 %5010, %v3173_v34  }
 0x5f2   : > { %5020 = vset.pattern.permute.xlu0 %v8817_v48 }
 0x5f3   : > { %3932 = vperm.xlu0 %5020, %v3174_v33  }
 0x5f4   : > { %5011 = vset.pattern.permute.xlu1 %v8816_v6 }
 0x5f5   : > { %3826 = vperm.xlu1 %5011, %v3173_v34  }
 0x5f7   : > { %5029 = vset.pattern.permute.xlu0 %v8811_v23 }
 0x5f8   : > { %3328 = vperm.xlu0 %5029, %v3176_v27  }
 0x5f9   : > { %5012 = vset.pattern.permute.xlu1 %v8817_v48 }
 0x5fa   : > { %3928 = vperm.xlu1 %5012, %v3173_v34  }
 0x5fb   : > { %v7769_v57 = vpop.xlane.xlu0 %3143 }
 0x5fc   : > { %5030 = vset.pattern.permute.xlu0 %v8812_v35  ;;  %5196 = vrcp.f32 %v7769_v57  ;;  %v8846_v57 = vld [vmem:[#allocation60_spill] sm:$0xff] }
 0x5fd   : > { %3430 = vperm.xlu0 %5030, %v3176_v27   ;;  %5198 = vrcp.f32 %v7767_v51 }
 0x5fe   : > { %5013 = vset.pattern.permute.xlu1 %v8818_v56 }
 0x5ff   : > { %3205 = vperm.xlu1 %5013, %v3174_v33   ;;  %v5189_v33 = vpop.eup %5188 }
 0x600   : > { %v7804_v14 = vmul.f32 %v5189_v33, %v7666_v19 }
 0x601   : > { %5031 = vset.pattern.permute.xlu0 %v8813_v2 }
 0x602   : > { %3532 = vperm.xlu0 %5031, %v3176_v27  }
 0x603   : > { %3210 = vperm.xlu1 %5013, %v3175_v38  }
 0x606   : > { %5032 = vset.pattern.permute.xlu0 %v8814_v50 }
 0x607   : > { %3634 = vperm.xlu0 %5032, %v3176_v27   ;;  %5021 = vset.pattern.permute.xlu1 %v8811_v23 }
 0x608   : > { %3324 = vperm.xlu1 %5021, %v3175_v38  }
 0x60b   : > { %5033 = vset.pattern.permute.xlu0 %v8815_v21  ;;  %v7774_v37 = vpop.xlane.xlu1 %3146 }
 0x60c   : > { %3736 = vperm.xlu0 %5033, %v3176_v27   ;;  %5022 = vset.pattern.permute.xlu1 %v8812_v35 }
 0x60d   : > { %3426 = vperm.xlu1 %5022, %v3175_v38  }
 0x610   : > { %5034 = vset.pattern.permute.xlu0 %v8816_v6 }
 0x611   : > { %3838 = vperm.xlu0 %5034, %v3176_v27   ;;  %5023 = vset.pattern.permute.xlu1 %v8813_v2 }
 0x612   : > { %3528 = vperm.xlu1 %5023, %v3175_v38  }
 0x615   : > { %5035 = vset.pattern.permute.xlu0 %v8817_v48 }
 0x616   : > { %3940 = vperm.xlu0 %5035, %v3176_v27   ;;  %5024 = vset.pattern.permute.xlu1 %v8814_v50 }
 0x617   : > { %3630 = vperm.xlu1 %5024, %v3175_v38  }
 0x61a   : > { %5044 = vset.pattern.permute.xlu0 %v8811_v23 }
 0x61b   : > { %3336 = vperm.xlu0 %5044, %v7753_v12   ;;  %5025 = vset.pattern.permute.xlu1 %v8815_v21  ;;  %v7776_v40 = vpop.xlane.xlu0 %3149 }
 0x61c   : > { %3732 = vperm.xlu1 %5025, %v3175_v38   ;;  %5200 = vrcp.f32 %v7776_v40  ;;  %v8861_v40 = vld [vmem:[#allocation37_spill] sm:$0xff] }
 0x61d   : > { %5202 = vrcp.f32 %v7774_v37 }
 0x61f   : > { %5045 = vset.pattern.permute.xlu0 %v8812_v35 }
 0x620   : > { %3438 = vperm.xlu0 %5045, %v7753_v12   ;;  %5026 = vset.pattern.permute.xlu1 %v8816_v6 }
 0x621   : > { %3834 = vperm.xlu1 %5026, %v3175_v38  }
 0x624   : > { %5046 = vset.pattern.permute.xlu0 %v8813_v2 }
 0x625   : > { %3540 = vperm.xlu0 %5046, %v7753_v12   ;;  %5027 = vset.pattern.permute.xlu1 %v8817_v48 }
 0x626   : > { %3936 = vperm.xlu1 %5027, %v3175_v38   ;;  %v8825_v38 = vld [vmem:[#allocation56_spill] sm:$0xff] }
 0x629   : > { %5047 = vset.pattern.permute.xlu0 %v8814_v50 }
 0x62a   : > { %3642 = vperm.xlu0 %5047, %v7753_v12   ;;  %5028 = vset.pattern.permute.xlu1 %v8818_v56 }
 0x62b   : > { %v7781_v4 = vpop.xlane.xlu1 %3152  ;;  %3215 = vperm.xlu1 %5028, %v3176_v27  }
 0x62c   : > { %v3191_v60 = vpop.permute.xlu0 %3190  ;;  %5204 = vrcp.f32 %v7781_v4 }
 0x62d   : > { %v3273_v18 = vmul.f32 %v3191_v60, %v8819_v49 }
 0x62e   : > { %5048 = vset.pattern.permute.xlu0 %v8815_v21 }
 0x62f   : > { %3744 = vperm.xlu0 %5048, %v7753_v12   ;;  %v3196_v44 = vpop.permute.xlu1 %3195  ;;  %3220 = vperm.xlu1 %5028, %v7784_v28  }
 0x630   : > { %v3274_v43 = vmul.f32 %v3196_v44, %v8821_v41 }
 0x631   : > { %v3309_v32 = vpop.permute.xlu0 %3308 }
 0x632   : > { %v3375_v17 = vmul.f32 %v3309_v32, %v8820_v63  ;;  %v8827_v32 = vld [vmem:[#allocation62_spill] sm:$0xff]  ;;  %v8828_v63 = vld [vmem:[#allocation64_spill] sm:$0xff] }
 0x633   : > { %5049 = vset.pattern.permute.xlu0 %v8816_v6  ;;  %v3313_v24 = vpop.permute.xlu1 %3312  ;;  %5036 = vset.pattern.permute.xlu1 %v8811_v23 }
 0x634   : > { %v3392_v45 = vadd.f32 %v3375_v17, %v3273_v18  ;;  %v3376_v8 = vmul.f32 %v3313_v24, %v8822_v30  ;;  %3846 = vperm.xlu0 %5049, %v7753_v12   ;;  %3332 = vperm.xlu1 %5036, %v7784_v28  }
 0x636   : > { %v3393_v10 = vadd.f32 %v3376_v8, %v3274_v43  ;;  %v3411_v15 = vpop.permute.xlu0 %3410  ;;  %v8829_v43 = vld [vmem:[#allocation89_spill] sm:$0xff] }
 0x637   : > { %v3477_v59 = vmul.f32 %v3411_v15, %v8823_v52 }
 0x638   : > { %5050 = vset.pattern.permute.xlu0 %v8817_v48  ;;  %v3415_v11 = vpop.permute.xlu1 %3414  ;;  %5037 = vset.pattern.permute.xlu1 %v8812_v35 }
 0x639   : > { %v3494_v34 = vadd.f32 %v3477_v59, %v3392_v45  ;;  %v3478_v54 = vmul.f32 %v3415_v11, %v8824_v46  ;;  %3948 = vperm.xlu0 %5050, %v7753_v12   ;;  %3434 = vperm.xlu1 %5037, %v7784_v28   ;;  %v8831_v11 = vld [vmem:[#allocation97_spill] sm:$0xff] }
 0x63b   : > { %v3495_v20 = vadd.f32 %v3478_v54, %v3393_v10  ;;  %v3513_v27 = vpop.permute.xlu0 %3512  ;;  %v8830_v10 = vld [vmem:[#allocation91_spill] sm:$0xff]  ;;  %v8832_v54 = vld [vmem:[#allocation98_spill] sm:$0xff] }
 0x63c   : > { %v3579_v62 = vmul.f32 %v3513_v27, %v8825_v38 }
 0x63d   : > { %5058 = vset.pattern.permute.xlu0 %v8818_v56  ;;  %v3517_v29 = vpop.permute.xlu1 %3516  ;;  %5038 = vset.pattern.permute.xlu1 %v8813_v2 }
 0x63e   : > { %v3596_v13 = vadd.f32 %v3579_v62, %v3494_v34  ;;  %v3580_v0 = vmul.f32 %v3517_v29, %v8826_v3  ;;  %3235 = vperm.xlu0 %5058, %v7804_v14   ;;  %3536 = vperm.xlu1 %5038, %v7784_v28   ;;  %v8833_v62 = vld [vmem:[#allocation122_spill] sm:$0xff]  ;;  %v8834_v3 = vld [vmem:[#allocation124_spill] sm:$0xff] }
 0x640   : > { %v3597_v60 = vadd.f32 %v3580_v0, %v3495_v20  ;;  %v3615_v44 = vpop.permute.xlu0 %3614 }
 0x641   : > { %v3681_v49 = vmul.f32 %v3615_v44, %v8827_v32  ;;  %v5191_v32 = vpop.eup %5190 }
 0x642   : > { %5059 = vset.pattern.permute.xlu0 %v8811_v23  ;;  %v3619_v19 = vpop.permute.xlu1 %3618  ;;  %5039 = vset.pattern.permute.xlu1 %v8814_v50 }
 0x643   : > { %v3698_v18 = vadd.f32 %v3681_v49, %v3596_v13  ;;  %v3682_v17 = vmul.f32 %v3619_v19, %v8828_v63  ;;  %3344 = vperm.xlu0 %5059, %v7804_v14   ;;  %3638 = vperm.xlu1 %5039, %v7784_v28   ;;  %v8835_v63 = vld [vmem:[#allocation8_spill] sm:$0xff] }
 0x645   : > { %v3699_v24 = vadd.f32 %v3682_v17, %v3597_v60  ;;  %v3717_v41 = vpop.permute.xlu0 %3716 }
 0x646   : > { %v3783_v45 = vmul.f32 %v3717_v41, %v8829_v43 }
 0x647   : > { %5060 = vset.pattern.permute.xlu0 %v8812_v35  ;;  %v3721_v30 = vpop.permute.xlu1 %3720  ;;  %5040 = vset.pattern.permute.xlu1 %v8815_v21 }
 0x648   : > { %v3800_v8 = vadd.f32 %v3783_v45, %v3698_v18  ;;  %v3784_v15 = vmul.f32 %v3721_v30, %v8830_v10  ;;  %3446 = vperm.xlu0 %5060, %v7804_v14   ;;  %3740 = vperm.xlu1 %5040, %v7784_v28   ;;  %v8837_v45 = vld [vmem:[#allocation31_spill] sm:$0xff] }
 0x64a   : > { %v3801_v52 = vadd.f32 %v3784_v15, %v3699_v24  ;;  %v3819_v59 = vpop.permute.xlu0 %3818  ;;  %v8836_v24 = vld [vmem:[#allocation25_spill] sm:$0xff] }
 0x64b   : > { %v3885_v33 = vmul.f32 %v3819_v59, %v8831_v11  ;;  %v8838_v59 = vld [vmem:[#allocation59_spill] sm:$0xff] }
 0x64c   : > { %5061 = vset.pattern.permute.xlu0 %v8813_v2  ;;  %v3823_v34 = vpop.permute.xlu1 %3822  ;;  %5041 = vset.pattern.permute.xlu1 %v8816_v6 }
 0x64d   : > { %v3902_v46 = vadd.f32 %v3885_v33, %v3800_v8  ;;  %v3886_v20 = vmul.f32 %v3823_v34, %v8832_v54  ;;  %3548 = vperm.xlu0 %5061, %v7804_v14   ;;  %3842 = vperm.xlu1 %5041, %v7784_v28  }
 0x64f   : > { %v3903_v27 = vadd.f32 %v3886_v20, %v3801_v52  ;;  %v3921_v38 = vpop.permute.xlu0 %3920 }
 0x650   : > { %v3987_v29 = vmul.f32 %v3921_v38, %v8833_v62  ;;  %v8840_v38 = vld [vmem:[#allocation93_spill] sm:$0xff] }
 0x651   : > { %5062 = vset.pattern.permute.xlu0 %v8814_v50  ;;  %v3925_v61 = vpop.permute.xlu1 %3924  ;;  %5042 = vset.pattern.permute.xlu1 %v8817_v48 }
 0x652   : > { %v4004_v13 = vadd.f32 %v3987_v29, %v3902_v46  ;;  %v3988_v0 = vmul.f32 %v3925_v61, %v8834_v3  ;;  %3650 = vperm.xlu0 %5062, %v7804_v14   ;;  %3944 = vperm.xlu1 %5042, %v7784_v28   ;;  %v7852_v28 = vmul.f32 %v5191_v32, %v7662_v42  ;;  %v8841_v3 = vld [vmem:[#allocation101_spill] sm:$0xff] }
 0x654   : > { %4021 = vst [vmem:[%s7840_s25] sm:$0xff] %v4004_v13  ;;  %v4005_v60 = vadd.f32 %v3988_v0, %v3903_v27  ;;  %v7843_v44 = vpop.permute.xlu0 %3320 }
 0x656   : > { %4022 = vst [vmem:[%s7840_s25 + $0x8] sm:$0xff] %v4005_v60  ;;  %5063 = vset.pattern.permute.xlu0 %v8815_v21  ;;  %v3201_v49 = vpop.permute.xlu1 %3200  ;;  %5043 = vset.pattern.permute.xlu1 %v8818_v56 }
 0x657   : > { %3752 = vperm.xlu0 %5063, %v7804_v14   ;;  %3225 = vperm.xlu1 %5043, %v7753_v12   ;;  %v3275_v17 = vmul.f32 %v3201_v49, %v8835_v63  ;;  %v5193_v12 = vpop.eup %5192 }
 0x658   : > { %v7871_v15 = vmul.f32 %v5193_v12, %v7676_v55  ;;  %v8839_v55 = vld [vmem:[#allocation66_spill] sm:$0xff]  ;;  %v8844_v12 = vld [vmem:[#allocation9_spill] sm:$0xff] }
 0x659   : > { %v7854_v19 = vpop.permute.xlu0 %3422 }
 0x65b   : > { %5064 = vset.pattern.permute.xlu0 %v8816_v6  ;;  %v3317_v18 = vpop.permute.xlu1 %3316  ;;  %3230 = vperm.xlu1 %5043, %v7852_v28  }
 0x65c   : > { %v3377_v41 = vmul.f32 %v3317_v18, %v8836_v24  ;;  %3854 = vperm.xlu0 %5064, %v7804_v14   ;;  %v5195_v24 = vpop.eup %5194 }
 0x65e   : > { %v3394_v36 = vadd.f32 %v3377_v41, %v3275_v17  ;;  %v7861_v43 = vpop.permute.xlu0 %3524 }
 0x65f   : > { %5051 = vset.pattern.permute.xlu1 %v8811_v23 }
 0x660   : > { %5065 = vset.pattern.permute.xlu0 %v8817_v48  ;;  %v3419_v42 = vpop.permute.xlu1 %3418  ;;  %3340 = vperm.xlu1 %5051, %v7852_v28  }
 0x661   : > { %v3479_v30 = vmul.f32 %v3419_v42, %v8837_v45  ;;  %3956 = vperm.xlu0 %5065, %v7804_v14  }
 0x663   : > { %v3496_v8 = vadd.f32 %v3479_v30, %v3394_v36  ;;  %v7868_v10 = vpop.permute.xlu0 %3626  ;;  %v8843_v36 = vld [vmem:[#allocation26_spill] sm:$0xff]  ;;  %v7913_v30 = vmul.f32 %v5195_v24, %v7671_v1  ;;  %v8847_v1 = vld [vmem:[#allocation68_spill] sm:$0xff] }
 0x664   : > { %5052 = vset.pattern.permute.xlu1 %v8812_v35  ;;  %v3378_v42 = vmul.f32 %v7843_v44, %v8843_v36 }
 0x665   : > { %5074 = vset.pattern.permute.xlu0 %v8818_v56  ;;  %v3521_v52 = vpop.permute.xlu1 %3520  ;;  %3442 = vperm.xlu1 %5052, %v7852_v28  }
 0x666   : > { %v3581_v11 = vmul.f32 %v3521_v52, %v8838_v59  ;;  %3245 = vperm.xlu0 %5074, %v7871_v15  }
 0x668   : > { %v3598_v33 = vadd.f32 %v3581_v11, %v3496_v8  ;;  %v3729_v34 = vpop.permute.xlu0 %3728  ;;  %v8845_v8 = vld [vmem:[#allocation33_spill] sm:$0xff] }
 0x669   : > { %5053 = vset.pattern.permute.xlu1 %v8813_v2  ;;  %v3480_v52 = vmul.f32 %v7854_v19, %v8845_v8 }
 0x66a   : > { %5075 = vset.pattern.permute.xlu0 %v8811_v23  ;;  %v3623_v14 = vpop.permute.xlu1 %3622  ;;  %3544 = vperm.xlu1 %5053, %v7852_v28  }
 0x66b   : > { %v3683_v46 = vmul.f32 %v3623_v14, %v8839_v55  ;;  %3352 = vperm.xlu0 %5075, %v7871_v15   ;;  %v3684_v14 = vmul.f32 %v7868_v10, %v8847_v1 }
 0x66d   : > { %v3700_v54 = vadd.f32 %v3683_v46, %v3598_v33  ;;  %v3831_v20 = vpop.permute.xlu0 %3830  ;;  %v8848_v46 = vld [vmem:[#allocation94_spill] sm:$0xff] }
 0x66e   : > { %5054 = vset.pattern.permute.xlu1 %v8814_v50 }
 0x66f   : > { %5076 = vset.pattern.permute.xlu0 %v8812_v35  ;;  %v3725_v27 = vpop.permute.xlu1 %3724  ;;  %3646 = vperm.xlu1 %5054, %v7852_v28  }
 0x670   : > { %v3785_v62 = vmul.f32 %v3725_v27, %v8840_v38  ;;  %3454 = vperm.xlu0 %5076, %v7871_v15  }
 0x672   : > { %v3802_v29 = vadd.f32 %v3785_v62, %v3700_v54  ;;  %v3933_v61 = vpop.permute.xlu0 %3932  ;;  %v3786_v54 = vmul.f32 %v3729_v34, %v8848_v46 }
 0x673   : > { %5055 = vset.pattern.permute.xlu1 %v8815_v21 }
 0x674   : > { %5077 = vset.pattern.permute.xlu0 %v8813_v2  ;;  %v3827_v13 = vpop.permute.xlu1 %3826  ;;  %3748 = vperm.xlu1 %5055, %v7852_v28  }
 0x675   : > { %v3887_v0 = vmul.f32 %v3827_v13, %v8841_v3  ;;  %3556 = vperm.xlu0 %5077, %v7871_v15   ;;  %v5197_v3 = vpop.eup %5196 }
 0x676   : > { %v7941_v24 = vmul.f32 %v5197_v3, %v7686_v31  ;;  %v8854_v31 = vld [vmem:[#allocation61_spill] sm:$0xff]  ;;  %v8858_v3 = vld [vmem:[#allocation128_spill] sm:$0xff] }
 0x677   : > { %v3904_v60 = vadd.f32 %v3887_v0, %v3802_v29  ;;  %v7894_v32 = vpop.permute.xlu0 %3328  ;;  %v8850_v29 = vld [vmem:[#allocation28_spill] sm:$0xff]  ;;  %v8851_v0 = vld [vmem:[#allocation102_spill] sm:$0xff] }
 0x678   : > { %5056 = vset.pattern.permute.xlu1 %v8816_v6  ;;  %v3888_v10 = vmul.f32 %v3831_v20, %v8851_v0 }
 0x679   : > { %5078 = vset.pattern.permute.xlu0 %v8814_v50  ;;  %v3929_v49 = vpop.permute.xlu1 %3928  ;;  %3850 = vperm.xlu1 %5056, %v7852_v28  }
 0x67a   : > { %v3989_v18 = vmul.f32 %v3929_v49, %v8842_v9  ;;  %3658 = vperm.xlu0 %5078, %v7871_v15   ;;  %v8852_v49 = vld [vmem:[#allocation127_spill] sm:$0xff] }
 0x67b   : > { %v3990_v9 = vmul.f32 %v3933_v61, %v8852_v49 }
 0x67c   : > { %v4006_v63 = vadd.f32 %v3989_v18, %v3904_v60  ;;  %v7901_v17 = vpop.permute.xlu0 %3430 }
 0x67d   : > { %5057 = vset.pattern.permute.xlu1 %v8817_v48 }
 0x67e   : > { %4023 = vst [vmem:[%s7840_s25 + $0x10] sm:$0xff] %v4006_v63  ;;  %5079 = vset.pattern.permute.xlu0 %v8815_v21  ;;  %v3206_v41 = vpop.permute.xlu1 %3205  ;;  %3952 = vperm.xlu1 %5057, %v7852_v28   ;;  %v3582_v28 = vmul.f32 %v7861_v43, %v8846_v57  ;;  %v8849_v43 = vld [vmem:[#allocation12_spill] sm:$0xff] }
 0x67f   : > { %v3276_v45 = vmul.f32 %v3206_v41, %v8844_v12  ;;  %3760 = vperm.xlu0 %5079, %v7871_v15  }
 0x681   : > { %v3395_v59 = vadd.f32 %v3378_v42, %v3276_v45  ;;  %v7917_v11 = vpop.permute.xlu0 %3532  ;;  %v8853_v42 = vld [vmem:[#allocation35_spill] sm:$0xff] }
 0x682   : > { %v3211_v33 = vpop.permute.xlu1 %3210  ;;  %5066 = vset.pattern.permute.xlu1 %v8818_v56 }
 0x683   : > { %v3497_v44 = vadd.f32 %v3480_v52, %v3395_v59  ;;  %5080 = vset.pattern.permute.xlu0 %v8816_v6  ;;  %3240 = vperm.xlu1 %5066, %v7913_v30   ;;  %v3277_v62 = vmul.f32 %v3211_v33, %v8849_v43  ;;  %v8855_v33 = vld [vmem:[#allocation70_spill] sm:$0xff] }
 0x684   : > { %3862 = vperm.xlu0 %5080, %v7871_v15  }
 0x685   : > { %v3599_v19 = vadd.f32 %v3582_v28, %v3497_v44 }
 0x686   : > { %v7927_v55 = vpop.permute.xlu0 %3634 }
 0x687   : > { %v3701_v27 = vadd.f32 %v3684_v14, %v3599_v19  ;;  %v3325_v38 = vpop.permute.xlu1 %3324  ;;  %5067 = vset.pattern.permute.xlu1 %v8811_v23  ;;  %v8856_v14 = vld [vmem:[#allocation95_spill] sm:$0xff] }
 0x688   : > { %v3379_v13 = vmul.f32 %v3325_v38, %v8850_v29  ;;  %5081 = vset.pattern.permute.xlu0 %v8817_v48  ;;  %3348 = vperm.xlu1 %5067, %v7913_v30   ;;  %v8857_v38 = vld [vmem:[#allocation105_spill] sm:$0xff] }
 0x689   : > { %v3803_v60 = vadd.f32 %v3786_v54, %v3701_v27  ;;  %3964 = vperm.xlu0 %5081, %v7871_v15  }
 0x68a   : > { %v3396_v34 = vadd.f32 %v3379_v13, %v3277_v62  ;;  %v5199_v13 = vpop.eup %5198 }
 0x68b   : > { %v3905_v18 = vadd.f32 %v3888_v10, %v3803_v60  ;;  %v7938_v63 = vpop.permute.xlu0 %3736  ;;  %v7987_v60 = vmul.f32 %v5199_v13, %v7681_v39  ;;  %v3482_v39 = vmul.f32 %v7901_v17, %v8861_v40  ;;  %v8864_v17 = vld [vmem:[#allocation96_spill] sm:$0xff] }
 0x68c   : > { %v3427_v41 = vpop.permute.xlu1 %3426  ;;  %5068 = vset.pattern.permute.xlu1 %v8812_v35 }
 0x68d   : > { %v4007_v36 = vadd.f32 %v3990_v9, %v3905_v18  ;;  %v3481_v12 = vmul.f32 %v3427_v41, %v8853_v42  ;;  %5090 = vset.pattern.permute.xlu0 %v8818_v56  ;;  %3450 = vperm.xlu1 %5068, %v7913_v30   ;;  %v8859_v9 = vld [vmem:[#allocation30_spill] sm:$0xff]  ;;  %v8860_v41 = vld [vmem:[#allocation13_spill] sm:$0xff] }
 0x68e   : > { %3255 = vperm.xlu0 %5090, %v7941_v24   ;;  %v3380_v18 = vmul.f32 %v7894_v32, %v8859_v9  ;;  %v5201_v32 = vpop.eup %5200 }
 0x68f   : > { %4024 = vst [vmem:[%s7840_s25 + $0x18] sm:$0xff] %v4007_v36  ;;  %v3498_v15 = vadd.f32 %v3481_v12, %v3396_v34 }
 0x690   : > { %v7949_v20 = vpop.permute.xlu0 %3838 }
 0x691   : > { %v3529_v61 = vpop.permute.xlu1 %3528  ;;  %5069 = vset.pattern.permute.xlu1 %v8813_v2 }
 0x692   : > { %v3583_v45 = vmul.f32 %v3529_v61, %v8854_v31  ;;  %5091 = vset.pattern.permute.xlu0 %v8811_v23  ;;  %3552 = vperm.xlu1 %5069, %v7913_v30  }
 0x693   : > { %3360 = vperm.xlu0 %5091, %v7941_v24  }
 0x694   : > { %v3600_v8 = vadd.f32 %v3583_v45, %v3498_v15  ;;  %v8862_v15 = vld [vmem:[#allocation63_spill] sm:$0xff]  ;;  %v8863_v45 = vld [vmem:[#allocation72_spill] sm:$0xff] }
 0x695   : > { %v7956_v52 = vpop.permute.xlu0 %3940  ;;  %v3584_v61 = vmul.f32 %v7917_v11, %v8862_v15 }
 0x696   : > { %v3631_v59 = vpop.permute.xlu1 %3630  ;;  %5070 = vset.pattern.permute.xlu1 %v8814_v50 }
 0x697   : > { %v3685_v57 = vmul.f32 %v3631_v59, %v8855_v33  ;;  %5092 = vset.pattern.permute.xlu0 %v8812_v35  ;;  %3654 = vperm.xlu1 %5070, %v7913_v30   ;;  %v3788_v33 = vmul.f32 %v7938_v63, %v8864_v17  ;;  %v8874_v17 = vld [vmem:[#allocation45_spill] sm:$0xff] }
 0x698   : > { %3462 = vperm.xlu0 %5092, %v7941_v24  }
 0x699   : > { %v3702_v28 = vadd.f32 %v3685_v57, %v3600_v8  ;;  %v3686_v8 = vmul.f32 %v7927_v55, %v8863_v45  ;;  %v8867_v55 = vld [vmem:[#allocation106_spill] sm:$0xff] }
 0x69a   : > { %v7963_v44 = vpop.permute.xlu0 %3336 }
 0x69b   : > { %v3733_v1 = vpop.permute.xlu1 %3732  ;;  %5071 = vset.pattern.permute.xlu1 %v8815_v21 }
 0x69c   : > { %v3787_v19 = vmul.f32 %v3733_v1, %v8856_v14  ;;  %5093 = vset.pattern.permute.xlu0 %v8813_v2  ;;  %3756 = vperm.xlu1 %5071, %v7913_v30   ;;  %v8016_v1 = vmul.f32 %v5201_v32, %v7696_v53  ;;  %v8865_v14 = vld [vmem:[#allocation16_spill] sm:$0xff]  ;;  %v8868_v53 = vld [vmem:[#allocation129_spill] sm:$0xff] }
 0x69d   : > { %3564 = vperm.xlu0 %5093, %v7941_v24  }
 0x69e   : > { %v3804_v46 = vadd.f32 %v3787_v19, %v3702_v28 }
 0x69f   : > { %v7971_v54 = vpop.permute.xlu0 %3438 }
 0x6a0   : > { %v3835_v27 = vpop.permute.xlu1 %3834  ;;  %5072 = vset.pattern.permute.xlu1 %v8816_v6 }
 0x6a1   : > { %v3889_v43 = vmul.f32 %v3835_v27, %v8857_v38  ;;  %5094 = vset.pattern.permute.xlu0 %v8814_v50  ;;  %3858 = vperm.xlu1 %5072, %v7913_v30  }
 0x6a2   : > { %3666 = vperm.xlu0 %5094, %v7941_v24  }
 0x6a3   : > { %v3906_v51 = vadd.f32 %v3889_v43, %v3804_v46  ;;  %v8866_v46 = vld [vmem:[#allocation32_spill] sm:$0xff]  ;;  %v3992_v43 = vmul.f32 %v7956_v52, %v8868_v53  ;;  %v8870_v52 = vld [vmem:[#allocation65_spill] sm:$0xff] }
 0x6a4   : > { %v7978_v62 = vpop.permute.xlu0 %3540 }
 0x6a5   : > { %v3937_v29 = vpop.permute.xlu1 %3936  ;;  %5073 = vset.pattern.permute.xlu1 %v8817_v48 }
 0x6a6   : > { %v3991_v0 = vmul.f32 %v3937_v29, %v8858_v3  ;;  %5095 = vset.pattern.permute.xlu0 %v8815_v21  ;;  %3960 = vperm.xlu1 %5073, %v7913_v30  }
 0x6a7   : > { %3768 = vperm.xlu0 %5095, %v7941_v24  }
 0x6a8   : > { %v4008_v10 = vadd.f32 %v3991_v0, %v3906_v51  ;;  %v8869_v0 = vld [vmem:[#allocation39_spill] sm:$0xff] }
 0x6a9   : > { %v7989_v34 = vpop.permute.xlu0 %3642 }
 0x6aa   : > { %4025 = vst [vmem:[%s7840_s25 + $0x20] sm:$0xff] %v4008_v10  ;;  %v3216_v49 = vpop.permute.xlu1 %3215  ;;  %5082 = vset.pattern.permute.xlu1 %v8818_v56 }
 0x6ab   : > { %v3278_v36 = vmul.f32 %v3216_v49, %v8860_v41  ;;  %5096 = vset.pattern.permute.xlu0 %v8816_v6  ;;  %3250 = vperm.xlu1 %5082, %v7987_v60  }
 0x6ac   : > { %3870 = vperm.xlu0 %5096, %v7941_v24  }
 0x6ad   : > { %v3397_v30 = vadd.f32 %v3380_v18, %v3278_v36 }
 0x6ae   : > { %v8001_v42 = vpop.permute.xlu0 %3744  ;;  %v3221_v12 = vpop.permute.xlu1 %3220 }
 0x6af   : > { %v3499_v31 = vadd.f32 %v3482_v39, %v3397_v30  ;;  %5083 = vset.pattern.permute.xlu1 %v8811_v23  ;;  %v3279_v19 = vmul.f32 %v3221_v12, %v8865_v14  ;;  %v8871_v39 = vld [vmem:[#allocation11_spill] sm:$0xff]  ;;  %v8872_v12 = vld [vmem:[#allocation38_spill] sm:$0xff] }
 0x6b0   : > { %5097 = vset.pattern.permute.xlu0 %v8817_v48  ;;  %3356 = vperm.xlu1 %5083, %v7987_v60  }
 0x6b1   : > { %v3601_v59 = vadd.f32 %v3584_v61, %v3499_v31  ;;  %3972 = vperm.xlu0 %5097, %v7941_v24   ;;  %v3890_v24 = vmul.f32 %v7949_v20, %v8867_v55  ;;  %v8873_v61 = vld [vmem:[#allocation74_spill] sm:$0xff] }
 0x6b3   : > { %v3703_v57 = vadd.f32 %v3686_v8, %v3601_v59  ;;  %v8013_v28 = vpop.permute.xlu0 %3846  ;;  %v3333_v11 = vpop.permute.xlu1 %3332 }
 0x6b4   : > { %v3381_v27 = vmul.f32 %v3333_v11, %v8866_v46  ;;  %5084 = vset.pattern.permute.xlu1 %v8812_v35 }
 0x6b5   : > { %v3805_v38 = vadd.f32 %v3788_v33, %v3703_v57  ;;  %5106 = vset.pattern.permute.xlu0 %v8818_v56  ;;  %3458 = vperm.xlu1 %5084, %v7987_v60   ;;  %v8875_v57 = vld [vmem:[#allocation99_spill] sm:$0xff] }
 0x6b6   : > { %v3398_v63 = vadd.f32 %v3381_v27, %v3279_v19  ;;  %3265 = vperm.xlu0 %5106, %v8016_v1   ;;  %v8876_v27 = vld [vmem:[#allocation71_spill] sm:$0xff] }
 0x6b7   : > { %v3907_v51 = vadd.f32 %v3890_v24, %v3805_v38  ;;  %v8877_v24 = vld [vmem:[#allocation109_spill] sm:$0xff] }
 0x6b8   : > { %v8028_v29 = vpop.permute.xlu0 %3948  ;;  %v3435_v13 = vpop.permute.xlu1 %3434 }
 0x6b9   : > { %v4009_v3 = vadd.f32 %v3992_v43, %v3907_v51  ;;  %v3483_v10 = vmul.f32 %v3435_v13, %v8869_v0  ;;  %5085 = vset.pattern.permute.xlu1 %v8813_v2  ;;  %v8878_v0 = vld [vmem:[#allocation80_spill] sm:$0xff] }
 0x6ba   : > { %5107 = vset.pattern.permute.xlu0 %v8811_v23  ;;  %3560 = vperm.xlu1 %5085, %v7987_v60  }
 0x6bb   : > { %4026 = vst [vmem:[%s7840_s25 + $0x28] sm:$0xff] %v4009_v3  ;;  %v3500_v20 = vadd.f32 %v3483_v10, %v3398_v63  ;;  %3368 = vperm.xlu0 %5107, %v8016_v1   ;;  %v5203_v63 = vpop.eup %5202 }
 0x6bc   : > { %v8062_v51 = vmul.f32 %v5203_v63, %v7691_v58  ;;  %v8890_v63 = vld [vmem:[#allocation110_spill] sm:$0xff] }
 0x6bd   : > { %v3236_v49 = vpop.permute.xlu0 %3235  ;;  %v3537_v9 = vpop.permute.xlu1 %3536 }
 0x6be   : > { %v3585_v18 = vmul.f32 %v3537_v9, %v8870_v52  ;;  %5086 = vset.pattern.permute.xlu1 %v8814_v50  ;;  %v3282_v30 = vmul.f32 %v3236_v49, %v8871_v39  ;;  %v8882_v39 = vld [vmem:[#allocation17_spill] sm:$0xff] }
 0x6bf   : > { %5108 = vset.pattern.permute.xlu0 %v8812_v35  ;;  %3662 = vperm.xlu1 %5086, %v7987_v60  }
 0x6c0   : > { %v3602_v41 = vadd.f32 %v3585_v18, %v3500_v20  ;;  %3470 = vperm.xlu0 %5108, %v8016_v1   ;;  %v8879_v20 = vld [vmem:[#allocation130_spill] sm:$0xff] }
 0x6c1   : > { %v8880_v18 = vld [vmem:[#allocation34_spill] sm:$0xff] }
 0x6c2   : > { %v3345_v36 = vpop.permute.xlu0 %3344  ;;  %v3639_v40 = vpop.permute.xlu1 %3638 }
 0x6c3   : > { %v3384_v15 = vmul.f32 %v3345_v36, %v8872_v12  ;;  %v3687_v31 = vmul.f32 %v3639_v40, %v8873_v61  ;;  %5087 = vset.pattern.permute.xlu1 %v8815_v21  ;;  %v8881_v36 = vld [vmem:[#allocation104_spill] sm:$0xff]  ;;  %v8883_v12 = vld [vmem:[#allocation41_spill] sm:$0xff] }
 0x6c4   : > { %5109 = vset.pattern.permute.xlu0 %v8813_v2  ;;  %3764 = vperm.xlu1 %5087, %v7987_v60  }
 0x6c5   : > { %v3401_v32 = vadd.f32 %v3384_v15, %v3282_v30  ;;  %v3704_v45 = vadd.f32 %v3687_v31, %v3602_v41  ;;  %3572 = vperm.xlu0 %5109, %v8016_v1   ;;  %v3382_v41 = vmul.f32 %v7963_v44, %v8880_v18  ;;  %v3484_v15 = vmul.f32 %v7971_v54, %v8883_v12 }
 0x6c7   : > { %v3447_v8 = vpop.permute.xlu0 %3446  ;;  %v3741_v59 = vpop.permute.xlu1 %3740 }
 0x6c8   : > { %v3486_v33 = vmul.f32 %v3447_v8, %v8874_v17  ;;  %v3789_v11 = vmul.f32 %v3741_v59, %v8875_v57  ;;  %5088 = vset.pattern.permute.xlu1 %v8816_v6  ;;  %v8885_v17 = vld [vmem:[#allocation114_spill] sm:$0xff]  ;;  %v8886_v57 = vld [vmem:[#allocation76_spill] sm:$0xff] }
 0x6c9   : > { %5110 = vset.pattern.permute.xlu0 %v8814_v50  ;;  %3866 = vperm.xlu1 %5088, %v7987_v60  }
 0x6ca   : > { %v3503_v37 = vadd.f32 %v3486_v33, %v3401_v32  ;;  %v3806_v14 = vadd.f32 %v3789_v11, %v3704_v45  ;;  %3674 = vperm.xlu0 %5110, %v8016_v1   ;;  %v8884_v45 = vld [vmem:[#allocation67_spill] sm:$0xff]  ;;  %v3688_v11 = vmul.f32 %v7989_v34, %v8886_v57 }
 0x6cb   : > { %v3586_v44 = vmul.f32 %v7978_v62, %v8884_v45  ;;  %v8888_v62 = vld [vmem:[#allocation10_spill] sm:$0xff] }
 0x6cc   : > { %v3549_v19 = vpop.permute.xlu0 %3548  ;;  %v3843_v46 = vpop.permute.xlu1 %3842 }
 0x6cd   : > { %v3588_v55 = vmul.f32 %v3549_v19, %v8876_v27  ;;  %v3891_v38 = vmul.f32 %v3843_v46, %v8877_v24  ;;  %5089 = vset.pattern.permute.xlu1 %v8817_v48 }
 0x6ce   : > { %5111 = vset.pattern.permute.xlu0 %v8815_v21  ;;  %3968 = vperm.xlu1 %5089, %v7987_v60  }
 0x6cf   : > { %v3605_v53 = vadd.f32 %v3588_v55, %v3503_v37  ;;  %v3908_v43 = vadd.f32 %v3891_v38, %v3806_v14  ;;  %3776 = vperm.xlu0 %5111, %v8016_v1   ;;  %v8887_v14 = vld [vmem:[#allocation100_spill] sm:$0xff] }
 0x6d0   : > { %v8889_v55 = vld [vmem:[#allocation36_spill] sm:$0xff] }
 0x6d1   : > { %v3651_v13 = vpop.permute.xlu0 %3650  ;;  %v3945_v3 = vpop.permute.xlu1 %3944 }
 0x6d2   : > { %v3690_v10 = vmul.f32 %v3651_v13, %v8878_v0  ;;  %v3993_v49 = vmul.f32 %v3945_v3, %v8879_v20  ;;  %5098 = vset.pattern.permute.xlu1 %v8818_v56 }
 0x6d3   : > { %5112 = vset.pattern.permute.xlu0 %v8816_v6  ;;  %3260 = vperm.xlu1 %5098, %v8062_v51  }
 0x6d4   : > { %v3707_v60 = vadd.f32 %v3690_v10, %v3605_v53  ;;  %v4010_v9 = vadd.f32 %v3993_v49, %v3908_v43  ;;  %3878 = vperm.xlu0 %5112, %v8016_v1   ;;  %v3892_v53 = vmul.f32 %v8013_v28, %v8890_v63  ;;  %v8891_v43 = vld [vmem:[#allocation133_spill] sm:$0xff]  ;;  %v8902_v63 = vld [vmem:[#allocation84_spill] sm:$0xff] }
 0x6d6   : > { %4027 = vst [vmem:[%s7840_s25 + $0x30] sm:$0xff] %v4010_v9  ;;  %v3753_v52 = vpop.permute.xlu0 %3752  ;;  %v3226_v58 = vpop.permute.xlu1 %3225  ;;  %v8893_v9 = vld [vmem:[#allocation43_spill] sm:$0xff] }
 0x6d7   : > { %v3792_v40 = vmul.f32 %v3753_v52, %v8881_v36  ;;  %v3280_v30 = vmul.f32 %v3226_v58, %v8882_v39  ;;  %5099 = vset.pattern.permute.xlu1 %v8811_v23  ;;  %v8895_v39 = vld [vmem:[#allocation15_spill] sm:$0xff] }
 0x6d8   : > { %5120 = vset.pattern.permute.xlu0 %v8817_v48  ;;  %3364 = vperm.xlu1 %5099, %v8062_v51  }
 0x6d9   : > { %v3809_v61 = vadd.f32 %v3792_v40, %v3707_v60  ;;  %v3399_v31 = vadd.f32 %v3382_v41, %v3280_v30  ;;  %3980 = vperm.xlu0 %5120, %v8016_v1   ;;  %v3790_v1 = vmul.f32 %v8001_v42, %v8887_v14  ;;  %v8892_v42 = vld [vmem:[#allocation131_spill] sm:$0xff]  ;;  %v8894_v41 = vld [vmem:[#allocation69_spill] sm:$0xff]  ;;  %v8896_v30 = vld [vmem:[#allocation42_spill] sm:$0xff] }
 0x6da   : > { %v3231_v32 = vpop.permute.xlu1 %3230  ;;  %v3994_v0 = vmul.f32 %v8028_v29, %v8892_v42 }
 0x6db   : > { %v3501_v8 = vadd.f32 %v3484_v15, %v3399_v31  ;;  %v3855_v59 = vpop.permute.xlu0 %3854  ;;  %v3281_v27 = vmul.f32 %v3231_v32, %v8888_v62  ;;  %v8897_v32 = vld [vmem:[#allocation78_spill] sm:$0xff] }
 0x6dc   : > { %v3894_v33 = vmul.f32 %v3855_v59, %v8885_v17  ;;  %5100 = vset.pattern.permute.xlu1 %v8812_v35 }
 0x6dd   : > { %v3603_v37 = vadd.f32 %v3586_v44, %v3501_v8  ;;  %3466 = vperm.xlu1 %5100, %v8062_v51   ;;  %v8898_v8 = vld [vmem:[#allocation49_spill] sm:$0xff] }
 0x6de   : > { %v3911_v54 = vadd.f32 %v3894_v33, %v3809_v61 }
 0x6df   : > { %v3705_v19 = vadd.f32 %v3688_v11, %v3603_v37  ;;  %v3341_v46 = vpop.permute.xlu1 %3340  ;;  %v8899_v11 = vld [vmem:[#allocation103_spill] sm:$0xff] }
 0x6e0   : > { %v3383_v24 = vmul.f32 %v3341_v46, %v8889_v55  ;;  %v3957_v38 = vpop.permute.xlu0 %3956  ;;  %v8901_v55 = vld [vmem:[#allocation113_spill] sm:$0xff] }
 0x6e1   : > { %v3807_v34 = vadd.f32 %v3790_v1, %v3705_v19  ;;  %v3996_v13 = vmul.f32 %v3957_v38, %v8891_v43  ;;  %5101 = vset.pattern.permute.xlu1 %v8813_v2  ;;  %v5205_v1 = vpop.eup %5204 }
 0x6e2   : > { %v3400_v3 = vadd.f32 %v3383_v24, %v3281_v27  ;;  %3568 = vperm.xlu1 %5101, %v8062_v51   ;;  %v3187_v27 = vmul.f32 %v5205_v1, %v7701_v16 }
 0x6e3   : > { %v3909_v10 = vadd.f32 %v3892_v53, %v3807_v34  ;;  %v4013_v20 = vadd.f32 %v3996_v13, %v3911_v54  ;;  %v8900_v54 = vld [vmem:[#allocation75_spill] sm:$0xff] }
 0x6e4   : > { %v3443_v49 = vpop.permute.xlu1 %3442 }
 0x6e5   : > { %v4011_v60 = vadd.f32 %v3994_v0, %v3909_v10  ;;  %4030 = vst [vmem:[%s7840_s25 + $0x48] sm:$0xff] %v4013_v20  ;;  %v3485_v52 = vmul.f32 %v3443_v49, %v8893_v9  ;;  %v3246_v58 = vpop.permute.xlu0 %3245  ;;  %v8905_v9 = vld [vmem:[#allocation118_spill] sm:$0xff] }
 0x6e6   : > { %5102 = vset.pattern.permute.xlu1 %v8814_v50  ;;  %v3284_v29 = vmul.f32 %v3246_v58, %v8895_v39 }
 0x6e7   : > { %4028 = vst [vmem:[%s7840_s25 + $0x38] sm:$0xff] %v4011_v60  ;;  %v3502_v28 = vadd.f32 %v3485_v52, %v3400_v3  ;;  %3670 = vperm.xlu1 %5102, %v8062_v51   ;;  %v8903_v3 = vld [vmem:[#allocation132_spill] sm:$0xff] }
 0x6e9   : > { %v3545_v18 = vpop.permute.xlu1 %3544 }
 0x6ea   : > { %v3587_v36 = vmul.f32 %v3545_v18, %v8894_v41  ;;  %v3353_v40 = vpop.permute.xlu0 %3352  ;;  %v8907_v41 = vld [vmem:[#allocation40_spill] sm:$0xff] }
 0x6eb   : > { %v3386_v12 = vmul.f32 %v3353_v40, %v8896_v30  ;;  %5103 = vset.pattern.permute.xlu1 %v8815_v21 }
 0x6ec   : > { %v3604_v15 = vadd.f32 %v3587_v36, %v3502_v28  ;;  %3772 = vperm.xlu1 %5103, %v8062_v51   ;;  %v8906_v28 = vld [vmem:[#allocation14_spill] sm:$0xff] }
 0x6ed   : > { %v3403_v61 = vadd.f32 %v3386_v12, %v3284_v29 }
 0x6ee   : > { %v3647_v31 = vpop.permute.xlu1 %3646 }
 0x6ef   : > { %v3689_v45 = vmul.f32 %v3647_v31, %v8897_v32  ;;  %v3455_v44 = vpop.permute.xlu0 %3454 }
 0x6f0   : > { %v3488_v59 = vmul.f32 %v3455_v44, %v8898_v8  ;;  %5104 = vset.pattern.permute.xlu1 %v8816_v6 }
 0x6f1   : > { %v3706_v17 = vadd.f32 %v3689_v45, %v3604_v15  ;;  %3874 = vperm.xlu1 %5104, %v8062_v51   ;;  %v8909_v15 = vld [vmem:[#allocation47_spill] sm:$0xff]  ;;  %v8910_v45 = vld [vmem:[#allocation73_spill] sm:$0xff] }
 0x6f2   : > { %v3505_v33 = vadd.f32 %v3488_v59, %v3403_v61  ;;  %v8911_v59 = vld [vmem:[#allocation19_spill] sm:$0xff] }
 0x6f3   : > { %v3749_v57 = vpop.permute.xlu1 %3748 }
 0x6f4   : > { %v3791_v37 = vmul.f32 %v3749_v57, %v8899_v11  ;;  %v3557_v4 = vpop.permute.xlu0 %3556 }
 0x6f5   : > { %v3590_v14 = vmul.f32 %v3557_v4, %v8900_v54  ;;  %5105 = vset.pattern.permute.xlu1 %v8817_v48  ;;  %v8913_v4 = vld [vmem:[#allocation82_spill] sm:$0xff] }
 0x6f6   : > { %v3808_v19 = vadd.f32 %v3791_v37, %v3706_v17  ;;  %3976 = vperm.xlu1 %5105, %v8062_v51   ;;  %v8904_v51 = vld [vmem:[#allocation108_spill] sm:$0xff] }
 0x6f7   : > { %v3607_v46 = vadd.f32 %v3590_v14, %v3505_v33  ;;  %v8912_v33 = vld [vmem:[#allocation46_spill] sm:$0xff] }
 0x6f8   : > { %v3851_v62 = vpop.permute.xlu1 %3850 }
 0x6f9   : > { %v3893_v24 = vmul.f32 %v3851_v62, %v8901_v55  ;;  %v3659_v38 = vpop.permute.xlu0 %3658  ;;  %v8915_v55 = vld [vmem:[#allocation107_spill] sm:$0xff] }
 0x6fa   : > { %v3692_v53 = vmul.f32 %v3659_v38, %v8902_v63  ;;  %5113 = vset.pattern.permute.xlu1 %v8818_v56  ;;  %v8916_v63 = vld [vmem:[#allocation79_spill] sm:$0xff] }
 0x6fb   : > { %v3910_v34 = vadd.f32 %v3893_v24, %v3808_v19  ;;  %3270 = vperm.xlu1 %5113, %v3187_v27  }
 0x6fc   : > { %v3709_v43 = vadd.f32 %v3692_v53, %v3607_v46 }
 0x6fd   : > { %v3953_v13 = vpop.permute.xlu1 %3952 }
 0x6fe   : > { %v3995_v42 = vmul.f32 %v3953_v13, %v8903_v3  ;;  %v3761_v0 = vpop.permute.xlu0 %3760  ;;  %v8917_v13 = vld [vmem:[#allocation117_spill] sm:$0xff] }
 0x6ff   : > { %v3794_v10 = vmul.f32 %v3761_v0, %v8904_v51  ;;  %5114 = vset.pattern.permute.xlu1 %v8811_v23  ;;  %v8908_v23 = vld [vmem:[#allocation135_spill] sm:$0xff] }
 0x700   : > { %v4012_v16 = vadd.f32 %v3995_v42, %v3910_v34  ;;  %3372 = vperm.xlu1 %5114, %v3187_v27  }
 0x701   : > { %v3811_v20 = vadd.f32 %v3794_v10, %v3709_v43 }
 0x702   : > { %4029 = vst [vmem:[%s7840_s25 + $0x40] sm:$0xff] %v4012_v16  ;;  %v3241_v49 = vpop.permute.xlu1 %3240 }
 0x703   : > { %v3863_v60 = vpop.permute.xlu0 %3862  ;;  %v3283_v18 = vmul.f32 %v3241_v49, %v8906_v28  ;;  %v8921_v28 = vld [vmem:[#allocation121_spill] sm:$0xff] }
 0x704   : > { %v3896_v56 = vmul.f32 %v3863_v60, %v8905_v9  ;;  %5115 = vset.pattern.permute.xlu1 %v8812_v35  ;;  %v8920_v9 = vld [vmem:[#allocation112_spill] sm:$0xff] }
 0x705   : > { %3474 = vperm.xlu1 %5115, %v3187_v27  }
 0x706   : > { %v3913_v52 = vadd.f32 %v3896_v56, %v3811_v20  ;;  %v8919_v20 = vld [vmem:[#allocation134_spill] sm:$0xff] }
 0x707   : > { %v3349_v58 = vpop.permute.xlu1 %3348 }
 0x708   : > { %v3385_v36 = vmul.f32 %v3349_v58, %v8907_v41  ;;  %v3965_v40 = vpop.permute.xlu0 %3964 }
 0x709   : > { %v3998_v39 = vmul.f32 %v3965_v40, %v8908_v23  ;;  %5116 = vset.pattern.permute.xlu1 %v8813_v2  ;;  %v8922_v40 = vld [vmem:[#allocation18_spill] sm:$0xff] }
 0x70a   : > { %v3402_v29 = vadd.f32 %v3385_v36, %v3283_v18  ;;  %3576 = vperm.xlu1 %5116, %v3187_v27  }
 0x70b   : > { %v4015_v30 = vadd.f32 %v3998_v39, %v3913_v52  ;;  %v8923_v39 = vld [vmem:[#allocation44_spill] sm:$0xff] }
 0x70c   : > { %v3451_v12 = vpop.permute.xlu1 %3450 }
 0x70d   : > { %4032 = vst [vmem:[%s7840_s25 + $0x58] sm:$0xff] %v4015_v30  ;;  %v3487_v61 = vmul.f32 %v3451_v12, %v8909_v15  ;;  %v3256_v35 = vpop.permute.xlu0 %3255  ;;  %v8924_v12 = vld [vmem:[#allocation137_spill] sm:$0xff] }
 0x70e   : > { %5117 = vset.pattern.permute.xlu1 %v8814_v50  ;;  %v3286_v17 = vmul.f32 %v3256_v35, %v8911_v59  ;;  %v8914_v50 = vld [vmem:[#allocation53_spill] sm:$0xff] }
 0x70f   : > { %v3504_v31 = vadd.f32 %v3487_v61, %v3402_v29  ;;  %3678 = vperm.xlu1 %5117, %v3187_v27  }
 0x711   : > { %v3553_v32 = vpop.permute.xlu1 %3552 }
 0x712   : > { %v3589_v44 = vmul.f32 %v3553_v32, %v8910_v45  ;;  %v3361_v8 = vpop.permute.xlu0 %3360  ;;  %v8925_v32 = vld [vmem:[#allocation51_spill] sm:$0xff] }
 0x713   : > { %v3388_v2 = vmul.f32 %v3361_v8, %v8912_v33  ;;  %5118 = vset.pattern.permute.xlu1 %v8815_v21 }
 0x714   : > { %v3606_v57 = vadd.f32 %v3589_v44, %v3504_v31  ;;  %3780 = vperm.xlu1 %5118, %v3187_v27  }
 0x715   : > { %v3405_v11 = vadd.f32 %v3388_v2, %v3286_v17  ;;  %v8926_v17 = vld [vmem:[#allocation77_spill] sm:$0xff] }
 0x716   : > { %v3655_v37 = vpop.permute.xlu1 %3654 }
 0x717   : > { %v3691_v54 = vmul.f32 %v3655_v37, %v8913_v4  ;;  %v3463_v14 = vpop.permute.xlu0 %3462  ;;  %v8928_v37 = vld [vmem:[#allocation50_spill] sm:$0xff] }
 0x718   : > { %v3490_v1 = vmul.f32 %v3463_v14, %v8914_v50  ;;  %5119 = vset.pattern.permute.xlu1 %v8816_v6  ;;  %v8918_v6 = vld [vmem:[#allocation87_spill] sm:$0xff] }
 0x719   : > { %v3708_v19 = vadd.f32 %v3691_v54, %v3606_v57  ;;  %3882 = vperm.xlu1 %5119, %v3187_v27   ;;  %v8927_v57 = vld [vmem:[#allocation21_spill] sm:$0xff] }
 0x71a   : > { %v3507_v46 = vadd.f32 %v3490_v1, %v3405_v11  ;;  %v8929_v1 = vld [vmem:[#allocation86_spill] sm:$0xff] }
 0x71b   : > { %v3757_v62 = vpop.permute.xlu1 %3756 }
 0x71c   : > { %v3793_v24 = vmul.f32 %v3757_v62, %v8915_v55  ;;  %v3565_v38 = vpop.permute.xlu0 %3564  ;;  %v8930_v62 = vld [vmem:[#allocation55_spill] sm:$0xff] }
 0x71d   : > { %v3592_v21 = vmul.f32 %v3565_v38, %v8916_v63  ;;  %5121 = vset.pattern.permute.xlu1 %v8817_v48 }
 0x71e   : > { %v3810_v53 = vadd.f32 %v3793_v24, %v3708_v19  ;;  %3984 = vperm.xlu1 %5121, %v3187_v27  }
 0x71f   : > { %v3609_v34 = vadd.f32 %v3592_v21, %v3507_v46  ;;  %v8931_v21 = vld [vmem:[#allocation111_spill] sm:$0xff] }
 0x720   : > { %v3859_v43 = vpop.permute.xlu1 %3858 }
 0x721   : > { %v3895_v3 = vmul.f32 %v3859_v43, %v8917_v13  ;;  %v3667_v42 = vpop.permute.xlu0 %3666  ;;  %v8932_v43 = vld [vmem:[#allocation83_spill] sm:$0xff] }
 0x722   : > { %v3694_v0 = vmul.f32 %v3667_v42, %v8918_v6 }
 0x723   : > { %v3912_v51 = vadd.f32 %v3895_v3, %v3810_v53 }
 0x724   : > { %v3711_v10 = vadd.f32 %v3694_v0, %v3609_v34  ;;  %v8933_v0 = vld [vmem:[#allocation120_spill] sm:$0xff] }
 0x725   : > { %v3961_v16 = vpop.permute.xlu1 %3960 }
 0x726   : > { %v3997_v49 = vmul.f32 %v3961_v16, %v8919_v20  ;;  %v3769_v60 = vpop.permute.xlu0 %3768  ;;  %v8934_v16 = vld [vmem:[#allocation90_spill] sm:$0xff] }
 0x727   : > { %v3796_v56 = vmul.f32 %v3769_v60, %v8920_v9 }
 0x728   : > { %v4014_v48 = vadd.f32 %v3997_v49, %v3912_v51 }
 0x729   : > { %v3813_v52 = vadd.f32 %v3796_v56, %v3711_v10  ;;  %v8935_v56 = vld [vmem:[#allocation136_spill] sm:$0xff] }
 0x72a   : > { %4031 = vst [vmem:[%s7840_s25 + $0x50] sm:$0xff] %v4014_v48  ;;  %v3251_v27 = vpop.permute.xlu1 %3250 }
 0x72b   : > { %v3871_v58 = vpop.permute.xlu0 %3870  ;;  %v3285_v23 = vmul.f32 %v3251_v27, %v8922_v40  ;;  %v8936_v27 = vld [vmem:[#allocation116_spill] sm:$0xff]  ;;  %v8937_v40 = vld [vmem:[#allocation125_spill] sm:$0xff] }
 0x72c   : > { %v3898_v18 = vmul.f32 %v3871_v58, %v8921_v28 }
 0x72e   : > { %v3915_v41 = vadd.f32 %v3898_v18, %v3813_v52 }
 0x72f   : > { %v3357_v36 = vpop.permute.xlu1 %3356 }
 0x730   : > { %v3387_v29 = vmul.f32 %v3357_v36, %v8923_v39  ;;  %v3973_v30 = vpop.permute.xlu0 %3972 }
 0x731   : > { %v4000_v15 = vmul.f32 %v3973_v30, %v8924_v12  ;;  %v8938_v30 = vld [vmem:[#allocation20_spill] sm:$0xff] }
 0x732   : > { %v3404_v61 = vadd.f32 %v3387_v29, %v3285_v23 }
 0x733   : > { %v4017_v35 = vadd.f32 %v4000_v15, %v3915_v41  ;;  %v8939_v15 = vld [vmem:[#allocation48_spill] sm:$0xff] }
 0x734   : > { %v3459_v31 = vpop.permute.xlu1 %3458 }
 0x735   : > { %4034 = vst [vmem:[%s7840_s25 + $0x68] sm:$0xff] %v4017_v35  ;;  %v3489_v45 = vmul.f32 %v3459_v31, %v8925_v32  ;;  %v3266_v44 = vpop.permute.xlu0 %3265  ;;  %v8940_v31 = vld [vmem:[#allocation139_spill] sm:$0xff] }
 0x736   : > { %v3288_v11 = vmul.f32 %v3266_v44, %v8927_v57  ;;  %v8942_v57 = vld [vmem:[#allocation81_spill] sm:$0xff] }
 0x737   : > { %v3506_v8 = vadd.f32 %v3489_v45, %v3404_v61 }
 0x739   : > { %v3561_v59 = vpop.permute.xlu1 %3560 }
 0x73a   : > { %v3591_v33 = vmul.f32 %v3561_v59, %v8926_v17  ;;  %v3369_v2 = vpop.permute.xlu0 %3368  ;;  %v8941_v59 = vld [vmem:[#allocation54_spill] sm:$0xff] }
 0x73b   : > { %v3390_v4 = vmul.f32 %v3369_v2, %v8928_v37 }
 0x73c   : > { %v3608_v54 = vadd.f32 %v3591_v33, %v3506_v8 }
 0x73d   : > { %v3407_v14 = vadd.f32 %v3390_v4, %v3288_v11 }
 0x73e   : > { %v3663_v50 = vpop.permute.xlu1 %3662 }
 0x73f   : > { %v3693_v19 = vmul.f32 %v3663_v50, %v8929_v1  ;;  %v3471_v46 = vpop.permute.xlu0 %3470 }
 0x740   : > { %v3492_v55 = vmul.f32 %v3471_v46, %v8930_v62 }
 0x741   : > { %v3710_v24 = vadd.f32 %v3693_v19, %v3608_v54  ;;  %v8943_v54 = vld [vmem:[#allocation88_spill] sm:$0xff]  ;;  %v8944_v19 = vld [vmem:[#allocation115_spill] sm:$0xff] }
 0x742   : > { %v3509_v38 = vadd.f32 %v3492_v55, %v3407_v14 }
 0x743   : > { %v3765_v63 = vpop.permute.xlu1 %3764 }
 0x744   : > { %v3795_v53 = vmul.f32 %v3765_v63, %v8931_v21  ;;  %v3573_v34 = vpop.permute.xlu0 %3572 }
 0x745   : > { %v3594_v13 = vmul.f32 %v3573_v34, %v8932_v43 }
 0x746   : > { %v3812_v3 = vadd.f32 %v3795_v53, %v3710_v24  ;;  %v8945_v24 = vld [vmem:[#allocation123_spill] sm:$0xff]  ;;  %v8946_v53 = vld [vmem:[#allocation138_spill] sm:$0xff] }
 0x747   : > { %v3611_v42 = vadd.f32 %v3594_v13, %v3509_v38 }
 0x748   : > { %v3867_v6 = vpop.permute.xlu1 %3866 }
 0x749   : > { %v3897_v51 = vmul.f32 %v3867_v6, %v8933_v0  ;;  %v3675_v10 = vpop.permute.xlu0 %3674  ;;  %v8947_v6 = vld [vmem:[#allocation52_spill] sm:$0xff] }
 0x74a   : > { %v3696_v20 = vmul.f32 %v3675_v10, %v8934_v16 }
 0x74b   : > { %v3914_v49 = vadd.f32 %v3897_v51, %v3812_v3 }
 0x74c   : > { %v3713_v60 = vadd.f32 %v3696_v20, %v3611_v42 }
 0x74d   : > { %v3969_v9 = vpop.permute.xlu1 %3968 }
 0x74e   : > { %v3999_v48 = vmul.f32 %v3969_v9, %v8935_v56  ;;  %v3777_v52 = vpop.permute.xlu0 %3776 }
 0x74f   : > { %v3798_v58 = vmul.f32 %v3777_v52, %v8936_v27 }
 0x750   : > { %v4016_v28 = vadd.f32 %v3999_v48, %v3914_v49 }
 0x751   : > { %v3815_v18 = vadd.f32 %v3798_v58, %v3713_v60  ;;  %v8948_v60 = vld [vmem:[#allocation85_spill] sm:$0xff] }
 0x752   : > { %4033 = vst [vmem:[%s7840_s25 + $0x60] sm:$0xff] %v4016_v28  ;;  %v3261_v41 = vpop.permute.xlu1 %3260 }
 0x753   : > { %v3879_v36 = vpop.permute.xlu0 %3878  ;;  %v3287_v12 = vmul.f32 %v3261_v41, %v8938_v30 }
 0x754   : > { %v3900_v23 = vmul.f32 %v3879_v36, %v8937_v40 }
 0x756   : > { %v3917_v39 = vadd.f32 %v3900_v23, %v3815_v18 }
 0x757   : > { %v3365_v29 = vpop.permute.xlu1 %3364 }
 0x758   : > { %v3389_v61 = vmul.f32 %v3365_v29, %v8939_v15  ;;  %v3981_v35 = vpop.permute.xlu0 %3980 }
 0x759   : > { %v4002_v32 = vmul.f32 %v3981_v35, %v8940_v31 }
 0x75a   : > { %v3406_v45 = vadd.f32 %v3389_v61, %v3287_v12 }
 0x75b   : > { %v4019_v44 = vadd.f32 %v4002_v32, %v3917_v39 }
 0x75c   : > { %v3467_v8 = vpop.permute.xlu1 %3466 }
 0x75d   : > { %4036 = vst [vmem:[%s7840_s25 + $0x78] sm:$0xff] %v4019_v44  ;;  %v3491_v17 = vmul.f32 %v3467_v8, %v8941_v59 }
 0x75f   : > { %v3508_v33 = vadd.f32 %v3491_v17, %v3406_v45 }
 0x761   : > { %v3569_v2 = vpop.permute.xlu1 %3568 }
 0x762   : > { %v3593_v11 = vmul.f32 %v3569_v2, %v8942_v57 }
 0x764   : > { %v3610_v37 = vadd.f32 %v3593_v11, %v3508_v33 }
 0x766   : > { %v3671_v4 = vpop.permute.xlu1 %3670 }
 0x767   : > { %v3695_v14 = vmul.f32 %v3671_v4, %v8943_v54 }
 0x769   : > { %v3712_v50 = vadd.f32 %v3695_v14, %v3610_v37 }
 0x76b   : > { %v3773_v1 = vpop.permute.xlu1 %3772 }
 0x76c   : > { %v3797_v46 = vmul.f32 %v3773_v1, %v8944_v19 }
 0x76e   : > { %v3814_v62 = vadd.f32 %v3797_v46, %v3712_v50 }
 0x770   : > { %v3875_v55 = vpop.permute.xlu1 %3874 }
 0x771   : > { %v3899_v38 = vmul.f32 %v3875_v55, %v8945_v24 }
 0x773   : > { %v3916_v63 = vadd.f32 %v3899_v38, %v3814_v62 }
 0x775   : > { %v3977_v21 = vpop.permute.xlu1 %3976 }
 0x776   : > { %v4001_v34 = vmul.f32 %v3977_v21, %v8946_v53 }
 0x778   : > { %v4018_v43 = vadd.f32 %v4001_v34, %v3916_v63 }
 0x77a   : > { %4035 = vst [vmem:[%s7840_s25 + $0x70] sm:$0xff] %v4018_v43  ;;  %v3271_v13 = vpop.permute.xlu1 %3270 }
 0x77b   : > { %v3289_v42 = vmul.f32 %v3271_v13, %v8757_v7 }
 0x77f   : > { %v3373_v3 = vpop.permute.xlu1 %3372 }
 0x780   : > { %v3391_v0 = vmul.f32 %v3373_v3, %v8947_v6 }
 0x782   : > { %v3408_v51 = vadd.f32 %v3391_v0, %v3289_v42 }
 0x784   : > { %v3475_v10 = vpop.permute.xlu1 %3474 }
 0x785   : > { %v3493_v16 = vmul.f32 %v3475_v10, %v8759_v47 }
 0x787   : > { %v3510_v20 = vadd.f32 %v3493_v16, %v3408_v51 }
 0x789   : > { %v3577_v49 = vpop.permute.xlu1 %3576 }
 0x78a   : > { %v3595_v9 = vmul.f32 %v3577_v49, %v8948_v60 }
 0x78c   : > { %v3612_v56 = vadd.f32 %v3595_v9, %v3510_v20 }
 0x78e   : > { %v3679_v48 = vpop.permute.xlu1 %3678 }
 0x78f   : > { %v3697_v52 = vmul.f32 %v3679_v48, %v8761_v22 }
 0x791   : > { %v3714_v27 = vadd.f32 %v3697_v52, %v3612_v56 }
 0x793   : > { %v3781_v7 = vpop.permute.xlu1 %3780 }
 0x794   : > { %v3799_v58 = vmul.f32 %v3781_v7, %v8760_v5 }
 0x796   : > { %v3816_v28 = vadd.f32 %v3799_v58, %v3714_v27 }
 0x798   : > { %v3883_v18 = vpop.permute.xlu1 %3882 }
 0x799   : > { %v3901_v41 = vmul.f32 %v3883_v18, %v6833_v26 }
 0x79b   : > { %v3918_v47 = vadd.f32 %v3901_v41, %v3816_v28 }
 0x79d   : > { %v3985_v36 = vpop.permute.xlu1 %3984 }
 0x79e   : > { %v4003_v40 = vmul.f32 %v3985_v36, %v6904_v25 }
 0x7a0   : > { %v4020_v22 = vadd.f32 %v4003_v40, %v3918_v47 }
 0x7a2   : > { %4037 = vst [vmem:[%s7840_s25 + $0x80] sm:$0xff] %v4020_v22 }
 0x7a3   : > { %5227 = shalt.err (!%p5224_p3)
}
 0x7a4   : > { %s5228_s8 = scalar_lea.hbm %s8195_s30, 2176  ;;  %s5232_s11 = scalar_lea.hbm %s8244_s3, 4352 }
 0x7a5   : > { %p5229_p4 = scmp.ne.s32.totalorder %s8195_s30, %s5228_s8  ;;  %p5233_p9 = scmp.lt.u32.totalorder %s8195_s30, %s8244_s3 }
 0x7a6   : > { %p5234_p10 = scmp.lt.u32.totalorder %s5232_s11, %s5228_s8  ;;  %p5236_p12 = scmp.lt.u32.totalorder %s5228_s8, %s8195_s30 }
 0x7a7   : > { %p5230_p7 = pnand %p5229_p4, %p5350_p5 }
 0x7a8   : > { %p5235_p11 = por %p5234_p10, %p5233_p9 }
 0x7a9   : > { %p5231_p8 = pneg %p5230_p7 }
 0x7aa   : > { %p5237_p13 = por %p5236_p12, %p5235_p11 }
 0x7ac   : > { %p5238_p0 = pnand %p5237_p13, %p5231_p8 }
 0x7ae   : > { %5241 = shalt.err (!%p5238_p0)
}
 0x7af   : > { %s5290_s20 = smov 128   ;;  %s5291_s24 = smov 8  }
 0x7b0   : > { %4921 = dma.vmem_to_hbm [thread:$0]  (%p5350_p5), %s8190_s27, 2176, %s8195_s30, %s8200_s4, %s5290_s20, %s5290_s20, %s5291_s24  }
 0x7b1 PF: > { %p4927_p1 = scmp.ge.s32.totalorder %s5276_s15, 2  ;;  %s4067_s25 = sand.u32 1, %s5264_s12  }
 0x7b2   : > { %s4068_s26 = scalar_lea.sflag [#allocation4], %s4067_s25 }
 0x7b3   : > { %p4924_p2 = pnand %p4927_p1, %p5354_p6 }
 0x7b5   : > { %5259 = dma.done.wait (!%p4924_p2), %s4068_s26, 2176  }
 0x7b6   : > { %5261 = vsyncadd (!%p4924_p2), %s4068_s26, 4294965120  ;;  %p13_p3 = scmp.ge.s32.totalorder %s5337_s18, 4   ;;  %s8949_s12 = smov %s5268_s13 }
 0x7b7   : > { %s8950_s13 = smov %s5272_s14  ;;  %s8951_s14 = smov %s5348_s21 }
 0x7b8   : > { %s8952_s15 = smov %s5337_s18  ;;  %15 = sbr.rel (!%p13_p3) target bundleno = 3 (0x3), region = 74 }
 0x7bf   :  { %4073 = vsyncpa [#allocation4], 1 }
 0x7c0   :  { %4075 = vsyncpa [#allocation4 + $0x1], 1 }

</bundles_post_ra>
